<compile_context>
chip_gen: v5e
topology: v5e:2x2
jax: 0.10.0
libtpu: 0.0.40
codegen_flags: <defaults>
</compile_context>

<pallas_src>
import jax
import jax.numpy as jnp
from jax import lax
from jax.experimental import pallas as pl
from jax.experimental.pallas import tpu as pltpu

EMBEDDING_DIM = 64
HIDDEN = EMBEDDING_DIM // 2          # 32
IN_FEATURES = 50176                  # 224 * 224 (flattened input)
OUT_DIM = 4                          # len(np.unique(y_no_hosp)) -- synthetic value


def _classifier_kernel(x_ref, w1_ref, b1_ref, w2_ref, b2_ref, out_ref, acc_ref):
    """Fused Classifier forward.  Grid axis 0 walks the K (reduction) tiles.

    Per step:   acc (B, HIDDEN) += x_tile (B, tk) . W1_tile (HIDDEN, tk)^T
    Final step: h = ReLU(acc + b1); logits = h . W2^T + b2  (Dropout = identity,
    eval mode), written straight to out_ref.
    """
    k = pl.program_id(0)

    @pl.when(k == 0)
    def _():
        acc_ref[...] = jnp.zeros_like(acc_ref)

    # W1 kept in native (HIDDEN, K) layout -> lane-dense tiles; contraction on
    # both operands' last dims, MXU-consumable without materialized transposes.
    acc_ref[...] += lax.dot_general(
        x_ref[...], w1_ref[...],
        (((1,), (1,)), ((), ())),            # contract x dim 1 with w1 dim 1
        preferred_element_type=jnp.float32,
    )

    @pl.when(k == pl.num_programs(0) - 1)
    def _():
        h = jnp.maximum(acc_ref[...] + b1_ref[...], 0.0)   # bias + ReLU
        # TODO(synk): Dropout(0.5) is the identity in eval mode; training-mode
        # stochastic masking (pltpu.prng_*) with 1/(1-p) scaling not implemented.
        out = lax.dot_general(
            h, w2_ref[...],                  # W2 native (OUT_DIM, HIDDEN)
            (((1,), (1,)), ((), ())),
            preferred_element_type=jnp.float32,
        )
        out_ref[...] = (out + b2_ref[...]).astype(out_ref.dtype)


def classifier_forward(x, w1, b1, w2, b2, *, tk=25088):
    """x: (B, C, H, W) float32 with C*H*W == 50176. Returns logits (B, OUT_DIM).

    w1: (HIDDEN, IN_FEATURES), b1: (HIDDEN,), w2: (OUT_DIM, HIDDEN), b2: (OUT_DIM,)
    -- native PyTorch nn.Linear layouts, used as-is (no transposes anywhere).
    """
    B = x.shape[0]
    x_flat = x.reshape(B, -1)                # nn.Flatten()
    K = x_flat.shape[1]
    assert K == IN_FEATURES
    assert K % tk == 0 and tk % 128 == 0
    k_steps = K // tk

    b1_2d = b1.reshape(1, HIDDEN)
    b2_2d = b2.reshape(1, OUT_DIM)

    flops = 2 * B * K * HIDDEN + 2 * B * HIDDEN * OUT_DIM
    bytes_accessed = 4 * (B * K + HIDDEN * K + HIDDEN
                          + OUT_DIM * HIDDEN + OUT_DIM + B * OUT_DIM)

    return pl.pallas_call(
        _classifier_kernel,
        out_shape=jax.ShapeDtypeStruct((B, OUT_DIM), jnp.float32),
        grid_spec=pltpu.PrefetchScalarGridSpec(
            num_scalar_prefetch=0,
            grid=(k_steps,),
            in_specs=[
                # x tile: (B, tk), lane-dense
                pl.BlockSpec((B, tk), lambda k: (0, k)),
                # W1 tile: native layout (HIDDEN, tk), lane-dense
                pl.BlockSpec((HIDDEN, tk), lambda k: (0, k)),
                # tiny epilogue params, resident across the whole grid
                pl.BlockSpec((1, HIDDEN), lambda k: (0, 0)),
                pl.BlockSpec((OUT_DIM, HIDDEN), lambda k: (0, 0)),
                pl.BlockSpec((1, OUT_DIM), lambda k: (0, 0)),
            ],
            out_specs=pl.BlockSpec((B, OUT_DIM), lambda k: (0, 0)),
            scratch_shapes=[pltpu.VMEM((B, HIDDEN), jnp.float32)],
        ),
        compiler_params=pltpu.CompilerParams(
            dimension_semantics=("arbitrary",),   # K is a reduction axis
        ),
        cost_estimate=pl.CostEstimate(
            flops=flops, transcendentals=0, bytes_accessed=bytes_accessed),
    )(x_flat, w1, b1_2d, w2, b2_2d)


def _init_params(key):
    """Deterministic synthetic parameters (PyTorch nn.Linear shapes)."""
    k1, k2, k3, k4 = jax.random.split(key, 4)
    s1 = 1.0 / jnp.sqrt(IN_FEATURES)
    s2 = 1.0 / jnp.sqrt(HIDDEN)
    w1 = jax.random.uniform(k1, (HIDDEN, IN_FEATURES), jnp.float32, -s1, s1)
    b1 = jax.random.uniform(k2, (HIDDEN,), jnp.float32, -s1, s1)
    w2 = jax.random.uniform(k3, (OUT_DIM, HIDDEN), jnp.float32, -s2, s2)
    b2 = jax.random.uniform(k4, (OUT_DIM,), jnp.float32, -s2, s2)
    return w1, b1, w2, b2


if __name__ == "__main__":
    key = jax.random.PRNGKey(0)
    kx, kp = jax.random.split(key)

    # Small batch; spatial dims imply 224*224*1 = 50176 flattened features.
    B, C, H, W = 2, 1, 224, 224
    x = jax.random.normal(kx, (B, C, H, W), jnp.float32)
    w1, b1, w2, b2 = _init_params(kp)

    fwd = jax.jit(classifier_forward)
    out = jax.block_until_ready(fwd(x, w1, b1, w2, b2))

    # Reference check in plain JAX (eval-mode dropout = identity).
    # Note: K-chunked f32 accumulation is not bit-identical to the fused
    # reference; it is well within the tolerance below.
    x_flat = x.reshape(B, -1)
    ref = jnp.maximum(x_flat @ w1.T + b1, 0.0) @ w2.T + b2
    assert out.shape == (B, OUT_DIM)
    assert jnp.allclose(out, ref, atol=1e-3, rtol=1e-3), "mismatch vs reference"

    print("KERNEL_OK")
</pallas_src>

<mosaic_0001>
module attributes {stable_mosaic.version = 11 : i64} {
  func.func @_classifier_kernel(%arg0: i32, %arg1: memref<2x25088xf32, #tpu.memory_space<vmem>>, %arg2: memref<32x25088xf32, #tpu.memory_space<vmem>>, %arg3: memref<1x32xf32, #tpu.memory_space<vmem>>, %arg4: memref<4x32xf32, #tpu.memory_space<vmem>>, %arg5: memref<1x4xf32, #tpu.memory_space<vmem>>, %arg6: memref<2x4xf32, #tpu.memory_space<vmem>>, %arg7: memref<2x32xf32, #tpu.memory_space<vmem>>) attributes {dimension_semantics = [#tpu.dimension_semantics<arbitrary>], iteration_bounds = array<i64: 2>, scalar_prefetch = 0 : i64, scratch_operands = 1 : i64, tpu.core_type = #tpu.core_type<tc>, window_params = [{transform_indices = @transform_0, window_bounds = array<i64: 2, 25088>}, {transform_indices = @transform_1, window_bounds = array<i64: 32, 25088>}, {pipeline_mode = #tpu.pipeline_mode<synchronous>, transform_indices = @transform_2, window_bounds = array<i64: 1, 32>}, {pipeline_mode = #tpu.pipeline_mode<synchronous>, transform_indices = @transform_3, window_bounds = array<i64: 4, 32>}, {pipeline_mode = #tpu.pipeline_mode<synchronous>, transform_indices = @transform_4, window_bounds = array<i64: 1, 4>}, {pipeline_mode = #tpu.pipeline_mode<synchronous>, transform_indices = @transform_5, window_bounds = array<i64: 2, 4>}]} {
    %c0_i32 = arith.constant 0 : i32
    %0 = arith.cmpi eq, %arg0, %c0_i32 : i32
    %1 = arith.extui %0 : i1 to i32
    %c0_i32_0 = arith.constant 0 : i32
    %2 = arith.cmpi ne, %1, %c0_i32_0 : i32
    scf.if %2 {
      %cst_9 = arith.constant 0.000000e+00 : f32
      %12 = vector.broadcast %cst_9 : f32 to vector<2x32xf32>
      %c0_10 = arith.constant 0 : index
      %c0_11 = arith.constant 0 : index
      %13 = vector.load %arg7[%c0_10, %c0_11] : memref<2x32xf32, #tpu.memory_space<vmem>>, vector<2x32xf32>
      tpu.vector_store %arg7[%c0_10, %c0_11], %12 {strides = array<i32>} : memref<2x32xf32, #tpu.memory_space<vmem>>, vector<2x32xf32>,
    } else {
    }
    %c0 = arith.constant 0 : index
    %c0_1 = arith.constant 0 : index
    %3 = vector.load %arg7[%c0, %c0_1] : memref<2x32xf32, #tpu.memory_space<vmem>>, vector<2x32xf32>
    %c0_2 = arith.constant 0 : index
    %c0_3 = arith.constant 0 : index
    %4 = vector.load %arg1[%c0_2, %c0_3] : memref<2x25088xf32, #tpu.memory_space<vmem>>, vector<2x25088xf32>
    %c0_4 = arith.constant 0 : index
    %c0_5 = arith.constant 0 : index
    %5 = vector.load %arg2[%c0_4, %c0_5] : memref<32x25088xf32, #tpu.memory_space<vmem>>, vector<32x25088xf32>
    %cst = arith.constant dense<0.000000e+00> : vector<2x32xf32>
    %6 = tpu.matmul %4, %5, %cst {dimension_numbers = #tpu.dot_dimension_numbers<[1], [1], [0], [0], [0, 0, 1, 0], [], []>} : vector<2x25088xf32>, vector<32x25088xf32>, vector<2x32xf32> -> vector<2x32xf32>
    %7 = arith.addf %3, %6 : vector<2x32xf32>
    %c0_6 = arith.constant 0 : index
    %c0_7 = arith.constant 0 : index
    %8 = vector.load %arg7[%c0_6, %c0_7] : memref<2x32xf32, #tpu.memory_space<vmem>>, vector<2x32xf32>
    tpu.vector_store %arg7[%c0_6, %c0_7], %7 {strides = array<i32>} : memref<2x32xf32, #tpu.memory_space<vmem>>, vector<2x32xf32>,
    %c1_i32 = arith.constant 1 : i32
    %9 = arith.cmpi eq, %arg0, %c1_i32 : i32
    %10 = arith.extui %9 : i1 to i32
    %c0_i32_8 = arith.constant 0 : i32
    %11 = arith.cmpi ne, %10, %c0_i32_8 : i32
    scf.if %11 {
      %c0_9 = arith.constant 0 : index
      %c0_10 = arith.constant 0 : index
      %12 = vector.load %arg7[%c0_9, %c0_10] : memref<2x32xf32, #tpu.memory_space<vmem>>, vector<2x32xf32>
      %c0_11 = arith.constant 0 : index
      %c0_12 = arith.constant 0 : index
      %13 = vector.load %arg3[%c0_11, %c0_12] : memref<1x32xf32, #tpu.memory_space<vmem>>, vector<1x32xf32>
      %14 = vector.broadcast %13 : vector<1x32xf32> to vector<2x32xf32>
      %15 = arith.addf %12, %14 : vector<2x32xf32>
      %cst_13 = arith.constant 0.000000e+00 : f32
      %16 = vector.broadcast %cst_13 : f32 to vector<2x32xf32>
      %17 = arith.maximumf %15, %16 : vector<2x32xf32>
      %c0_14 = arith.constant 0 : index
      %c0_15 = arith.constant 0 : index
      %18 = vector.load %arg4[%c0_14, %c0_15] : memref<4x32xf32, #tpu.memory_space<vmem>>, vector<4x32xf32>
      %cst_16 = arith.constant dense<0.000000e+00> : vector<2x4xf32>
      %19 = tpu.matmul %17, %18, %cst_16 {dimension_numbers = #tpu.dot_dimension_numbers<[1], [1], [0], [0], [0, 0, 1, 0], [], []>} : vector<2x32xf32>, vector<4x32xf32>, vector<2x4xf32> -> vector<2x4xf32>
      %c0_17 = arith.constant 0 : index
      %c0_18 = arith.constant 0 : index
      %20 = vector.load %arg5[%c0_17, %c0_18] : memref<1x4xf32, #tpu.memory_space<vmem>>, vector<1x4xf32>
      %21 = vector.broadcast %20 : vector<1x4xf32> to vector<2x4xf32>
      %22 = arith.addf %19, %21 : vector<2x4xf32>
      %c0_19 = arith.constant 0 : index
      %c0_20 = arith.constant 0 : index
      %23 = vector.load %arg6[%c0_19, %c0_20] : memref<2x4xf32, #tpu.memory_space<vmem>>, vector<2x4xf32>
      tpu.vector_store %arg6[%c0_19, %c0_20], %22 {strides = array<i32>} : memref<2x4xf32, #tpu.memory_space<vmem>>, vector<2x4xf32>,
    } else {
    }
    return
  }
  func.func @transform_0(%arg0: i32) -> (i32, i32) {
    %c0_i32 = arith.constant 0 : i32
    %c0_i32_0 = arith.constant 0 : i32
    return %c0_i32, %arg0 : i32, i32
  }
  func.func @transform_1(%arg0: i32) -> (i32, i32) {
    %c0_i32 = arith.constant 0 : i32
    %c0_i32_0 = arith.constant 0 : i32
    return %c0_i32, %arg0 : i32, i32
  }
  func.func @transform_2(%arg0: i32) -> (i32, i32) {
    %c0_i32 = arith.constant 0 : i32
    %c0_i32_0 = arith.constant 0 : i32
    %c0_i32_1 = arith.constant 0 : i32
    return %c0_i32, %c0_i32_0 : i32, i32
  }
  func.func @transform_3(%arg0: i32) -> (i32, i32) {
    %c0_i32 = arith.constant 0 : i32
    %c0_i32_0 = arith.constant 0 : i32
    %c0_i32_1 = arith.constant 0 : i32
    return %c0_i32, %c0_i32_0 : i32, i32
  }
  func.func @transform_4(%arg0: i32) -> (i32, i32) {
    %c0_i32 = arith.constant 0 : i32
    %c0_i32_0 = arith.constant 0 : i32
    %c0_i32_1 = arith.constant 0 : i32
    return %c0_i32, %c0_i32_0 : i32, i32
  }
  func.func @transform_5(%arg0: i32) -> (i32, i32) {
    %c0_i32 = arith.constant 0 : i32
    %c0_i32_0 = arith.constant 0 : i32
    %c0_i32_1 = arith.constant 0 : i32
    return %c0_i32, %c0_i32_0 : i32, i32
  }
}

</mosaic_0001>

<bundles_post_ra>
// kernel: classifier_forward.1
= control target key start
LH: loop header
LB: loop body
LE: loop exit
PB: predicated region body
PF: predicated region fallthrough
CT: control target
= control target key end

     0   :  { %10 = vsyncpa [#allocation4], 0  ;;  %s7012_s0 = inlined_call_operand.vmem [shape: f32[2,50176], index: 0, kind: input, shape index: {}]   ;;  %s7013_s1 = inlined_call_operand.hbm [shape: f32[32,50176], index: 1, kind: input, shape index: {}]   ;;  %s7014_s2 = inlined_call_operand.hbm [shape: f32[1,32], index: 2, kind: input, shape index: {}]   ;;  %s7015_s3 = inlined_call_operand.hbm [shape: f32[4,32], index: 3, kind: input, shape index: {}]   ;;  %s7016_s4 = inlined_call_operand.hbm [shape: f32[1,4], index: 4, kind: input, shape index: {}]   ;;  %s7017_s5 = inlined_call_operand.hbm [shape: f32[2,4], index: 5, kind: output, shape index: {}]  }
   0x1   :  { %12 = vsyncpa [#allocation4 + $0x1], 0 }
   0x2   :  { %13 = vsyncpa [#allocation7], 0 }
   0x3   :  { %14 = vsyncpa [#allocation10], 0 }
   0x4   :  { %15 = vsyncpa [#allocation5], 0  ;;  %s6039_s18 = smov 0   ;;  %s6041_s19 = smov 0  }
   0x5   :  { %s6043_s20 = smov 0   ;;  %s6045_s21 = smov 0  }
   0x6 LB: > { %s6058_s22 = sadd.s32 4294967295, %s5999_s21   ;;  %s6061_s23 = sadd.s32 1, %s5999_s21   ;;  %s5999_s21 = sphi %s6045_s21, %s7026_s21   ;;  %s5995_s20 = sphi %s6043_s20, %s7025_s20   ;;  %s5991_s19 = sphi %s6041_s19, %s7024_s19   ;;  %s5987_s18 = sphi %s6039_s18, %s7023_s18  }
   0x7   : > { %s51_s24 = ssub.s32 %s5999_s21, %s6061_s23  ;;  %s54_s25 = sadd.s32 1, %s5995_s20 }
   0x8   : > { %p52_p0 = scmp.eq.s32.totalorder %s51_s24, 0  ;;  %p61_p1 = scmp.ne.s32.totalorder %s5995_s20, %s5991_s19 }
   0x9   : > { %p62_p2 = scmp.eq.s32.totalorder %s5999_s21, 0  ;;  %p67_p3 = scmp.ne.s32.totalorder %s5991_s19, %s5987_s18 }
   0xa   : > { %s6071_s26 = scalar_select %p52_p0, %s5995_s20, %s54_s25  }
   0xb   : > { %p6073_p4 = por %p62_p2, %p61_p1  ;;  %p68_p5 = scmp.eq.s32.totalorder %s6058_s22, 0 }
   0xc   : > { %p5700_p6 = scmp.ge.s32.totalorder %s5999_s21, 1  ;;  %p162_p7 = scmp.lt.s32.totalorder %s5999_s21, 3 }
   0xd   : > { %p6082_p8 = por %p68_p5, %p67_p3  ;;  %p5701_p9 = scmp.ne.s32.totalorder %s6058_s22, 0 }
   0xe   : > { %p6087_p10 = pnand %p5700_p6, %p162_p7  ;;  %s174_s7 = sshll.u32 %s7014_s2, 4  ;;  %s175_s7 = int_to_ptr.hbm [resolvable:$true] %s174_s7 }
   0xf   : > { %s6001_s8 = smov [#allocation6]   ;;  %p5757_p13 = scmp.lt.s32.totalorder %s5999_s21, 2 }
  0x10   : > { %p5740_p11 = pneg %p6087_p10  ;;  %s176_s9 = sshll.u32 %s6001_s8, 4  ;;  %s177_s9 = int_to_ptr.vmem [resolvable:$true] %s176_s9 }
  0x11   : > { %s186_s13 = sshll.u32 %s7015_s3, 4  ;;  %p6108_p0 = pnand %p5757_p13, %p6073_p4  ;;  %s187_s13 = int_to_ptr.hbm [resolvable:$true] %s186_s13 }
  0x12   : > { %p6098_p12 = pnand %p5740_p11, %p68_p5  ;;  %s6002_s15 = smov [#allocation8]  }
  0x13   : > { %s188_s16 = sshll.u32 %s6002_s15, 4  ;;  %s198_s24 = sshll.u32 %s7016_s4, 4  ;;  %s189_s16 = int_to_ptr.vmem [resolvable:$true] %s188_s16  ;;  %s199_s24 = int_to_ptr.hbm [resolvable:$true] %s198_s24 }
  0x14   : > { %5743 = dma.hbm_to_vmem [thread:$0]  (!%p6098_p12), %s175_s7, 16, %s177_s9, [#allocation7]  }
  0x15   : > { %5746 = dma.hbm_to_vmem [thread:$0]  (!%p6098_p12), %s187_s13, 64, %s189_s16, [#allocation7]  }
  0x16   : > { %s220_s25 = sand.u32 1, %s5995_s20   ;;  %s6003_s27 = smov [#allocation9]  }
  0x17   : > { %s200_s30 = sshll.u32 %s6003_s27, 4  ;;  %s5720_s6 = smul.u32 6272, %s220_s25  ;;  %s201_s30 = int_to_ptr.vmem [resolvable:$true] %s200_s30 }
  0x18   : > { %5749 = dma.hbm_to_vmem [thread:$0]  (!%p6098_p12), %s199_s24, 16, %s201_s30, [#allocation10]  }
  0x19   : > { %s5719_s7 = smul.u32 1568, %s5999_s21  ;;  %s224_s8 = scalar_lea.vmem [#allocation3], %s5720_s6 }
  0x1a   : > { %s232_s9 = sshll.u32 %s224_s8, 4  ;;  %s221_s18 = scalar_lea.sflag [#allocation4], %s220_s25  ;;  %s233_s9 = int_to_ptr.vmem [resolvable:$true] %s232_s9 }
  0x1b   : > { %s229_s15 = scalar_lea.hbm %s7013_s1, %s5719_s7  ;;  %p5899_p2 = pneg %p6108_p0 }
  0x1c   : > { %s230_s17 = sshll.u32 %s229_s15, 4  ;;  %s5902_s24 = scalar_lea.hbm %s7013_s1, 12544  ;;  %s231_s17 = int_to_ptr.hbm [resolvable:$true] %s230_s17 }
  0x1d   : > { %s5895_s13 = sshra.s32 %s231_s17, 4  ;;  %s5896_s13 = int_to_ptr.hbm [resolvable:$true] %s5895_s13 }
  0x1e   : > { %s5897_s16 = scalar_lea.hbm %s5896_s13, 6272  ;;  %p5903_p6 = scmp.lt.s32.totalorder %s5896_s13, %s7013_s1 }
  0x1f   : > { %p5898_p1 = scmp.ne.s32.totalorder %s5896_s13, %s5897_s16  ;;  %p5904_p7 = scmp.lt.s32.totalorder %s5902_s24, %s5897_s16 }
  0x21   : > { %p5900_p3 = pnand %p5899_p2, %p5898_p1  ;;  %p5905_p11 = por %p5904_p7, %p5903_p6 }
  0x23   : > { %p5901_p4 = pneg %p5900_p3 }
  0x25   : > { %p5906_p12 = pnand %p5905_p11, %p5901_p4 }
  0x27   : > { %5909 = shalt.err (!%p5906_p12)
}
  0x28   : > { %s6004_s25 = smov 50176   ;;  %s6005_s6 = smov 25088  }
  0x29   : > { %s6006_s7 = smov 1568   ;;  %244 = sbr.rel (%p6087_p10) target bundleno = 1129 (0x469), region = 40 }
  0x2a   : > { %5753 = dma.hbm_to_vmem [thread:$0]  (!%p6108_p0), %s231_s17, 100352, %s233_s9, %s221_s18, %s6004_s25, %s6005_s6, %s6006_s7  }
  0x2b   : > { %s246_s8 = sand.u32 (!%p6087_p10), 1, %s5991_s19  }
  0x2c   : > { %s5721_s11 = smul.u32 (!%p6087_p10), 6272, %s246_s8  ;;  %s247_s12 = scalar_lea.sflag (!%p6087_p10), [#allocation4], %s246_s8 }
  0x2e   : > { %s6139_s15 = scalar_lea.vmem [#allocation3], %s5721_s11 }
  0x2f   : > { %5970 = dma.done.wait (%p6082_p8), %s247_s12, 100352  }
  0x30   : > { %5972 = vsyncadd (%p6082_p8), %s247_s12, 4294866944 }
  0x31   : > { %5974 = dma.done.wait (%p68_p5), [#allocation7], 80  }
  0x32   : > { %5976 = vsyncadd (%p68_p5), [#allocation7], 4294967216 }
  0x33   : > { %5978 = dma.done.wait (%p68_p5), [#allocation10], 16  }
  0x34   : > { %5980 = vsyncadd (%p68_p5), [#allocation10], 4294967280  ;;  %s293_s29 = smul.u32 196, %s6058_s22 }
  0x36   : > { %p294_p10 = scmp.lt.s32.totalorder %s293_s29, 391  ;;  %303 = sbr.rel (%p5701_p9) target bundleno = 61 (0x3d), region = 60 }
  0x38   : > { %s7028_s29 = smov (!%p294_p10, %s293_s29), 391 }
  0x39   : > { %s5710_s14 = sshll.u32 %s7028_s29, 1 }
  0x3a   : > { %s6157_s17 = scalar_lea.vmem %s7012_s0, %s5710_s14 }
  0x3b   : > { %vm304_vm0 = vcmask 254976   ;;  %v6007_v0 = vmov 0.0  }
  0x3c   : > { %305 = vst.msk [vmem:[#allocation2] sm:$0x3] %vm304_vm0, %v6007_v0 }
  0x3d PF: > { %v944_v1 = vld [vmem:[%s6139_s15 + $0x1260] sm:$0xff]  ;;  %v946_v2 = vld [vmem:[%s6139_s15 + $0x1270] sm:$0xff]  ;;  %v945_v3 = vld [vmem:[%s6139_s15 + $0x1268] sm:$0xff]  ;;  %vm5552_vm1 = vcmask 254976   ;;  %p5712_p5 = scmp.ne.s32.totalorder %s6058_s22, 1 }
  0x3e   : > { %1643 = vmatpush.xpose.msra.mxu0 %v944_v1  ;;  %1683 = vmatpush.xpose.msra.mxu2 %v946_v2  ;;  %v947_v4 = vld [vmem:[%s6139_s15 + $0x1278] sm:$0xff]  ;;  %v748_v5 = vld [vmem:[%s6139_s15 + $0xc40] sm:$0xff]  ;;  %v750_v6 = vld [vmem:[%s6139_s15 + $0xc50] sm:$0xff] }
  0x3f   : > { %1663 = vmatpush.xpose.msra.mxu1 %v945_v3  ;;  %1703 = vmatpush.xpose.msra.mxu3 %v947_v4  ;;  %v749_v7 = vld [vmem:[%s6139_s15 + $0xc48] sm:$0xff]  ;;  %v751_v8 = vld [vmem:[%s6139_s15 + $0xc58] sm:$0xff]  ;;  %v552_v9 = vld [vmem:[%s6139_s15 + $0x620] sm:$0xff] }
  0x40   : > { %v554_v10 = vld [vmem:[%s6139_s15 + $0x630] sm:$0xff]  ;;  %v553_v11 = vld [vmem:[%s6139_s15 + $0x628] sm:$0xff]  ;;  %v555_v12 = vld [vmem:[%s6139_s15 + $0x638] sm:$0xff] }
  0x41   : > { %v307_v13 = vld [vmem:[%s6157_s17] sm:$0xff]  ;;  %v356_v14 = vld [vmem:[%s6139_s15] sm:$0xff]  ;;  %v357_v18 = vld [vmem:[%s6139_s15 + $0x8] sm:$0xff] }
  0x42   : > { %1644 = vmatpush.xpose.msra.mxu0 %v748_v5  ;;  %1684 = vmatpush.xpose.msra.mxu2 %v750_v6  ;;  %v358_v15 = vld [vmem:[%s6139_s15 + $0x10] sm:$0xff]  ;;  %1189 = vst [vmem:[#allocation1] ss:$4 sm:$0xff] %v307_v13  ;;  %v948_v16 = vld [vmem:[%s6139_s15 + $0x1280] sm:$0xff]  ;;  %v359_v19 = vld [vmem:[%s6139_s15 + $0x18] sm:$0xff] }
  0x43   : > { %1664 = vmatpush.xpose.msra.mxu1 %v749_v7  ;;  %1704 = vmatpush.xpose.msra.mxu3 %v751_v8  ;;  %v950_v17 = vld [vmem:[%s6139_s15 + $0x1290] sm:$0xff]  ;;  %v949_v20 = vld [vmem:[%s6139_s15 + $0x1288] sm:$0xff]  ;;  %v951_v21 = vld [vmem:[%s6139_s15 + $0x1298] sm:$0xff] }
  0x44   : > { %v308_v22 = vld [vmem:[%s6157_s17 + $0x8] sm:$0xff]  ;;  %v754_v24 = vld [vmem:[%s6139_s15 + $0xc70] sm:$0xff]  ;;  %v753_v25 = vld [vmem:[%s6139_s15 + $0xc68] sm:$0xff] }
  0x45   : > { %1191 = vst [vmem:[#allocation1 + $0x20] ss:$4 sm:$0xff] %v308_v22  ;;  %v752_v23 = vld [vmem:[%s6139_s15 + $0xc60] sm:$0xff]  ;;  %v755_v26 = vld [vmem:[%s6139_s15 + $0xc78] sm:$0xff]  ;;  %v558_v32 = vld [vmem:[%s6139_s15 + $0x650] sm:$0xff] }
  0x46   : > { %1645 = vmatpush.xpose.msra.mxu0 %v552_v9  ;;  %1685 = vmatpush.xpose.msra.mxu2 %v554_v10  ;;  %v556_v31 = vld [vmem:[%s6139_s15 + $0x640] sm:$0xff]  ;;  %v557_v34 = vld [vmem:[%s6139_s15 + $0x648] sm:$0xff]  ;;  %v559_v35 = vld [vmem:[%s6139_s15 + $0x658] sm:$0xff] }
  0x47   : > { %1665 = vmatpush.xpose.msra.mxu1 %v553_v11  ;;  %1705 = vmatpush.xpose.msra.mxu3 %v555_v12  ;;  %v309_v33 = vld [vmem:[%s6157_s17 + $0x10] sm:$0xff]  ;;  %v362_v37 = vld [vmem:[%s6139_s15 + $0x30] sm:$0xff]  ;;  %v363_v41 = vld [vmem:[%s6139_s15 + $0x38] sm:$0xff] }
  0x48   : > { %v360_v36 = vld [vmem:[%s6139_s15 + $0x20] sm:$0xff]  ;;  %v954_v39 = vld [vmem:[%s6139_s15 + $0x12b0] sm:$0xff]  ;;  %v361_v40 = vld [vmem:[%s6139_s15 + $0x28] sm:$0xff] }
  0x49   : > { %v1194_v27 = vld.sshfl [vmem:[#allocation1 + $0x10] sm:$0xff pattern:$0x73625140]  ;;  %v1192_v28 = vld.sshfl [vmem:[#allocation1] sm:$0xff pattern:$0x73625140] }
  0x4a   : > { %1646 = vmatpush.xpose.msra.mxu0 %v356_v14  ;;  %1686 = vmatpush.xpose.msra.mxu2 %v358_v15  ;;  %v1195_v29 = vld.sshfl [vmem:[#allocation1 + $0x18] sm:$0xff pattern:$0x73625140]  ;;  %v1193_v30 = vld.sshfl [vmem:[#allocation1 + $0x8] sm:$0xff pattern:$0x73625140] }
  0x4b   : > { %1666 = vmatpush.xpose.msra.mxu1 %v357_v18  ;;  %1706 = vmatpush.xpose.msra.mxu3 %v359_v19  ;;  %1200 = vst [vmem:[#allocation1] ss:$4 sm:$0xff] %v309_v33  ;;  %v952_v38 = vld [vmem:[%s6139_s15 + $0x12a0] sm:$0xff]  ;;  %v953_v42 = vld [vmem:[%s6139_s15 + $0x12a8] sm:$0xff]  ;;  %v955_v43 = vld [vmem:[%s6139_s15 + $0x12b8] sm:$0xff] }
  0x4c   : > { %v756_v44 = vld [vmem:[%s6139_s15 + $0xc80] sm:$0xff]  ;;  %v1196_v46 = vld.sshfl [vmem:[#allocation1 + $0x20] sm:$0xff pattern:$0x73625140]  ;;  %v757_v48 = vld [vmem:[%s6139_s15 + $0xc88] sm:$0xff] }
  0x4d   : > { %1687 = vmatmul.f32.vlgmr.msra.gmra.mxu2 %v1194_v27  ;;  %1647 = vmatmul.f32.vlgmr.msra.gmra.mxu0 %v1192_v28  ;;  %v1198_v45 = vld.sshfl [vmem:[#allocation1 + $0x30] sm:$0xff pattern:$0x73625140]  ;;  %v758_v47 = vld [vmem:[%s6139_s15 + $0xc90] sm:$0xff]  ;;  %v759_v50 = vld [vmem:[%s6139_s15 + $0xc98] sm:$0xff] }
  0x4e   : > { %1723 = vmatpush.xpose.msrb.mxu0 %v948_v16  ;;  %1763 = vmatpush.xpose.msrb.mxu2 %v950_v17  ;;  %v1199_v49 = vld.sshfl [vmem:[#allocation1 + $0x38] sm:$0xff pattern:$0x73625140]  ;;  %v1197_v51 = vld.sshfl [vmem:[#allocation1 + $0x28] sm:$0xff pattern:$0x73625140] }
  0x4f   : > { %1743 = vmatpush.xpose.msrb.mxu1 %v949_v20  ;;  %1783 = vmatpush.xpose.msrb.mxu3 %v951_v21  ;;  %v310_v52 = vld [vmem:[%s6157_s17 + $0x18] sm:$0xff]  ;;  %v560_v53 = vld [vmem:[%s6139_s15 + $0x660] sm:$0xff]  ;;  %v311_v59 = vld [vmem:[%s6157_s17 + $0x20] sm:$0xff] }
  0x50   : > { %1707 = vmatmul.f32.vlgmr.msra.gmra.mxu3 %v1195_v29  ;;  %1667 = vmatmul.f32.vlgmr.msra.gmra.mxu1 %v1193_v30  ;;  %1201 = vst [vmem:[#allocation1 + $0x20] ss:$4 sm:$0xff] %v310_v52  ;;  %v562_v57 = vld [vmem:[%s6139_s15 + $0x670] sm:$0xff]  ;;  %v561_v60 = vld [vmem:[%s6139_s15 + $0x668] sm:$0xff]  ;;  %v563_v61 = vld [vmem:[%s6139_s15 + $0x678] sm:$0xff] }
  0x51   : > { %v364_v62 = vld [vmem:[%s6139_s15 + $0x40] sm:$0xff]  ;;  %v366_v63 = vld [vmem:[%s6139_s15 + $0x50] sm:$0xff]  ;;  %v365_v2 = vld [vmem:[%s6139_s15 + $0x48] sm:$0xff] }
  0x52   : > { %1724 = vmatpush.xpose.msrb.mxu0 %v752_v23  ;;  %1764 = vmatpush.xpose.msrb.mxu2 %v754_v24  ;;  %v1204_v54 = vld.sshfl [vmem:[#allocation1 + $0x10] sm:$0xff pattern:$0x73625140]  ;;  %v1202_v55 = vld.sshfl [vmem:[#allocation1] sm:$0xff pattern:$0x73625140] }
  0x53   : > { %1744 = vmatpush.xpose.msrb.mxu1 %v753_v25  ;;  %1784 = vmatpush.xpose.msrb.mxu3 %v755_v26  ;;  %v1205_v56 = vld.sshfl [vmem:[#allocation1 + $0x18] sm:$0xff pattern:$0x73625140]  ;;  %v1203_v58 = vld.sshfl [vmem:[#allocation1 + $0x8] sm:$0xff pattern:$0x73625140] }
  0x54   : > { %1210 = vst [vmem:[#allocation1] ss:$4 sm:$0xff] %v311_v59  ;;  %v956_v0 = vld [vmem:[%s6139_s15 + $0x12c0] sm:$0xff]  ;;  %v958_v1 = vld [vmem:[%s6139_s15 + $0x12d0] sm:$0xff]  ;;  %v367_v3 = vld [vmem:[%s6139_s15 + $0x58] sm:$0xff] }
  0x55   : > { %v957_v4 = vld [vmem:[%s6139_s15 + $0x12c8] sm:$0xff]  ;;  %v959_v5 = vld [vmem:[%s6139_s15 + $0x12d8] sm:$0xff]  ;;  %v760_v6 = vld [vmem:[%s6139_s15 + $0xca0] sm:$0xff] }
  0x56   : > { %1725 = vmatpush.xpose.msrb.mxu0 %v556_v31  ;;  %1765 = vmatpush.xpose.msrb.mxu2 %v558_v32  ;;  %v762_v7 = vld [vmem:[%s6139_s15 + $0xcb0] sm:$0xff]  ;;  %v761_v11 = vld [vmem:[%s6139_s15 + $0xca8] sm:$0xff]  ;;  %v312_v13 = vld [vmem:[%s6157_s17 + $0x28] sm:$0xff] }
  0x57   : > { %1745 = vmatpush.xpose.msrb.mxu1 %v557_v34  ;;  %1785 = vmatpush.xpose.msrb.mxu3 %v559_v35  ;;  %v1206_v8 = vld.sshfl [vmem:[#allocation1 + $0x20] sm:$0xff pattern:$0x73625140]  ;;  %v1208_v9 = vld.sshfl [vmem:[#allocation1 + $0x30] sm:$0xff pattern:$0x73625140] }
  0x58   : > { %v1207_v10 = vld.sshfl [vmem:[#allocation1 + $0x28] sm:$0xff pattern:$0x73625140]  ;;  %v1209_v12 = vld.sshfl [vmem:[#allocation1 + $0x38] sm:$0xff pattern:$0x73625140] }
  0x59   : > { %v763_v14 = vld [vmem:[%s6139_s15 + $0xcb8] sm:$0xff]  ;;  %1211 = vst [vmem:[#allocation1 + $0x20] ss:$4 sm:$0xff] %v312_v13  ;;  %v564_v15 = vld [vmem:[%s6139_s15 + $0x680] sm:$0xff]  ;;  %v566_v16 = vld [vmem:[%s6139_s15 + $0x690] sm:$0xff] }
  0x5a   : > { %1726 = vmatpush.xpose.msrb.mxu0 %v360_v36  ;;  %1766 = vmatpush.xpose.msrb.mxu2 %v362_v37  ;;  %v565_v17 = vld [vmem:[%s6139_s15 + $0x688] sm:$0xff]  ;;  %v567_v18 = vld [vmem:[%s6139_s15 + $0x698] sm:$0xff]  ;;  %v368_v19 = vld [vmem:[%s6139_s15 + $0x60] sm:$0xff] }
  0x5b   : > { %1746 = vmatpush.xpose.msrb.mxu1 %v361_v40  ;;  %1786 = vmatpush.xpose.msrb.mxu3 %v363_v41  ;;  %v370_v20 = vld [vmem:[%s6139_s15 + $0x70] sm:$0xff]  ;;  %v960_v21 = vld [vmem:[%s6139_s15 + $0x12e0] sm:$0xff]  ;;  %v369_v23 = vld [vmem:[%s6139_s15 + $0x68] sm:$0xff] }
  0x5c   : > { %v962_v22 = vld [vmem:[%s6139_s15 + $0x12f0] sm:$0xff]  ;;  %v371_v24 = vld [vmem:[%s6139_s15 + $0x78] sm:$0xff]  ;;  %v961_v25 = vld [vmem:[%s6139_s15 + $0x12e8] sm:$0xff] }
  0x5d   : > { %1767 = vmatmul.f32.vlgmr.msrb.gmra.mxu2 %v1198_v45  ;;  %1727 = vmatmul.f32.vlgmr.msrb.gmra.mxu0 %v1196_v46  ;;  %v963_v26 = vld [vmem:[%s6139_s15 + $0x12f8] sm:$0xff]  ;;  %v764_v27 = vld [vmem:[%s6139_s15 + $0xcc0] sm:$0xff]  ;;  %v766_v28 = vld [vmem:[%s6139_s15 + $0xcd0] sm:$0xff] }
  0x5e   : > { %1803 = vmatpush.xpose.msra.mxu0 %v952_v38  ;;  %1843 = vmatpush.xpose.msra.mxu2 %v954_v39  ;;  %v1212_v29 = vld.sshfl [vmem:[#allocation1] sm:$0xff pattern:$0x73625140]  ;;  %v1214_v30 = vld.sshfl [vmem:[#allocation1 + $0x10] sm:$0xff pattern:$0x73625140] }
  0x5f   : > { %1823 = vmatpush.xpose.msra.mxu1 %v953_v42  ;;  %1863 = vmatpush.xpose.msra.mxu3 %v955_v43  ;;  %v1213_v31 = vld.sshfl [vmem:[#allocation1 + $0x8] sm:$0xff pattern:$0x73625140]  ;;  %v765_v32 = vld [vmem:[%s6139_s15 + $0xcc8] sm:$0xff]  ;;  %v570_v37 = vld [vmem:[%s6139_s15 + $0x6b0] sm:$0xff] }
  0x60   : > { %1787 = vmatmul.f32.vlgmr.msrb.gmra.mxu3 %v1199_v49  ;;  %1747 = vmatmul.f32.vlgmr.msrb.gmra.mxu1 %v1197_v51  ;;  %v1215_v33 = vld.sshfl [vmem:[#allocation1 + $0x18] sm:$0xff pattern:$0x73625140]  ;;  %v313_v34 = vld [vmem:[%s6157_s17 + $0x30] sm:$0xff]  ;;  %v767_v35 = vld [vmem:[%s6139_s15 + $0xcd8] sm:$0xff] }
  0x61   : > { %1220 = vst [vmem:[#allocation1] ss:$4 sm:$0xff] %v313_v34  ;;  %v568_v36 = vld [vmem:[%s6139_s15 + $0x6a0] sm:$0xff]  ;;  %v569_v38 = vld [vmem:[%s6139_s15 + $0x6a8] sm:$0xff]  ;;  %v571_v39 = vld [vmem:[%s6139_s15 + $0x6b8] sm:$0xff] }
  0x62   : > { %1804 = vmatpush.xpose.msra.mxu0 %v756_v44  ;;  %1844 = vmatpush.xpose.msra.mxu2 %v758_v47  ;;  %v372_v40 = vld [vmem:[%s6139_s15 + $0x80] sm:$0xff]  ;;  %v374_v41 = vld [vmem:[%s6139_s15 + $0x90] sm:$0xff]  ;;  %v373_v44 = vld [vmem:[%s6139_s15 + $0x88] sm:$0xff] }
  0x63   : > { %1824 = vmatpush.xpose.msra.mxu1 %v757_v48  ;;  %1864 = vmatpush.xpose.msra.mxu3 %v759_v50  ;;  %v964_v42 = vld [vmem:[%s6139_s15 + $0x1300] sm:$0xff]  ;;  %v966_v43 = vld [vmem:[%s6139_s15 + $0x1310] sm:$0xff]  ;;  %v375_v45 = vld [vmem:[%s6139_s15 + $0x98] sm:$0xff] }
  0x64   : > { %v965_v46 = vld [vmem:[%s6139_s15 + $0x1308] sm:$0xff]  ;;  %v967_v47 = vld [vmem:[%s6139_s15 + $0x1318] sm:$0xff]  ;;  %v768_v48 = vld [vmem:[%s6139_s15 + $0xce0] sm:$0xff] }
  0x65   : > { %v770_v49 = vld [vmem:[%s6139_s15 + $0xcf0] sm:$0xff]  ;;  %v1218_v51 = vld.sshfl [vmem:[#allocation1 + $0x30] sm:$0xff pattern:$0x73625140]  ;;  %v775_v13 = vld [vmem:[%s6139_s15 + $0xd18] sm:$0xff] }
  0x66   : > { %1805 = vmatpush.xpose.msra.mxu0 %v560_v53  ;;  %1845 = vmatpush.xpose.msra.mxu2 %v562_v57  ;;  %v1216_v50 = vld.sshfl [vmem:[#allocation1 + $0x20] sm:$0xff pattern:$0x73625140]  ;;  %v1217_v52 = vld.sshfl [vmem:[#allocation1 + $0x28] sm:$0xff pattern:$0x73625140] }
  0x67   : > { %1825 = vmatpush.xpose.msra.mxu1 %v561_v60  ;;  %1865 = vmatpush.xpose.msra.mxu3 %v563_v61  ;;  %v769_v53 = vld [vmem:[%s6139_s15 + $0xce8] sm:$0xff]  ;;  %v572_v57 = vld [vmem:[%s6139_s15 + $0x6c0] sm:$0xff]  ;;  %v575_v60 = vld [vmem:[%s6139_s15 + $0x6d8] sm:$0xff] }
  0x68   : > { %v573_v59 = vld [vmem:[%s6139_s15 + $0x6c8] sm:$0xff]  ;;  %v376_v61 = vld [vmem:[%s6139_s15 + $0xa0] sm:$0xff]  ;;  %v779_v34 = vld [vmem:[%s6139_s15 + $0xd38] sm:$0xff] }
  0x6a   : > { %1806 = vmatpush.xpose.msra.mxu0 %v364_v62  ;;  %1846 = vmatpush.xpose.msra.mxu2 %v366_v63  ;;  %v378_v62 = vld [vmem:[%s6139_s15 + $0xb0] sm:$0xff]  ;;  %v968_v63 = vld [vmem:[%s6139_s15 + $0x1320] sm:$0xff] }
  0x6b   : > { %1826 = vmatpush.xpose.msra.mxu1 %v365_v2  ;;  %1866 = vmatpush.xpose.msra.mxu3 %v367_v3  ;;  %v379_v2 = vld [vmem:[%s6139_s15 + $0xb8] sm:$0xff]  ;;  %v969_v3 = vld [vmem:[%s6139_s15 + $0x1328] sm:$0xff] }
  0x6d   : > { %1847 = vmatmul.f32.vlgmr.msra.gmra.mxu2 %v1204_v54  ;;  %1807 = vmatmul.f32.vlgmr.msra.gmra.mxu0 %v1202_v55  ;;  %v1219_v54 = vld.sshfl [vmem:[#allocation1 + $0x38] sm:$0xff pattern:$0x73625140] }
  0x6e   : > { %1883 = vmatpush.xpose.msrb.mxu0 %v956_v0  ;;  %1923 = vmatpush.xpose.msrb.mxu2 %v958_v1  ;;  %v314_v55 = vld [vmem:[%s6157_s17 + $0x38] sm:$0xff] }
  0x6f   : > { %1903 = vmatpush.xpose.msrb.mxu1 %v957_v4  ;;  %1943 = vmatpush.xpose.msrb.mxu3 %v959_v5  ;;  %1221 = vst [vmem:[#allocation1 + $0x20] ss:$4 sm:$0xff] %v314_v55  ;;  %v970_v0 = vld [vmem:[%s6139_s15 + $0x1330] sm:$0xff]  ;;  %v377_v1 = vld [vmem:[%s6139_s15 + $0xa8] sm:$0xff]  ;;  %v971_v4 = vld [vmem:[%s6139_s15 + $0x1338] sm:$0xff] }
  0x70   : > { %1867 = vmatmul.f32.vlgmr.msra.gmra.mxu3 %v1205_v56  ;;  %1827 = vmatmul.f32.vlgmr.msra.gmra.mxu1 %v1203_v58  ;;  %v771_v56 = vld [vmem:[%s6139_s15 + $0xcf8] sm:$0xff]  ;;  %v574_v58 = vld [vmem:[%s6139_s15 + $0x6d0] sm:$0xff]  ;;  %v772_v5 = vld [vmem:[%s6139_s15 + $0xd00] sm:$0xff] }
  0x71   : > { %v783_v55 = vld [vmem:[%s6139_s15 + $0xd58] sm:$0xff] }
  0x72   : > { %1884 = vmatpush.xpose.msrb.mxu0 %v760_v6  ;;  %1924 = vmatpush.xpose.msrb.mxu2 %v762_v7  ;;  %v774_v6 = vld [vmem:[%s6139_s15 + $0xd10] sm:$0xff] }
  0x73   : > { %1904 = vmatpush.xpose.msrb.mxu1 %v761_v11  ;;  %1944 = vmatpush.xpose.msrb.mxu3 %v763_v14  ;;  %v1222_v7 = vld.sshfl [vmem:[#allocation1] sm:$0xff pattern:$0x73625140]  ;;  %v1225_v11 = vld.sshfl [vmem:[#allocation1 + $0x18] sm:$0xff pattern:$0x73625140] }
  0x74   : > { %v576_v14 = vld [vmem:[%s6139_s15 + $0x6e0] sm:$0xff] }
  0x76   : > { %1885 = vmatpush.xpose.msrb.mxu0 %v564_v15  ;;  %1925 = vmatpush.xpose.msrb.mxu2 %v566_v16  ;;  %v578_v15 = vld [vmem:[%s6139_s15 + $0x6f0] sm:$0xff]  ;;  %v577_v16 = vld [vmem:[%s6139_s15 + $0x6e8] sm:$0xff] }
  0x77   : > { %1905 = vmatpush.xpose.msrb.mxu1 %v565_v17  ;;  %1945 = vmatpush.xpose.msrb.mxu3 %v567_v18  ;;  %v579_v17 = vld [vmem:[%s6139_s15 + $0x6f8] sm:$0xff]  ;;  %v380_v18 = vld [vmem:[%s6139_s15 + $0xc0] sm:$0xff] }
  0x7a   : > { %1886 = vmatpush.xpose.msrb.mxu0 %v368_v19  ;;  %1926 = vmatpush.xpose.msrb.mxu2 %v370_v20  ;;  %v382_v19 = vld [vmem:[%s6139_s15 + $0xd0] sm:$0xff]  ;;  %v972_v20 = vld [vmem:[%s6139_s15 + $0x1340] sm:$0xff] }
  0x7b   : > { %1906 = vmatpush.xpose.msrb.mxu1 %v369_v23  ;;  %1946 = vmatpush.xpose.msrb.mxu3 %v371_v24  ;;  %v383_v23 = vld [vmem:[%s6139_s15 + $0xd8] sm:$0xff]  ;;  %v973_v24 = vld [vmem:[%s6139_s15 + $0x1348] sm:$0xff] }
  0x7d   : > { %1887 = vmatmul.f32.vlgmr.msrb.gmra.mxu0 %v1206_v8  ;;  %1927 = vmatmul.f32.vlgmr.msrb.gmra.mxu2 %v1208_v9  ;;  %v1224_v8 = vld.sshfl [vmem:[#allocation1 + $0x10] sm:$0xff pattern:$0x73625140]  ;;  %v1223_v9 = vld.sshfl [vmem:[#allocation1 + $0x8] sm:$0xff pattern:$0x73625140] }
  0x7e   : > { %1963 = vmatpush.xpose.msra.mxu0 %v960_v21  ;;  %2003 = vmatpush.xpose.msra.mxu2 %v962_v22  ;;  %v974_v21 = vld [vmem:[%s6139_s15 + $0x1350] sm:$0xff]  ;;  %v381_v22 = vld [vmem:[%s6139_s15 + $0xc8] sm:$0xff] }
  0x7f   : > { %1983 = vmatpush.xpose.msra.mxu1 %v961_v25  ;;  %2023 = vmatpush.xpose.msra.mxu3 %v963_v26  ;;  %v975_v25 = vld [vmem:[%s6139_s15 + $0x1358] sm:$0xff]  ;;  %v776_v26 = vld [vmem:[%s6139_s15 + $0xd20] sm:$0xff] }
  0x80   : > { %1907 = vmatmul.f32.vlgmr.msrb.gmra.mxu1 %v1207_v10  ;;  %1947 = vmatmul.f32.vlgmr.msrb.gmra.mxu3 %v1209_v12  ;;  %v773_v10 = vld [vmem:[%s6139_s15 + $0xd08] sm:$0xff]  ;;  %v315_v12 = vld [vmem:[%s6157_s17 + $0x40] sm:$0xff] }
  0x81   : > { %1230 = vst [vmem:[#allocation1] ss:$4 sm:$0xff] %v315_v12  ;;  %v787_v12 = vld [vmem:[%s6139_s15 + $0xd78] sm:$0xff] }
  0x82   : > { %1964 = vmatpush.xpose.msra.mxu0 %v764_v27  ;;  %2004 = vmatpush.xpose.msra.mxu2 %v766_v28  ;;  %v778_v27 = vld [vmem:[%s6139_s15 + $0xd30] sm:$0xff] }
  0x83   : > { %1984 = vmatpush.xpose.msra.mxu1 %v765_v32  ;;  %2024 = vmatpush.xpose.msra.mxu3 %v767_v35  ;;  %v1226_v28 = vld.sshfl [vmem:[#allocation1 + $0x20] sm:$0xff pattern:$0x73625140]  ;;  %v1229_v32 = vld.sshfl [vmem:[#allocation1 + $0x38] sm:$0xff pattern:$0x73625140] }
  0x84   : > { %v580_v35 = vld [vmem:[%s6139_s15 + $0x700] sm:$0xff] }
  0x86   : > { %1965 = vmatpush.xpose.msra.mxu0 %v568_v36  ;;  %2005 = vmatpush.xpose.msra.mxu2 %v570_v37  ;;  %v582_v36 = vld [vmem:[%s6139_s15 + $0x710] sm:$0xff]  ;;  %v581_v37 = vld [vmem:[%s6139_s15 + $0x708] sm:$0xff] }
  0x87   : > { %1985 = vmatpush.xpose.msra.mxu1 %v569_v38  ;;  %2025 = vmatpush.xpose.msra.mxu3 %v571_v39  ;;  %v583_v38 = vld [vmem:[%s6139_s15 + $0x718] sm:$0xff]  ;;  %v384_v39 = vld [vmem:[%s6139_s15 + $0xe0] sm:$0xff] }
  0x8a   : > { %1966 = vmatpush.xpose.msra.mxu0 %v372_v40  ;;  %2006 = vmatpush.xpose.msra.mxu2 %v374_v41  ;;  %v386_v40 = vld [vmem:[%s6139_s15 + $0xf0] sm:$0xff]  ;;  %v976_v41 = vld [vmem:[%s6139_s15 + $0x1360] sm:$0xff] }
  0x8b   : > { %1986 = vmatpush.xpose.msra.mxu1 %v373_v44  ;;  %2026 = vmatpush.xpose.msra.mxu3 %v375_v45  ;;  %v387_v44 = vld [vmem:[%s6139_s15 + $0xf8] sm:$0xff]  ;;  %v977_v45 = vld [vmem:[%s6139_s15 + $0x1368] sm:$0xff] }
  0x8d   : > { %1967 = vmatmul.f32.vlgmr.msra.gmra.mxu0 %v1212_v29  ;;  %2007 = vmatmul.f32.vlgmr.msra.gmra.mxu2 %v1214_v30  ;;  %v1228_v29 = vld.sshfl [vmem:[#allocation1 + $0x30] sm:$0xff pattern:$0x73625140]  ;;  %v1227_v30 = vld.sshfl [vmem:[#allocation1 + $0x28] sm:$0xff pattern:$0x73625140] }
  0x8e   : > { %2043 = vmatpush.xpose.msrb.mxu0 %v964_v42  ;;  %2083 = vmatpush.xpose.msrb.mxu2 %v966_v43  ;;  %v978_v42 = vld [vmem:[%s6139_s15 + $0x1370] sm:$0xff]  ;;  %v385_v43 = vld [vmem:[%s6139_s15 + $0xe8] sm:$0xff] }
  0x8f   : > { %2063 = vmatpush.xpose.msrb.mxu1 %v965_v46  ;;  %2103 = vmatpush.xpose.msrb.mxu3 %v967_v47  ;;  %v979_v46 = vld [vmem:[%s6139_s15 + $0x1378] sm:$0xff]  ;;  %v780_v47 = vld [vmem:[%s6139_s15 + $0xd40] sm:$0xff] }
  0x90   : > { %1987 = vmatmul.f32.vlgmr.msra.gmra.mxu1 %v1213_v31  ;;  %2027 = vmatmul.f32.vlgmr.msra.gmra.mxu3 %v1215_v33  ;;  %v777_v31 = vld [vmem:[%s6139_s15 + $0xd28] sm:$0xff]  ;;  %v316_v33 = vld [vmem:[%s6157_s17 + $0x48] sm:$0xff] }
  0x91   : > { %1231 = vst [vmem:[#allocation1 + $0x20] ss:$4 sm:$0xff] %v316_v33  ;;  %v791_v33 = vld [vmem:[%s6139_s15 + $0xd98] sm:$0xff] }
  0x92   : > { %2044 = vmatpush.xpose.msrb.mxu0 %v768_v48  ;;  %2084 = vmatpush.xpose.msrb.mxu2 %v770_v49  ;;  %v782_v48 = vld [vmem:[%s6139_s15 + $0xd50] sm:$0xff] }
  0x93   : > { %2064 = vmatpush.xpose.msrb.mxu1 %v769_v53  ;;  %2104 = vmatpush.xpose.msrb.mxu3 %v771_v56  ;;  %v1232_v49 = vld.sshfl [vmem:[#allocation1] sm:$0xff pattern:$0x73625140]  ;;  %v1235_v53 = vld.sshfl [vmem:[#allocation1 + $0x18] sm:$0xff pattern:$0x73625140] }
  0x94   : > { %v584_v56 = vld [vmem:[%s6139_s15 + $0x720] sm:$0xff] }
  0x96   : > { %2045 = vmatpush.xpose.msrb.mxu0 %v572_v57  ;;  %2085 = vmatpush.xpose.msrb.mxu2 %v574_v58  ;;  %v586_v57 = vld [vmem:[%s6139_s15 + $0x730] sm:$0xff]  ;;  %v585_v58 = vld [vmem:[%s6139_s15 + $0x728] sm:$0xff] }
  0x97   : > { %2065 = vmatpush.xpose.msrb.mxu1 %v573_v59  ;;  %2105 = vmatpush.xpose.msrb.mxu3 %v575_v60  ;;  %v587_v59 = vld [vmem:[%s6139_s15 + $0x738] sm:$0xff]  ;;  %v388_v60 = vld [vmem:[%s6139_s15 + $0x100] sm:$0xff] }
  0x9a   : > { %2046 = vmatpush.xpose.msrb.mxu0 %v376_v61  ;;  %2086 = vmatpush.xpose.msrb.mxu2 %v378_v62  ;;  %v390_v61 = vld [vmem:[%s6139_s15 + $0x110] sm:$0xff]  ;;  %v980_v62 = vld [vmem:[%s6139_s15 + $0x1380] sm:$0xff] }
  0x9b   : > { %2066 = vmatpush.xpose.msrb.mxu1 %v377_v1  ;;  %2106 = vmatpush.xpose.msrb.mxu3 %v379_v2  ;;  %v391_v1 = vld [vmem:[%s6139_s15 + $0x118] sm:$0xff]  ;;  %v981_v2 = vld [vmem:[%s6139_s15 + $0x1388] sm:$0xff] }
  0x9d   : > { %2047 = vmatmul.f32.vlgmr.msrb.gmra.mxu0 %v1216_v50  ;;  %2087 = vmatmul.f32.vlgmr.msrb.gmra.mxu2 %v1218_v51  ;;  %v1234_v50 = vld.sshfl [vmem:[#allocation1 + $0x10] sm:$0xff pattern:$0x73625140]  ;;  %v1233_v51 = vld.sshfl [vmem:[#allocation1 + $0x8] sm:$0xff pattern:$0x73625140] }
  0x9e   : > { %2123 = vmatpush.xpose.msra.mxu0 %v968_v63  ;;  %2163 = vmatpush.xpose.msra.mxu2 %v970_v0  ;;  %v982_v63 = vld [vmem:[%s6139_s15 + $0x1390] sm:$0xff]  ;;  %v389_v0 = vld [vmem:[%s6139_s15 + $0x108] sm:$0xff] }
  0x9f   : > { %2143 = vmatpush.xpose.msra.mxu1 %v969_v3  ;;  %2183 = vmatpush.xpose.msra.mxu3 %v971_v4  ;;  %v983_v3 = vld [vmem:[%s6139_s15 + $0x1398] sm:$0xff]  ;;  %v784_v4 = vld [vmem:[%s6139_s15 + $0xd60] sm:$0xff] }
  0xa0   : > { %2067 = vmatmul.f32.vlgmr.msrb.gmra.mxu1 %v1217_v52  ;;  %2107 = vmatmul.f32.vlgmr.msrb.gmra.mxu3 %v1219_v54  ;;  %v781_v52 = vld [vmem:[%s6139_s15 + $0xd48] sm:$0xff] }
  0xa1   : > { %v317_v54 = vld [vmem:[%s6157_s17 + $0x50] sm:$0xff] }
  0xa2   : > { %2124 = vmatpush.xpose.msra.mxu0 %v772_v5  ;;  %2164 = vmatpush.xpose.msra.mxu2 %v774_v6  ;;  %1240 = vst [vmem:[#allocation1] ss:$4 sm:$0xff] %v317_v54  ;;  %v786_v5 = vld [vmem:[%s6139_s15 + $0xd70] sm:$0xff]  ;;  %v795_v54 = vld [vmem:[%s6139_s15 + $0xdb8] sm:$0xff] }
  0xa3   : > { %2144 = vmatpush.xpose.msra.mxu1 %v773_v10  ;;  %2184 = vmatpush.xpose.msra.mxu3 %v775_v13  ;;  %v1236_v6 = vld.sshfl [vmem:[#allocation1 + $0x20] sm:$0xff pattern:$0x73625140]  ;;  %v1239_v10 = vld.sshfl [vmem:[#allocation1 + $0x38] sm:$0xff pattern:$0x73625140] }
  0xa4   : > { %v588_v13 = vld [vmem:[%s6139_s15 + $0x740] sm:$0xff] }
  0xa6   : > { %2125 = vmatpush.xpose.msra.mxu0 %v576_v14  ;;  %2165 = vmatpush.xpose.msra.mxu2 %v578_v15  ;;  %v590_v14 = vld [vmem:[%s6139_s15 + $0x750] sm:$0xff]  ;;  %v589_v15 = vld [vmem:[%s6139_s15 + $0x748] sm:$0xff] }
  0xa7   : > { %2145 = vmatpush.xpose.msra.mxu1 %v577_v16  ;;  %2185 = vmatpush.xpose.msra.mxu3 %v579_v17  ;;  %v591_v16 = vld [vmem:[%s6139_s15 + $0x758] sm:$0xff]  ;;  %v392_v17 = vld [vmem:[%s6139_s15 + $0x120] sm:$0xff] }
  0xaa   : > { %2126 = vmatpush.xpose.msra.mxu0 %v380_v18  ;;  %2166 = vmatpush.xpose.msra.mxu2 %v382_v19  ;;  %v394_v18 = vld [vmem:[%s6139_s15 + $0x130] sm:$0xff]  ;;  %v984_v19 = vld [vmem:[%s6139_s15 + $0x13a0] sm:$0xff] }
  0xab   : > { %2146 = vmatpush.xpose.msra.mxu1 %v381_v22  ;;  %2186 = vmatpush.xpose.msra.mxu3 %v383_v23  ;;  %v395_v22 = vld [vmem:[%s6139_s15 + $0x138] sm:$0xff]  ;;  %v985_v23 = vld [vmem:[%s6139_s15 + $0x13a8] sm:$0xff] }
  0xad   : > { %2127 = vmatmul.f32.vlgmr.msra.gmra.mxu0 %v1222_v7  ;;  %2167 = vmatmul.f32.vlgmr.msra.gmra.mxu2 %v1224_v8  ;;  %v1238_v7 = vld.sshfl [vmem:[#allocation1 + $0x30] sm:$0xff pattern:$0x73625140]  ;;  %v1237_v8 = vld.sshfl [vmem:[#allocation1 + $0x28] sm:$0xff pattern:$0x73625140] }
  0xae   : > { %2203 = vmatpush.xpose.msrb.mxu0 %v972_v20  ;;  %2243 = vmatpush.xpose.msrb.mxu2 %v974_v21  ;;  %v986_v20 = vld [vmem:[%s6139_s15 + $0x13b0] sm:$0xff]  ;;  %v393_v21 = vld [vmem:[%s6139_s15 + $0x128] sm:$0xff] }
  0xaf   : > { %2223 = vmatpush.xpose.msrb.mxu1 %v973_v24  ;;  %2263 = vmatpush.xpose.msrb.mxu3 %v975_v25  ;;  %v987_v24 = vld [vmem:[%s6139_s15 + $0x13b8] sm:$0xff]  ;;  %v788_v25 = vld [vmem:[%s6139_s15 + $0xd80] sm:$0xff] }
  0xb0   : > { %2147 = vmatmul.f32.vlgmr.msra.gmra.mxu1 %v1223_v9  ;;  %2187 = vmatmul.f32.vlgmr.msra.gmra.mxu3 %v1225_v11  ;;  %v785_v9 = vld [vmem:[%s6139_s15 + $0xd68] sm:$0xff] }
  0xb1   : > { %v318_v11 = vld [vmem:[%s6157_s17 + $0x58] sm:$0xff] }
  0xb2   : > { %2204 = vmatpush.xpose.msrb.mxu0 %v776_v26  ;;  %2244 = vmatpush.xpose.msrb.mxu2 %v778_v27  ;;  %1241 = vst [vmem:[#allocation1 + $0x20] ss:$4 sm:$0xff] %v318_v11  ;;  %v790_v26 = vld [vmem:[%s6139_s15 + $0xd90] sm:$0xff]  ;;  %v799_v11 = vld [vmem:[%s6139_s15 + $0xdd8] sm:$0xff] }
  0xb3   : > { %2224 = vmatpush.xpose.msrb.mxu1 %v777_v31  ;;  %2264 = vmatpush.xpose.msrb.mxu3 %v779_v34  ;;  %v1242_v27 = vld.sshfl [vmem:[#allocation1] sm:$0xff pattern:$0x73625140]  ;;  %v1245_v31 = vld.sshfl [vmem:[#allocation1 + $0x18] sm:$0xff pattern:$0x73625140] }
  0xb4   : > { %v592_v34 = vld [vmem:[%s6139_s15 + $0x760] sm:$0xff] }
  0xb6   : > { %2205 = vmatpush.xpose.msrb.mxu0 %v580_v35  ;;  %2245 = vmatpush.xpose.msrb.mxu2 %v582_v36  ;;  %v594_v35 = vld [vmem:[%s6139_s15 + $0x770] sm:$0xff]  ;;  %v593_v36 = vld [vmem:[%s6139_s15 + $0x768] sm:$0xff] }
  0xb7   : > { %2225 = vmatpush.xpose.msrb.mxu1 %v581_v37  ;;  %2265 = vmatpush.xpose.msrb.mxu3 %v583_v38  ;;  %v595_v37 = vld [vmem:[%s6139_s15 + $0x778] sm:$0xff]  ;;  %v396_v38 = vld [vmem:[%s6139_s15 + $0x140] sm:$0xff] }
  0xba   : > { %2206 = vmatpush.xpose.msrb.mxu0 %v384_v39  ;;  %2246 = vmatpush.xpose.msrb.mxu2 %v386_v40  ;;  %v398_v39 = vld [vmem:[%s6139_s15 + $0x150] sm:$0xff]  ;;  %v988_v40 = vld [vmem:[%s6139_s15 + $0x13c0] sm:$0xff] }
  0xbb   : > { %2226 = vmatpush.xpose.msrb.mxu1 %v385_v43  ;;  %2266 = vmatpush.xpose.msrb.mxu3 %v387_v44  ;;  %v399_v43 = vld [vmem:[%s6139_s15 + $0x158] sm:$0xff]  ;;  %v989_v44 = vld [vmem:[%s6139_s15 + $0x13c8] sm:$0xff] }
  0xbd   : > { %2207 = vmatmul.f32.vlgmr.msrb.gmra.mxu0 %v1226_v28  ;;  %2247 = vmatmul.f32.vlgmr.msrb.gmra.mxu2 %v1228_v29  ;;  %v1244_v28 = vld.sshfl [vmem:[#allocation1 + $0x10] sm:$0xff pattern:$0x73625140]  ;;  %v1243_v29 = vld.sshfl [vmem:[#allocation1 + $0x8] sm:$0xff pattern:$0x73625140] }
  0xbe   : > { %2283 = vmatpush.xpose.msra.mxu0 %v976_v41  ;;  %2323 = vmatpush.xpose.msra.mxu2 %v978_v42  ;;  %v990_v41 = vld [vmem:[%s6139_s15 + $0x13d0] sm:$0xff]  ;;  %v397_v42 = vld [vmem:[%s6139_s15 + $0x148] sm:$0xff] }
  0xbf   : > { %2303 = vmatpush.xpose.msra.mxu1 %v977_v45  ;;  %2343 = vmatpush.xpose.msra.mxu3 %v979_v46  ;;  %v991_v45 = vld [vmem:[%s6139_s15 + $0x13d8] sm:$0xff]  ;;  %v792_v46 = vld [vmem:[%s6139_s15 + $0xda0] sm:$0xff] }
  0xc0   : > { %2227 = vmatmul.f32.vlgmr.msrb.gmra.mxu1 %v1227_v30  ;;  %2267 = vmatmul.f32.vlgmr.msrb.gmra.mxu3 %v1229_v32  ;;  %v789_v30 = vld [vmem:[%s6139_s15 + $0xd88] sm:$0xff]  ;;  %v319_v32 = vld [vmem:[%s6157_s17 + $0x60] sm:$0xff] }
  0xc1   : > { %1250 = vst [vmem:[#allocation1] ss:$4 sm:$0xff] %v319_v32  ;;  %v803_v32 = vld [vmem:[%s6139_s15 + $0xdf8] sm:$0xff] }
  0xc2   : > { %2284 = vmatpush.xpose.msra.mxu0 %v780_v47  ;;  %2324 = vmatpush.xpose.msra.mxu2 %v782_v48  ;;  %v794_v47 = vld [vmem:[%s6139_s15 + $0xdb0] sm:$0xff] }
  0xc3   : > { %2304 = vmatpush.xpose.msra.mxu1 %v781_v52  ;;  %2344 = vmatpush.xpose.msra.mxu3 %v783_v55  ;;  %v1246_v48 = vld.sshfl [vmem:[#allocation1 + $0x20] sm:$0xff pattern:$0x73625140]  ;;  %v1249_v52 = vld.sshfl [vmem:[#allocation1 + $0x38] sm:$0xff pattern:$0x73625140] }
  0xc4   : > { %v596_v55 = vld [vmem:[%s6139_s15 + $0x780] sm:$0xff] }
  0xc6   : > { %2285 = vmatpush.xpose.msra.mxu0 %v584_v56  ;;  %2325 = vmatpush.xpose.msra.mxu2 %v586_v57  ;;  %v598_v56 = vld [vmem:[%s6139_s15 + $0x790] sm:$0xff]  ;;  %v597_v57 = vld [vmem:[%s6139_s15 + $0x788] sm:$0xff] }
  0xc7   : > { %2305 = vmatpush.xpose.msra.mxu1 %v585_v58  ;;  %2345 = vmatpush.xpose.msra.mxu3 %v587_v59  ;;  %v599_v58 = vld [vmem:[%s6139_s15 + $0x798] sm:$0xff]  ;;  %v400_v59 = vld [vmem:[%s6139_s15 + $0x160] sm:$0xff] }
  0xca   : > { %2286 = vmatpush.xpose.msra.mxu0 %v388_v60  ;;  %2326 = vmatpush.xpose.msra.mxu2 %v390_v61  ;;  %v402_v60 = vld [vmem:[%s6139_s15 + $0x170] sm:$0xff]  ;;  %v992_v61 = vld [vmem:[%s6139_s15 + $0x13e0] sm:$0xff] }
  0xcb   : > { %2306 = vmatpush.xpose.msra.mxu1 %v389_v0  ;;  %2346 = vmatpush.xpose.msra.mxu3 %v391_v1  ;;  %v403_v0 = vld [vmem:[%s6139_s15 + $0x178] sm:$0xff]  ;;  %v993_v1 = vld [vmem:[%s6139_s15 + $0x13e8] sm:$0xff] }
  0xcd   : > { %2287 = vmatmul.f32.vlgmr.msra.gmra.mxu0 %v1232_v49  ;;  %2327 = vmatmul.f32.vlgmr.msra.gmra.mxu2 %v1234_v50  ;;  %v1248_v49 = vld.sshfl [vmem:[#allocation1 + $0x30] sm:$0xff pattern:$0x73625140]  ;;  %v1247_v50 = vld.sshfl [vmem:[#allocation1 + $0x28] sm:$0xff pattern:$0x73625140] }
  0xce   : > { %2363 = vmatpush.xpose.msrb.mxu0 %v980_v62  ;;  %2403 = vmatpush.xpose.msrb.mxu2 %v982_v63  ;;  %v994_v62 = vld [vmem:[%s6139_s15 + $0x13f0] sm:$0xff]  ;;  %v401_v63 = vld [vmem:[%s6139_s15 + $0x168] sm:$0xff] }
  0xcf   : > { %2383 = vmatpush.xpose.msrb.mxu1 %v981_v2  ;;  %2423 = vmatpush.xpose.msrb.mxu3 %v983_v3  ;;  %v995_v2 = vld [vmem:[%s6139_s15 + $0x13f8] sm:$0xff]  ;;  %v796_v3 = vld [vmem:[%s6139_s15 + $0xdc0] sm:$0xff] }
  0xd0   : > { %2307 = vmatmul.f32.vlgmr.msra.gmra.mxu1 %v1233_v51  ;;  %2347 = vmatmul.f32.vlgmr.msra.gmra.mxu3 %v1235_v53  ;;  %v793_v51 = vld [vmem:[%s6139_s15 + $0xda8] sm:$0xff]  ;;  %v320_v53 = vld [vmem:[%s6157_s17 + $0x68] sm:$0xff] }
  0xd1   : > { %1251 = vst [vmem:[#allocation1 + $0x20] ss:$4 sm:$0xff] %v320_v53  ;;  %v807_v53 = vld [vmem:[%s6139_s15 + $0xe18] sm:$0xff] }
  0xd2   : > { %2364 = vmatpush.xpose.msrb.mxu0 %v784_v4  ;;  %2404 = vmatpush.xpose.msrb.mxu2 %v786_v5  ;;  %v798_v4 = vld [vmem:[%s6139_s15 + $0xdd0] sm:$0xff] }
  0xd3   : > { %2384 = vmatpush.xpose.msrb.mxu1 %v785_v9  ;;  %2424 = vmatpush.xpose.msrb.mxu3 %v787_v12  ;;  %v1252_v5 = vld.sshfl [vmem:[#allocation1] sm:$0xff pattern:$0x73625140]  ;;  %v1255_v9 = vld.sshfl [vmem:[#allocation1 + $0x18] sm:$0xff pattern:$0x73625140] }
  0xd4   : > { %v600_v12 = vld [vmem:[%s6139_s15 + $0x7a0] sm:$0xff] }
  0xd6   : > { %2365 = vmatpush.xpose.msrb.mxu0 %v588_v13  ;;  %2405 = vmatpush.xpose.msrb.mxu2 %v590_v14  ;;  %v602_v13 = vld [vmem:[%s6139_s15 + $0x7b0] sm:$0xff]  ;;  %v601_v14 = vld [vmem:[%s6139_s15 + $0x7a8] sm:$0xff] }
  0xd7   : > { %2385 = vmatpush.xpose.msrb.mxu1 %v589_v15  ;;  %2425 = vmatpush.xpose.msrb.mxu3 %v591_v16  ;;  %v603_v15 = vld [vmem:[%s6139_s15 + $0x7b8] sm:$0xff]  ;;  %v404_v16 = vld [vmem:[%s6139_s15 + $0x180] sm:$0xff] }
  0xda   : > { %2366 = vmatpush.xpose.msrb.mxu0 %v392_v17  ;;  %2406 = vmatpush.xpose.msrb.mxu2 %v394_v18  ;;  %v406_v17 = vld [vmem:[%s6139_s15 + $0x190] sm:$0xff]  ;;  %v996_v18 = vld [vmem:[%s6139_s15 + $0x1400] sm:$0xff] }
  0xdb   : > { %2386 = vmatpush.xpose.msrb.mxu1 %v393_v21  ;;  %2426 = vmatpush.xpose.msrb.mxu3 %v395_v22  ;;  %v407_v21 = vld [vmem:[%s6139_s15 + $0x198] sm:$0xff]  ;;  %v997_v22 = vld [vmem:[%s6139_s15 + $0x1408] sm:$0xff] }
  0xdd   : > { %2367 = vmatmul.f32.vlgmr.msrb.gmra.mxu0 %v1236_v6  ;;  %2407 = vmatmul.f32.vlgmr.msrb.gmra.mxu2 %v1238_v7  ;;  %v1254_v6 = vld.sshfl [vmem:[#allocation1 + $0x10] sm:$0xff pattern:$0x73625140]  ;;  %v1253_v7 = vld.sshfl [vmem:[#allocation1 + $0x8] sm:$0xff pattern:$0x73625140] }
  0xde   : > { %2443 = vmatpush.xpose.msra.mxu0 %v984_v19  ;;  %2483 = vmatpush.xpose.msra.mxu2 %v986_v20  ;;  %v998_v19 = vld [vmem:[%s6139_s15 + $0x1410] sm:$0xff]  ;;  %v405_v20 = vld [vmem:[%s6139_s15 + $0x188] sm:$0xff] }
  0xdf   : > { %2463 = vmatpush.xpose.msra.mxu1 %v985_v23  ;;  %2503 = vmatpush.xpose.msra.mxu3 %v987_v24  ;;  %v999_v23 = vld [vmem:[%s6139_s15 + $0x1418] sm:$0xff]  ;;  %v800_v24 = vld [vmem:[%s6139_s15 + $0xde0] sm:$0xff] }
  0xe0   : > { %2387 = vmatmul.f32.vlgmr.msrb.gmra.mxu1 %v1237_v8  ;;  %2427 = vmatmul.f32.vlgmr.msrb.gmra.mxu3 %v1239_v10  ;;  %v797_v8 = vld [vmem:[%s6139_s15 + $0xdc8] sm:$0xff] }
  0xe1   : > { %v321_v10 = vld [vmem:[%s6157_s17 + $0x70] sm:$0xff] }
  0xe2   : > { %2444 = vmatpush.xpose.msra.mxu0 %v788_v25  ;;  %2484 = vmatpush.xpose.msra.mxu2 %v790_v26  ;;  %1260 = vst [vmem:[#allocation1] ss:$4 sm:$0xff] %v321_v10  ;;  %v802_v25 = vld [vmem:[%s6139_s15 + $0xdf0] sm:$0xff]  ;;  %v811_v10 = vld [vmem:[%s6139_s15 + $0xe38] sm:$0xff] }
  0xe3   : > { %2464 = vmatpush.xpose.msra.mxu1 %v789_v30  ;;  %2504 = vmatpush.xpose.msra.mxu3 %v791_v33  ;;  %v1256_v26 = vld.sshfl [vmem:[#allocation1 + $0x20] sm:$0xff pattern:$0x73625140]  ;;  %v1259_v30 = vld.sshfl [vmem:[#allocation1 + $0x38] sm:$0xff pattern:$0x73625140] }
  0xe4   : > { %v604_v33 = vld [vmem:[%s6139_s15 + $0x7c0] sm:$0xff] }
  0xe6   : > { %2445 = vmatpush.xpose.msra.mxu0 %v592_v34  ;;  %2485 = vmatpush.xpose.msra.mxu2 %v594_v35  ;;  %v606_v34 = vld [vmem:[%s6139_s15 + $0x7d0] sm:$0xff]  ;;  %v605_v35 = vld [vmem:[%s6139_s15 + $0x7c8] sm:$0xff] }
  0xe7   : > { %2465 = vmatpush.xpose.msra.mxu1 %v593_v36  ;;  %2505 = vmatpush.xpose.msra.mxu3 %v595_v37  ;;  %v607_v36 = vld [vmem:[%s6139_s15 + $0x7d8] sm:$0xff]  ;;  %v408_v37 = vld [vmem:[%s6139_s15 + $0x1a0] sm:$0xff] }
  0xea   : > { %2446 = vmatpush.xpose.msra.mxu0 %v396_v38  ;;  %2486 = vmatpush.xpose.msra.mxu2 %v398_v39  ;;  %v410_v38 = vld [vmem:[%s6139_s15 + $0x1b0] sm:$0xff]  ;;  %v1000_v39 = vld [vmem:[%s6139_s15 + $0x1420] sm:$0xff] }
  0xeb   : > { %2466 = vmatpush.xpose.msra.mxu1 %v397_v42  ;;  %2506 = vmatpush.xpose.msra.mxu3 %v399_v43  ;;  %v411_v42 = vld [vmem:[%s6139_s15 + $0x1b8] sm:$0xff]  ;;  %v1001_v43 = vld [vmem:[%s6139_s15 + $0x1428] sm:$0xff] }
  0xed   : > { %2447 = vmatmul.f32.vlgmr.msra.gmra.mxu0 %v1242_v27  ;;  %2487 = vmatmul.f32.vlgmr.msra.gmra.mxu2 %v1244_v28  ;;  %v1258_v27 = vld.sshfl [vmem:[#allocation1 + $0x30] sm:$0xff pattern:$0x73625140]  ;;  %v1257_v28 = vld.sshfl [vmem:[#allocation1 + $0x28] sm:$0xff pattern:$0x73625140] }
  0xee   : > { %2523 = vmatpush.xpose.msrb.mxu0 %v988_v40  ;;  %2563 = vmatpush.xpose.msrb.mxu2 %v990_v41  ;;  %v1002_v40 = vld [vmem:[%s6139_s15 + $0x1430] sm:$0xff]  ;;  %v409_v41 = vld [vmem:[%s6139_s15 + $0x1a8] sm:$0xff] }
  0xef   : > { %2543 = vmatpush.xpose.msrb.mxu1 %v989_v44  ;;  %2583 = vmatpush.xpose.msrb.mxu3 %v991_v45  ;;  %v1003_v44 = vld [vmem:[%s6139_s15 + $0x1438] sm:$0xff]  ;;  %v804_v45 = vld [vmem:[%s6139_s15 + $0xe00] sm:$0xff] }
  0xf0   : > { %2467 = vmatmul.f32.vlgmr.msra.gmra.mxu1 %v1243_v29  ;;  %2507 = vmatmul.f32.vlgmr.msra.gmra.mxu3 %v1245_v31  ;;  %v801_v29 = vld [vmem:[%s6139_s15 + $0xde8] sm:$0xff] }
  0xf1   : > { %v322_v31 = vld [vmem:[%s6157_s17 + $0x78] sm:$0xff] }
  0xf2   : > { %2524 = vmatpush.xpose.msrb.mxu0 %v792_v46  ;;  %2564 = vmatpush.xpose.msrb.mxu2 %v794_v47  ;;  %1261 = vst [vmem:[#allocation1 + $0x20] ss:$4 sm:$0xff] %v322_v31  ;;  %v806_v46 = vld [vmem:[%s6139_s15 + $0xe10] sm:$0xff]  ;;  %v815_v31 = vld [vmem:[%s6139_s15 + $0xe58] sm:$0xff] }
  0xf3   : > { %2544 = vmatpush.xpose.msrb.mxu1 %v793_v51  ;;  %2584 = vmatpush.xpose.msrb.mxu3 %v795_v54  ;;  %v1262_v47 = vld.sshfl [vmem:[#allocation1] sm:$0xff pattern:$0x73625140]  ;;  %v1265_v51 = vld.sshfl [vmem:[#allocation1 + $0x18] sm:$0xff pattern:$0x73625140] }
  0xf4   : > { %v608_v54 = vld [vmem:[%s6139_s15 + $0x7e0] sm:$0xff] }
  0xf6   : > { %2525 = vmatpush.xpose.msrb.mxu0 %v596_v55  ;;  %2565 = vmatpush.xpose.msrb.mxu2 %v598_v56  ;;  %v610_v55 = vld [vmem:[%s6139_s15 + $0x7f0] sm:$0xff]  ;;  %v609_v56 = vld [vmem:[%s6139_s15 + $0x7e8] sm:$0xff] }
  0xf7   : > { %2545 = vmatpush.xpose.msrb.mxu1 %v597_v57  ;;  %2585 = vmatpush.xpose.msrb.mxu3 %v599_v58  ;;  %v611_v57 = vld [vmem:[%s6139_s15 + $0x7f8] sm:$0xff]  ;;  %v412_v58 = vld [vmem:[%s6139_s15 + $0x1c0] sm:$0xff] }
  0xfa   : > { %2526 = vmatpush.xpose.msrb.mxu0 %v400_v59  ;;  %2566 = vmatpush.xpose.msrb.mxu2 %v402_v60  ;;  %v414_v59 = vld [vmem:[%s6139_s15 + $0x1d0] sm:$0xff]  ;;  %v1004_v60 = vld [vmem:[%s6139_s15 + $0x1440] sm:$0xff] }
  0xfb   : > { %2546 = vmatpush.xpose.msrb.mxu1 %v401_v63  ;;  %2586 = vmatpush.xpose.msrb.mxu3 %v403_v0  ;;  %v415_v63 = vld [vmem:[%s6139_s15 + $0x1d8] sm:$0xff]  ;;  %v1005_v0 = vld [vmem:[%s6139_s15 + $0x1448] sm:$0xff] }
  0xfd   : > { %2527 = vmatmul.f32.vlgmr.msrb.gmra.mxu0 %v1246_v48  ;;  %2567 = vmatmul.f32.vlgmr.msrb.gmra.mxu2 %v1248_v49  ;;  %v1264_v48 = vld.sshfl [vmem:[#allocation1 + $0x10] sm:$0xff pattern:$0x73625140]  ;;  %v1263_v49 = vld.sshfl [vmem:[#allocation1 + $0x8] sm:$0xff pattern:$0x73625140] }
  0xfe   : > { %2603 = vmatpush.xpose.msra.mxu0 %v992_v61  ;;  %2643 = vmatpush.xpose.msra.mxu2 %v994_v62  ;;  %v1006_v61 = vld [vmem:[%s6139_s15 + $0x1450] sm:$0xff]  ;;  %v413_v62 = vld [vmem:[%s6139_s15 + $0x1c8] sm:$0xff] }
  0xff   : > { %2623 = vmatpush.xpose.msra.mxu1 %v993_v1  ;;  %2663 = vmatpush.xpose.msra.mxu3 %v995_v2  ;;  %v1007_v1 = vld [vmem:[%s6139_s15 + $0x1458] sm:$0xff]  ;;  %v808_v2 = vld [vmem:[%s6139_s15 + $0xe20] sm:$0xff] }
 0x100   : > { %2547 = vmatmul.f32.vlgmr.msrb.gmra.mxu1 %v1247_v50  ;;  %2587 = vmatmul.f32.vlgmr.msrb.gmra.mxu3 %v1249_v52  ;;  %v805_v50 = vld [vmem:[%s6139_s15 + $0xe08] sm:$0xff]  ;;  %v323_v52 = vld [vmem:[%s6157_s17 + $0x80] sm:$0xff] }
 0x101   : > { %1270 = vst [vmem:[#allocation1] ss:$4 sm:$0xff] %v323_v52 }
 0x102   : > { %2604 = vmatpush.xpose.msra.mxu0 %v796_v3  ;;  %2644 = vmatpush.xpose.msra.mxu2 %v798_v4  ;;  %v810_v3 = vld [vmem:[%s6139_s15 + $0xe30] sm:$0xff] }
 0x103   : > { %2624 = vmatpush.xpose.msra.mxu1 %v797_v8  ;;  %2664 = vmatpush.xpose.msra.mxu3 %v799_v11  ;;  %v1266_v4 = vld.sshfl [vmem:[#allocation1 + $0x20] sm:$0xff pattern:$0x73625140]  ;;  %v1269_v8 = vld.sshfl [vmem:[#allocation1 + $0x38] sm:$0xff pattern:$0x73625140] }
 0x104   : > { %v612_v11 = vld [vmem:[%s6139_s15 + $0x800] sm:$0xff] }
 0x106   : > { %2605 = vmatpush.xpose.msra.mxu0 %v600_v12  ;;  %2645 = vmatpush.xpose.msra.mxu2 %v602_v13  ;;  %v614_v12 = vld [vmem:[%s6139_s15 + $0x810] sm:$0xff]  ;;  %v613_v13 = vld [vmem:[%s6139_s15 + $0x808] sm:$0xff] }
 0x107   : > { %2625 = vmatpush.xpose.msra.mxu1 %v601_v14  ;;  %2665 = vmatpush.xpose.msra.mxu3 %v603_v15  ;;  %v615_v14 = vld [vmem:[%s6139_s15 + $0x818] sm:$0xff]  ;;  %v416_v15 = vld [vmem:[%s6139_s15 + $0x1e0] sm:$0xff] }
 0x10a   : > { %2606 = vmatpush.xpose.msra.mxu0 %v404_v16  ;;  %2646 = vmatpush.xpose.msra.mxu2 %v406_v17  ;;  %v418_v16 = vld [vmem:[%s6139_s15 + $0x1f0] sm:$0xff]  ;;  %v1008_v17 = vld [vmem:[%s6139_s15 + $0x1460] sm:$0xff] }
 0x10b   : > { %2626 = vmatpush.xpose.msra.mxu1 %v405_v20  ;;  %2666 = vmatpush.xpose.msra.mxu3 %v407_v21  ;;  %v419_v20 = vld [vmem:[%s6139_s15 + $0x1f8] sm:$0xff]  ;;  %v1009_v21 = vld [vmem:[%s6139_s15 + $0x1468] sm:$0xff] }
 0x10d   : > { %2607 = vmatmul.f32.vlgmr.msra.gmra.mxu0 %v1252_v5  ;;  %2647 = vmatmul.f32.vlgmr.msra.gmra.mxu2 %v1254_v6  ;;  %v1268_v5 = vld.sshfl [vmem:[#allocation1 + $0x30] sm:$0xff pattern:$0x73625140]  ;;  %v1267_v6 = vld.sshfl [vmem:[#allocation1 + $0x28] sm:$0xff pattern:$0x73625140] }
 0x10e   : > { %2683 = vmatpush.xpose.msrb.mxu0 %v996_v18  ;;  %2723 = vmatpush.xpose.msrb.mxu2 %v998_v19  ;;  %v1010_v18 = vld [vmem:[%s6139_s15 + $0x1470] sm:$0xff]  ;;  %v417_v19 = vld [vmem:[%s6139_s15 + $0x1e8] sm:$0xff] }
 0x10f   : > { %2703 = vmatpush.xpose.msrb.mxu1 %v997_v22  ;;  %2743 = vmatpush.xpose.msrb.mxu3 %v999_v23  ;;  %v1011_v22 = vld [vmem:[%s6139_s15 + $0x1478] sm:$0xff]  ;;  %v812_v23 = vld [vmem:[%s6139_s15 + $0xe40] sm:$0xff] }
 0x110   : > { %2627 = vmatmul.f32.vlgmr.msra.gmra.mxu1 %v1253_v7  ;;  %2667 = vmatmul.f32.vlgmr.msra.gmra.mxu3 %v1255_v9  ;;  %v809_v7 = vld [vmem:[%s6139_s15 + $0xe28] sm:$0xff]  ;;  %v324_v9 = vld [vmem:[%s6157_s17 + $0x88] sm:$0xff] }
 0x111   : > { %1271 = vst [vmem:[#allocation1 + $0x20] ss:$4 sm:$0xff] %v324_v9  ;;  %v425_v9 = vld [vmem:[%s6139_s15 + $0x228] sm:$0xff] }
 0x112   : > { %2684 = vmatpush.xpose.msrb.mxu0 %v800_v24  ;;  %2724 = vmatpush.xpose.msrb.mxu2 %v802_v25  ;;  %v814_v24 = vld [vmem:[%s6139_s15 + $0xe50] sm:$0xff] }
 0x113   : > { %2704 = vmatpush.xpose.msrb.mxu1 %v801_v29  ;;  %2744 = vmatpush.xpose.msrb.mxu3 %v803_v32  ;;  %v1272_v25 = vld.sshfl [vmem:[#allocation1] sm:$0xff pattern:$0x73625140]  ;;  %v1275_v29 = vld.sshfl [vmem:[#allocation1 + $0x18] sm:$0xff pattern:$0x73625140]  ;;  %v1668_v32 = vpop.f32.mrf.mxu1 }
 0x116   : > { %2685 = vmatpush.xpose.msrb.mxu0 %v604_v33  ;;  %2725 = vmatpush.xpose.msrb.mxu2 %v606_v34  ;;  %v616_v33 = vld [vmem:[%s6139_s15 + $0x820] sm:$0xff]  ;;  %v618_v34 = vld [vmem:[%s6139_s15 + $0x830] sm:$0xff] }
 0x117   : > { %2705 = vmatpush.xpose.msrb.mxu1 %v605_v35  ;;  %2745 = vmatpush.xpose.msrb.mxu3 %v607_v36  ;;  %v1648_v35 = vpop.f32.mrf.mxu0  ;;  %v617_v36 = vld [vmem:[%s6139_s15 + $0x828] sm:$0xff] }
 0x118   : > { %v1276_v52 = vld.sshfl [vmem:[#allocation1 + $0x20] sm:$0xff pattern:$0x73625140] }
 0x11a   : > { %2686 = vmatpush.xpose.msrb.mxu0 %v408_v37  ;;  %2726 = vmatpush.xpose.msrb.mxu2 %v410_v38  ;;  %v1669_v37 = vadd.f32 %v1668_v32, %v1648_v35  ;;  %v619_v38 = vld [vmem:[%s6139_s15 + $0x838] sm:$0xff]  ;;  %v428_v32 = vld [vmem:[%s6139_s15 + $0x240] sm:$0xff]  ;;  %v1022_v35 = vld [vmem:[%s6139_s15 + $0x14d0] sm:$0xff] }
 0x11b   : > { %2706 = vmatpush.xpose.msrb.mxu1 %v409_v41  ;;  %2746 = vmatpush.xpose.msrb.mxu3 %v411_v42  ;;  %v422_v41 = vld [vmem:[%s6139_s15 + $0x210] sm:$0xff]  ;;  %v1012_v42 = vld [vmem:[%s6139_s15 + $0x1480] sm:$0xff] }
 0x11d   : > { %2687 = vmatmul.f32.vlgmr.msrb.gmra.mxu0 %v1256_v26  ;;  %2727 = vmatmul.f32.vlgmr.msrb.gmra.mxu2 %v1258_v27  ;;  %v1274_v26 = vld.sshfl [vmem:[#allocation1 + $0x10] sm:$0xff pattern:$0x73625140]  ;;  %v1273_v27 = vld.sshfl [vmem:[#allocation1 + $0x8] sm:$0xff pattern:$0x73625140] }
 0x11e   : > { %2763 = vmatpush.xpose.msra.mxu0 %v1000_v39  ;;  %2803 = vmatpush.xpose.msra.mxu2 %v1002_v40  ;;  %v1688_v39 = vpop.f32.mrf.mxu2  ;;  %v420_v40 = vld [vmem:[%s6139_s15 + $0x200] sm:$0xff] }
 0x11f   : > { %2783 = vmatpush.xpose.msra.mxu1 %v1001_v43  ;;  %2823 = vmatpush.xpose.msra.mxu3 %v1003_v44  ;;  %v1014_v43 = vld [vmem:[%s6139_s15 + $0x1490] sm:$0xff]  ;;  %v421_v44 = vld [vmem:[%s6139_s15 + $0x208] sm:$0xff] }
 0x120   : > { %2707 = vmatmul.f32.vlgmr.msrb.gmra.mxu1 %v1257_v28  ;;  %2747 = vmatmul.f32.vlgmr.msrb.gmra.mxu3 %v1259_v30  ;;  %v813_v28 = vld [vmem:[%s6139_s15 + $0xe48] sm:$0xff] }
 0x121   : > { %v325_v30 = vld [vmem:[%s6157_s17 + $0x90] sm:$0xff] }
 0x122   : > { %2764 = vmatpush.xpose.msra.mxu0 %v804_v45  ;;  %2804 = vmatpush.xpose.msra.mxu2 %v806_v46  ;;  %1280 = vst [vmem:[#allocation1] ss:$4 sm:$0xff] %v325_v30  ;;  %v1689_v45 = vadd.f32 %v1688_v39, %v1669_v37  ;;  %v423_v46 = vld [vmem:[%s6139_s15 + $0x218] sm:$0xff] }
 0x123   : > { %2784 = vmatpush.xpose.msra.mxu1 %v805_v50  ;;  %2824 = vmatpush.xpose.msra.mxu3 %v807_v53  ;;  %v816_v50 = vld [vmem:[%s6139_s15 + $0xe60] sm:$0xff]  ;;  %v627_v30 = vld [vmem:[%s6139_s15 + $0x878] sm:$0xff] }
 0x126   : > { %2765 = vmatpush.xpose.msra.mxu0 %v608_v54  ;;  %2805 = vmatpush.xpose.msra.mxu2 %v610_v55  ;;  %v1278_v54 = vld.sshfl [vmem:[#allocation1 + $0x30] sm:$0xff pattern:$0x73625140]  ;;  %v1277_v55 = vld.sshfl [vmem:[#allocation1 + $0x28] sm:$0xff pattern:$0x73625140] }
 0x127   : > { %2785 = vmatpush.xpose.msra.mxu1 %v609_v56  ;;  %2825 = vmatpush.xpose.msra.mxu3 %v611_v57  ;;  %v1728_v56 = vpop.f32.mrf.mxu0  ;;  %v817_v57 = vld [vmem:[%s6139_s15 + $0xe68] sm:$0xff] }
 0x12a   : > { %2766 = vmatpush.xpose.msra.mxu0 %v412_v58  ;;  %2806 = vmatpush.xpose.msra.mxu2 %v414_v59  ;;  %v1279_v58 = vld.sshfl [vmem:[#allocation1 + $0x38] sm:$0xff pattern:$0x73625140] }
 0x12b   : > { %2786 = vmatpush.xpose.msra.mxu1 %v413_v62  ;;  %2826 = vmatpush.xpose.msra.mxu3 %v415_v63  ;;  %v326_v59 = vld [vmem:[%s6157_s17 + $0x98] sm:$0xff] }
 0x12c   : > { %1281 = vst [vmem:[#allocation1 + $0x20] ss:$4 sm:$0xff] %v326_v59  ;;  %v622_v63 = vld [vmem:[%s6139_s15 + $0x850] sm:$0xff]  ;;  %v631_v59 = vld [vmem:[%s6139_s15 + $0x898] sm:$0xff] }
 0x12d   : > { %2767 = vmatmul.f32.vlgmr.msra.gmra.mxu0 %v1262_v47  ;;  %2807 = vmatmul.f32.vlgmr.msra.gmra.mxu2 %v1264_v48  ;;  %v1708_v47 = vpop.f32.mrf.mxu3  ;;  %v1013_v48 = vld [vmem:[%s6139_s15 + $0x1488] sm:$0xff] }
 0x12e   : > { %2843 = vmatpush.xpose.msrb.mxu0 %v1004_v60  ;;  %2883 = vmatpush.xpose.msrb.mxu2 %v1006_v61  ;;  %v1709_v53 = vadd.f32 %v1708_v47, %v1689_v45  ;;  %v819_v60 = vld [vmem:[%s6139_s15 + $0xe78] sm:$0xff]  ;;  %v620_v61 = vld [vmem:[%s6139_s15 + $0x840] sm:$0xff] }
 0x12f   : > { %2863 = vmatpush.xpose.msrb.mxu1 %v1005_v0  ;;  %2903 = vmatpush.xpose.msrb.mxu3 %v1007_v1  ;;  %v1748_v0 = vpop.f32.mrf.mxu1  ;;  %v621_v1 = vld [vmem:[%s6139_s15 + $0x848] sm:$0xff] }
 0x130   : > { %2787 = vmatmul.f32.vlgmr.msra.gmra.mxu1 %v1263_v49  ;;  %2827 = vmatmul.f32.vlgmr.msra.gmra.mxu3 %v1265_v51  ;;  %v1015_v49 = vld [vmem:[%s6139_s15 + $0x1498] sm:$0xff]  ;;  %v818_v51 = vld [vmem:[%s6139_s15 + $0xe70] sm:$0xff]  ;;  %v1729_v62 = vadd.f32 %v1728_v56, %v1709_v53 }
 0x131   : > { %v630_v56 = vld [vmem:[%s6139_s15 + $0x890] sm:$0xff] }
 0x132   : > { %2844 = vmatpush.xpose.msrb.mxu0 %v808_v2  ;;  %2884 = vmatpush.xpose.msrb.mxu2 %v810_v3  ;;  %v623_v2 = vld [vmem:[%s6139_s15 + $0x858] sm:$0xff]  ;;  %v424_v3 = vld [vmem:[%s6139_s15 + $0x220] sm:$0xff] }
 0x133   : > { %2864 = vmatpush.xpose.msrb.mxu1 %v809_v7  ;;  %2904 = vmatpush.xpose.msrb.mxu3 %v811_v10  ;;  %v1768_v7 = vpop.f32.mrf.mxu2  ;;  %v427_v10 = vld [vmem:[%s6139_s15 + $0x238] sm:$0xff] }
 0x134   : > { %v1287_v47 = vld.sshfl [vmem:[#allocation1 + $0x28] sm:$0xff pattern:$0x73625140] }
 0x136   : > { %2845 = vmatpush.xpose.msrb.mxu0 %v612_v11  ;;  %2885 = vmatpush.xpose.msrb.mxu2 %v614_v12  ;;  %v1017_v11 = vld [vmem:[%s6139_s15 + $0x14a8] sm:$0xff] }
 0x137   : > { %2865 = vmatpush.xpose.msrb.mxu1 %v613_v13  ;;  %2905 = vmatpush.xpose.msrb.mxu3 %v615_v14  ;;  %v1019_v13 = vld [vmem:[%s6139_s15 + $0x14b8] sm:$0xff]  ;;  %v1788_v14 = vpop.f32.mrf.mxu3 }
 0x13a   : > { %2846 = vmatpush.xpose.msrb.mxu0 %v416_v15  ;;  %2886 = vmatpush.xpose.msrb.mxu2 %v418_v16  ;;  %v820_v15 = vld [vmem:[%s6139_s15 + $0xe80] sm:$0xff]  ;;  %v822_v16 = vld [vmem:[%s6139_s15 + $0xe90] sm:$0xff] }
 0x13b   : > { %2866 = vmatpush.xpose.msrb.mxu1 %v417_v19  ;;  %2906 = vmatpush.xpose.msrb.mxu3 %v419_v20  ;;  %v1283_v19 = vld.sshfl [vmem:[#allocation1 + $0x8] sm:$0xff pattern:$0x73625140]  ;;  %v821_v20 = vld [vmem:[%s6139_s15 + $0xe88] sm:$0xff]  ;;  %v1848_v39 = vpop.f32.mrf.mxu2 }
 0x13d   : > { %2847 = vmatmul.f32.vlgmr.msrb.gmra.mxu0 %v1266_v4  ;;  %2887 = vmatmul.f32.vlgmr.msrb.gmra.mxu2 %v1268_v5  ;;  %v1749_v4 = vadd.f32 %v1748_v0, %v1729_v62  ;;  %v426_v5 = vld [vmem:[%s6139_s15 + $0x230] sm:$0xff] }
 0x13e   : > { %2923 = vmatpush.xpose.msra.mxu0 %v1008_v17  ;;  %2963 = vmatpush.xpose.msra.mxu2 %v1010_v18  ;;  %v1282_v17 = vld.sshfl [vmem:[#allocation1] sm:$0xff pattern:$0x73625140]  ;;  %v1284_v18 = vld.sshfl [vmem:[#allocation1 + $0x10] sm:$0xff pattern:$0x73625140] }
 0x13f   : > { %2943 = vmatpush.xpose.msra.mxu1 %v1009_v21  ;;  %2983 = vmatpush.xpose.msra.mxu3 %v1011_v22  ;;  %v1769_v12 = vadd.f32 %v1768_v7, %v1749_v4  ;;  %v1285_v21 = vld.sshfl [vmem:[#allocation1 + $0x18] sm:$0xff pattern:$0x73625140]  ;;  %v327_v22 = vld [vmem:[%s6157_s17 + $0xa0] sm:$0xff] }
 0x140   : > { %2867 = vmatmul.f32.vlgmr.msrb.gmra.mxu1 %v1267_v6  ;;  %2907 = vmatmul.f32.vlgmr.msrb.gmra.mxu3 %v1269_v8  ;;  %v1016_v6 = vld [vmem:[%s6139_s15 + $0x14a0] sm:$0xff]  ;;  %v1018_v8 = vld [vmem:[%s6139_s15 + $0x14b0] sm:$0xff]  ;;  %1290 = vst [vmem:[#allocation1] ss:$4 sm:$0xff] %v327_v22  ;;  %v435_v4 = vld [vmem:[%s6139_s15 + $0x278] sm:$0xff] }
 0x141   : > { %v434_v62 = vld [vmem:[%s6139_s15 + $0x270] sm:$0xff]  ;;  %v1027_v7 = vld [vmem:[%s6139_s15 + $0x14f8] sm:$0xff] }
 0x142   : > { %2924 = vmatpush.xpose.msra.mxu0 %v812_v23  ;;  %2964 = vmatpush.xpose.msra.mxu2 %v814_v24  ;;  %v1789_v23 = vadd.f32 %v1788_v14, %v1769_v12  ;;  %v823_v24 = vld [vmem:[%s6139_s15 + $0xe98] sm:$0xff]  ;;  %v634_v22 = vld [vmem:[%s6139_s15 + $0x8b0] sm:$0xff] }
 0x143   : > { %2944 = vmatpush.xpose.msra.mxu1 %v813_v28  ;;  %2984 = vmatpush.xpose.msra.mxu3 %v815_v31  ;;  %v625_v28 = vld [vmem:[%s6139_s15 + $0x868] sm:$0xff]  ;;  %v1828_v31 = vpop.f32.mrf.mxu1  ;;  %v1928_v0 = vpop.f32.mrf.mxu2 }
 0x146   : > { %2925 = vmatpush.xpose.msra.mxu0 %v616_v33  ;;  %2965 = vmatpush.xpose.msra.mxu2 %v618_v34  ;;  %v430_v33 = vld [vmem:[%s6139_s15 + $0x250] sm:$0xff]  ;;  %v1020_v34 = vld [vmem:[%s6139_s15 + $0x14c0] sm:$0xff] }
 0x147   : > { %2945 = vmatpush.xpose.msra.mxu1 %v617_v36  ;;  %2985 = vmatpush.xpose.msra.mxu3 %v619_v38  ;;  %v429_v36 = vld [vmem:[%s6139_s15 + $0x248] sm:$0xff]  ;;  %v431_v38 = vld [vmem:[%s6139_s15 + $0x258] sm:$0xff] }
 0x148   : > { %v1294_v12 = vld.sshfl [vmem:[#allocation1 + $0x10] sm:$0xff pattern:$0x73625140] }
 0x14a   : > { %2926 = vmatpush.xpose.msra.mxu0 %v420_v40  ;;  %2966 = vmatpush.xpose.msra.mxu2 %v422_v41  ;;  %v1021_v40 = vld [vmem:[%s6139_s15 + $0x14c8] sm:$0xff]  ;;  %v1023_v41 = vld [vmem:[%s6139_s15 + $0x14d8] sm:$0xff] }
 0x14b   : > { %2946 = vmatpush.xpose.msra.mxu1 %v421_v44  ;;  %2986 = vmatpush.xpose.msra.mxu3 %v423_v46  ;;  %v1286_v44 = vld.sshfl [vmem:[#allocation1 + $0x20] sm:$0xff pattern:$0x73625140]  ;;  %v1288_v46 = vld.sshfl [vmem:[#allocation1 + $0x30] sm:$0xff pattern:$0x73625140] }
 0x14d   : > { %2927 = vmatmul.f32.vlgmr.msra.gmra.mxu0 %v1272_v25  ;;  %2967 = vmatmul.f32.vlgmr.msra.gmra.mxu2 %v1274_v26  ;;  %v1808_v25 = vpop.f32.mrf.mxu0  ;;  %v624_v26 = vld [vmem:[%s6139_s15 + $0x860] sm:$0xff] }
 0x14e   : > { %3003 = vmatpush.xpose.msrb.mxu0 %v1012_v42  ;;  %3043 = vmatpush.xpose.msrb.mxu2 %v1014_v43  ;;  %v824_v42 = vld [vmem:[%s6139_s15 + $0xea0] sm:$0xff]  ;;  %v826_v43 = vld [vmem:[%s6139_s15 + $0xeb0] sm:$0xff] }
 0x14f   : > { %3023 = vmatpush.xpose.msrb.mxu1 %v1013_v48  ;;  %3063 = vmatpush.xpose.msrb.mxu3 %v1015_v49  ;;  %v1868_v48 = vpop.f32.mrf.mxu3  ;;  %v825_v49 = vld [vmem:[%s6139_s15 + $0xea8] sm:$0xff] }
 0x150   : > { %2947 = vmatmul.f32.vlgmr.msra.gmra.mxu1 %v1273_v27  ;;  %2987 = vmatmul.f32.vlgmr.msra.gmra.mxu3 %v1275_v29  ;;  %v626_v27 = vld [vmem:[%s6139_s15 + $0x870] sm:$0xff]  ;;  %v1809_v29 = vadd.f32 %v1808_v25, %v1789_v23  ;;  %v635_v25 = vld [vmem:[%s6139_s15 + $0x8b8] sm:$0xff] }
 0x152   : > { %3004 = vmatpush.xpose.msrb.mxu0 %v816_v50  ;;  %3044 = vmatpush.xpose.msrb.mxu2 %v818_v51  ;;  %v1829_v37 = vadd.f32 %v1828_v31, %v1809_v29  ;;  %v1289_v50 = vld.sshfl [vmem:[#allocation1 + $0x38] sm:$0xff pattern:$0x73625140]  ;;  %v328_v51 = vld [vmem:[%s6157_s17 + $0xa8] sm:$0xff] }
 0x153   : > { %3024 = vmatpush.xpose.msrb.mxu1 %v817_v57  ;;  %3064 = vmatpush.xpose.msrb.mxu3 %v819_v60  ;;  %1291 = vst [vmem:[#allocation1 + $0x20] ss:$4 sm:$0xff] %v328_v51  ;;  %v629_v57 = vld [vmem:[%s6139_s15 + $0x888] sm:$0xff]  ;;  %v1908_v60 = vpop.f32.mrf.mxu1  ;;  %v438_v29 = vld [vmem:[%s6139_s15 + $0x290] sm:$0xff]  ;;  %v636_v51 = vld [vmem:[%s6139_s15 + $0x8c0] sm:$0xff] }
 0x154   : > { %v1849_v45 = vadd.f32 %v1848_v39, %v1829_v37  ;;  %v1030_v31 = vld [vmem:[%s6139_s15 + $0x1510] sm:$0xff]  ;;  %v1031_v37 = vld [vmem:[%s6139_s15 + $0x1518] sm:$0xff]  ;;  %v832_v39 = vld [vmem:[%s6139_s15 + $0xee0] sm:$0xff] }
 0x155   : > { %v1888_v53 = vpop.f32.mrf.mxu0 }
 0x156   : > { %3005 = vmatpush.xpose.msrb.mxu0 %v620_v61  ;;  %3045 = vmatpush.xpose.msrb.mxu2 %v622_v63  ;;  %v432_v61 = vld [vmem:[%s6139_s15 + $0x260] sm:$0xff] }
 0x157   : > { %3025 = vmatpush.xpose.msrb.mxu1 %v621_v1  ;;  %3065 = vmatpush.xpose.msrb.mxu3 %v623_v2  ;;  %v1024_v63 = vld [vmem:[%s6139_s15 + $0x14e0] sm:$0xff]  ;;  %v1026_v1 = vld [vmem:[%s6139_s15 + $0x14f0] sm:$0xff]  ;;  %v433_v2 = vld [vmem:[%s6139_s15 + $0x268] sm:$0xff] }
 0x15a   : > { %3006 = vmatpush.xpose.msrb.mxu0 %v424_v3  ;;  %3046 = vmatpush.xpose.msrb.mxu2 %v426_v5  ;;  %v1025_v5 = vld [vmem:[%s6139_s15 + $0x14e8] sm:$0xff] }
 0x15b   : > { %3026 = vmatpush.xpose.msrb.mxu1 %v425_v9  ;;  %3066 = vmatpush.xpose.msrb.mxu3 %v427_v10  ;;  %v828_v9 = vld [vmem:[%s6139_s15 + $0xec0] sm:$0xff]  ;;  %v830_v10 = vld [vmem:[%s6139_s15 + $0xed0] sm:$0xff]  ;;  %v1988_v23 = vpop.f32.mrf.mxu1 }
 0x15d   : > { %3007 = vmatmul.f32.vlgmr.msrb.gmra.mxu0 %v1276_v52  ;;  %3047 = vmatmul.f32.vlgmr.msrb.gmra.mxu2 %v1278_v54  ;;  %v827_v52 = vld [vmem:[%s6139_s15 + $0xeb8] sm:$0xff]  ;;  %v628_v54 = vld [vmem:[%s6139_s15 + $0x880] sm:$0xff]  ;;  %v1968_v14 = vpop.f32.mrf.mxu0 }
 0x15e   : > { %3083 = vmatpush.xpose.msra.mxu0 %v1016_v6  ;;  %3123 = vmatpush.xpose.msra.mxu2 %v1018_v8  ;;  %v1948_v8 = vpop.f32.mrf.mxu3 }
 0x15f   : > { %3103 = vmatpush.xpose.msra.mxu1 %v1017_v11  ;;  %3143 = vmatpush.xpose.msra.mxu3 %v1019_v13  ;;  %v1292_v11 = vld.sshfl [vmem:[#allocation1] sm:$0xff pattern:$0x73625140]  ;;  %v1293_v13 = vld.sshfl [vmem:[#allocation1 + $0x8] sm:$0xff pattern:$0x73625140] }
 0x160   : > { %3027 = vmatmul.f32.vlgmr.msrb.gmra.mxu1 %v1277_v55  ;;  %3067 = vmatmul.f32.vlgmr.msrb.gmra.mxu3 %v1279_v58  ;;  %v1869_v55 = vadd.f32 %v1868_v48, %v1849_v45  ;;  %v833_v45 = vld [vmem:[%s6139_s15 + $0xee8] sm:$0xff] }
 0x162   : > { %3084 = vmatpush.xpose.msra.mxu0 %v820_v15  ;;  %3124 = vmatpush.xpose.msra.mxu2 %v822_v16  ;;  %v1889_v58 = vadd.f32 %v1888_v53, %v1869_v55  ;;  %v829_v15 = vld [vmem:[%s6139_s15 + $0xec8] sm:$0xff] }
 0x163   : > { %3104 = vmatpush.xpose.msra.mxu1 %v821_v20  ;;  %3144 = vmatpush.xpose.msra.mxu3 %v823_v24  ;;  %v1295_v16 = vld.sshfl [vmem:[#allocation1 + $0x18] sm:$0xff pattern:$0x73625140]  ;;  %v632_v20 = vld [vmem:[%s6139_s15 + $0x8a0] sm:$0xff] }
 0x164   : > { %v1909_v3 = vadd.f32 %v1908_v60, %v1889_v58  ;;  %v633_v24 = vld [vmem:[%s6139_s15 + $0x8a8] sm:$0xff]  ;;  %v1032_v60 = vld [vmem:[%s6139_s15 + $0x1520] sm:$0xff] }
 0x166   : > { %3085 = vmatpush.xpose.msra.mxu0 %v624_v26  ;;  %3125 = vmatpush.xpose.msra.mxu2 %v626_v27  ;;  %v1929_v6 = vadd.f32 %v1928_v0, %v1909_v3  ;;  %v2008_v26 = vpop.f32.mrf.mxu2  ;;  %v436_v27 = vld [vmem:[%s6139_s15 + $0x280] sm:$0xff]  ;;  %v443_v0 = vld [vmem:[%s6139_s15 + $0x2b8] sm:$0xff] }
 0x167   : > { %3105 = vmatpush.xpose.msra.mxu1 %v625_v28  ;;  %3145 = vmatpush.xpose.msra.mxu3 %v627_v30  ;;  %v1028_v30 = vld [vmem:[%s6139_s15 + $0x1500] sm:$0xff] }
 0x16a   : > { %3086 = vmatpush.xpose.msra.mxu0 %v428_v32  ;;  %3126 = vmatpush.xpose.msra.mxu2 %v430_v33  ;;  %v437_v32 = vld [vmem:[%s6139_s15 + $0x288] sm:$0xff] }
 0x16b   : > { %3106 = vmatpush.xpose.msra.mxu1 %v429_v36  ;;  %3146 = vmatpush.xpose.msra.mxu3 %v431_v38  ;;  %v1029_v36 = vld [vmem:[%s6139_s15 + $0x1508] sm:$0xff]  ;;  %v2048_v38 = vpop.f32.mrf.mxu0 }
 0x16d   : > { %3087 = vmatmul.f32.vlgmr.msra.gmra.mxu0 %v1282_v17  ;;  %3127 = vmatmul.f32.vlgmr.msra.gmra.mxu2 %v1284_v18  ;;  %v329_v17 = vld [vmem:[%s6157_s17 + $0xb0] sm:$0xff]  ;;  %v1949_v18 = vadd.f32 %v1948_v8, %v1929_v6  ;;  %v838_v6 = vld [vmem:[%s6139_s15 + $0xf10] sm:$0xff] }
 0x16e   : > { %3163 = vmatpush.xpose.msrb.mxu0 %v1020_v34  ;;  %3203 = vmatpush.xpose.msrb.mxu2 %v1022_v35  ;;  %1300 = vst [vmem:[#allocation1] ss:$4 sm:$0xff] %v329_v17  ;;  %v439_v34 = vld [vmem:[%s6139_s15 + $0x298] sm:$0xff]  ;;  %v2028_v35 = vpop.f32.mrf.mxu3  ;;  %v2088_v53 = vpop.f32.mrf.mxu2  ;;  %v640_v17 = vld [vmem:[%s6139_s15 + $0x8e0] sm:$0xff] }
 0x16f   : > { %3183 = vmatpush.xpose.msrb.mxu1 %v1021_v40  ;;  %3223 = vmatpush.xpose.msrb.mxu3 %v1023_v41  ;;  %v834_v40 = vld [vmem:[%s6139_s15 + $0xef0] sm:$0xff] }
 0x170   : > { %3107 = vmatmul.f32.vlgmr.msra.gmra.mxu1 %v1283_v19  ;;  %3147 = vmatmul.f32.vlgmr.msra.gmra.mxu3 %v1285_v21  ;;  %v831_v19 = vld [vmem:[%s6139_s15 + $0xed8] sm:$0xff]  ;;  %v1969_v21 = vadd.f32 %v1968_v14, %v1949_v18 }
 0x171   : > { %v1296_v41 = vld.sshfl [vmem:[#allocation1 + $0x20] sm:$0xff pattern:$0x73625140] }
 0x172   : > { %3164 = vmatpush.xpose.msrb.mxu0 %v824_v42  ;;  %3204 = vmatpush.xpose.msrb.mxu2 %v826_v43  ;;  %v1989_v28 = vadd.f32 %v1988_v23, %v1969_v21  ;;  %v1298_v43 = vld.sshfl [vmem:[#allocation1 + $0x30] sm:$0xff pattern:$0x73625140]  ;;  %v331_v14 = vld [vmem:[%s6157_s17 + $0xc0] sm:$0xff] }
 0x173   : > { %3184 = vmatpush.xpose.msrb.mxu1 %v825_v49  ;;  %3224 = vmatpush.xpose.msrb.mxu3 %v827_v52  ;;  %v835_v49 = vld [vmem:[%s6139_s15 + $0xef8] sm:$0xff]  ;;  %v638_v52 = vld [vmem:[%s6139_s15 + $0x8d0] sm:$0xff] }
 0x174   : > { %v2009_v33 = vadd.f32 %v2008_v26, %v1989_v28  ;;  %v1036_v26 = vld [vmem:[%s6139_s15 + $0x1540] sm:$0xff]  ;;  %v1038_v28 = vld [vmem:[%s6139_s15 + $0x1550] sm:$0xff] }
 0x176   : > { %3165 = vmatpush.xpose.msrb.mxu0 %v628_v54  ;;  %3205 = vmatpush.xpose.msrb.mxu2 %v630_v56  ;;  %v2029_v42 = vadd.f32 %v2028_v35, %v2009_v33  ;;  %v637_v54 = vld [vmem:[%s6139_s15 + $0x8c8] sm:$0xff]  ;;  %v639_v56 = vld [vmem:[%s6139_s15 + $0x8d8] sm:$0xff] }
 0x177   : > { %3185 = vmatpush.xpose.msrb.mxu1 %v629_v57  ;;  %3225 = vmatpush.xpose.msrb.mxu3 %v631_v59  ;;  %v440_v57 = vld [vmem:[%s6139_s15 + $0x2a0] sm:$0xff]  ;;  %v442_v59 = vld [vmem:[%s6139_s15 + $0x2b0] sm:$0xff] }
 0x178   : > { %v2049_v48 = vadd.f32 %v2048_v38, %v2029_v42  ;;  %v841_v42 = vld [vmem:[%s6139_s15 + $0xf28] sm:$0xff] }
 0x17a   : > { %3166 = vmatpush.xpose.msrb.mxu0 %v432_v61  ;;  %3206 = vmatpush.xpose.msrb.mxu2 %v434_v62  ;;  %v2108_v61 = vpop.f32.mrf.mxu3  ;;  %v1034_v62 = vld [vmem:[%s6139_s15 + $0x1530] sm:$0xff] }
 0x17b   : > { %3186 = vmatpush.xpose.msrb.mxu1 %v433_v2  ;;  %3226 = vmatpush.xpose.msrb.mxu3 %v435_v4  ;;  %v1033_v2 = vld [vmem:[%s6139_s15 + $0x1528] sm:$0xff]  ;;  %v1035_v4 = vld [vmem:[%s6139_s15 + $0x1538] sm:$0xff] }
 0x17d   : > { %3167 = vmatmul.f32.vlgmr.msrb.gmra.mxu0 %v1286_v44  ;;  %3207 = vmatmul.f32.vlgmr.msrb.gmra.mxu2 %v1288_v46  ;;  %v1297_v44 = vld.sshfl [vmem:[#allocation1 + $0x28] sm:$0xff pattern:$0x73625140]  ;;  %v1299_v46 = vld.sshfl [vmem:[#allocation1 + $0x38] sm:$0xff pattern:$0x73625140] }
 0x17e   : > { %3243 = vmatpush.xpose.msra.mxu0 %v1024_v63  ;;  %3283 = vmatpush.xpose.msra.mxu2 %v1026_v1  ;;  %v441_v63 = vld [vmem:[%s6139_s15 + $0x2a8] sm:$0xff]  ;;  %v2128_v1 = vpop.f32.mrf.mxu0 }
 0x17f   : > { %3263 = vmatpush.xpose.msra.mxu1 %v1025_v5  ;;  %3303 = vmatpush.xpose.msra.mxu3 %v1027_v7  ;;  %v836_v5 = vld [vmem:[%s6139_s15 + $0xf00] sm:$0xff]  ;;  %v1302_v7 = vld.sshfl [vmem:[#allocation1] sm:$0xff pattern:$0x73625140] }
 0x180   : > { %3187 = vmatmul.f32.vlgmr.msrb.gmra.mxu1 %v1287_v47  ;;  %3227 = vmatmul.f32.vlgmr.msrb.gmra.mxu3 %v1289_v50  ;;  %v330_v47 = vld [vmem:[%s6157_s17 + $0xb8] sm:$0xff]  ;;  %v2068_v50 = vpop.f32.mrf.mxu1 }
 0x181   : > { %1301 = vst [vmem:[#allocation1 + $0x20] ss:$4 sm:$0xff] %v330_v47  ;;  %v2069_v55 = vadd.f32 %v2068_v50, %v2049_v48  ;;  %v644_v47 = vld [vmem:[%s6139_s15 + $0x900] sm:$0xff] }
 0x182   : > { %3244 = vmatpush.xpose.msra.mxu0 %v828_v9  ;;  %3284 = vmatpush.xpose.msra.mxu2 %v830_v10  ;;  %v1304_v9 = vld.sshfl [vmem:[#allocation1 + $0x10] sm:$0xff pattern:$0x73625140]  ;;  %v1303_v10 = vld.sshfl [vmem:[#allocation1 + $0x8] sm:$0xff pattern:$0x73625140]  ;;  %v2188_v23 = vpop.f32.mrf.mxu3 }
 0x183   : > { %3264 = vmatpush.xpose.msra.mxu1 %v829_v15  ;;  %3304 = vmatpush.xpose.msra.mxu3 %v831_v19  ;;  %v2089_v58 = vadd.f32 %v2088_v53, %v2069_v55  ;;  %v839_v15 = vld [vmem:[%s6139_s15 + $0xf18] sm:$0xff]  ;;  %v642_v19 = vld [vmem:[%s6139_s15 + $0x8f0] sm:$0xff] }
 0x185   : > { %v2109_v3 = vadd.f32 %v2108_v61, %v2089_v58  ;;  %v1042_v58 = vld [vmem:[%s6139_s15 + $0x1570] sm:$0xff]  ;;  %v451_v61 = vld [vmem:[%s6139_s15 + $0x2f8] sm:$0xff] }
 0x186   : > { %3245 = vmatpush.xpose.msra.mxu0 %v632_v20  ;;  %3285 = vmatpush.xpose.msra.mxu2 %v634_v22  ;;  %v641_v20 = vld [vmem:[%s6139_s15 + $0x8e8] sm:$0xff]  ;;  %v643_v22 = vld [vmem:[%s6139_s15 + $0x8f8] sm:$0xff] }
 0x187   : > { %3265 = vmatpush.xpose.msra.mxu1 %v633_v24  ;;  %3305 = vmatpush.xpose.msra.mxu3 %v635_v25  ;;  %v2129_v8 = vadd.f32 %v2128_v1, %v2109_v3  ;;  %v444_v24 = vld [vmem:[%s6139_s15 + $0x2c0] sm:$0xff]  ;;  %v446_v25 = vld [vmem:[%s6139_s15 + $0x2d0] sm:$0xff] }
 0x188   : > { %v1306_v38 = vld.sshfl [vmem:[#allocation1 + $0x20] sm:$0xff pattern:$0x73625140] }
 0x189   : > { %v846_v3 = vld [vmem:[%s6139_s15 + $0xf50] sm:$0xff] }
 0x18a   : > { %3246 = vmatpush.xpose.msra.mxu0 %v436_v27  ;;  %3286 = vmatpush.xpose.msra.mxu2 %v438_v29  ;;  %v2208_v27 = vpop.f32.mrf.mxu0  ;;  %v445_v29 = vld [vmem:[%s6139_s15 + $0x2c8] sm:$0xff]  ;;  %v2268_v50 = vpop.f32.mrf.mxu3 }
 0x18b   : > { %3266 = vmatpush.xpose.msra.mxu1 %v437_v32  ;;  %3306 = vmatpush.xpose.msra.mxu3 %v439_v34  ;;  %v1037_v32 = vld [vmem:[%s6139_s15 + $0x1548] sm:$0xff]  ;;  %v1039_v34 = vld [vmem:[%s6139_s15 + $0x1558] sm:$0xff] }
 0x18d   : > { %3247 = vmatmul.f32.vlgmr.msra.gmra.mxu0 %v1292_v11  ;;  %3287 = vmatmul.f32.vlgmr.msra.gmra.mxu2 %v1294_v12  ;;  %v2148_v11 = vpop.f32.mrf.mxu1  ;;  %v837_v12 = vld [vmem:[%s6139_s15 + $0xf08] sm:$0xff] }
 0x18e   : > { %3323 = vmatpush.xpose.msrb.mxu0 %v1028_v30  ;;  %3363 = vmatpush.xpose.msrb.mxu2 %v1030_v31  ;;  %v2149_v18 = vadd.f32 %v2148_v11, %v2129_v8  ;;  %v447_v31 = vld [vmem:[%s6139_s15 + $0x2d8] sm:$0xff]  ;;  %v845_v8 = vld [vmem:[%s6139_s15 + $0xf48] sm:$0xff] }
 0x18f   : > { %3343 = vmatpush.xpose.msrb.mxu1 %v1029_v36  ;;  %3383 = vmatpush.xpose.msrb.mxu3 %v1031_v37  ;;  %v840_v36 = vld [vmem:[%s6139_s15 + $0xf20] sm:$0xff]  ;;  %v842_v37 = vld [vmem:[%s6139_s15 + $0xf30] sm:$0xff] }
 0x190   : > { %3267 = vmatmul.f32.vlgmr.msra.gmra.mxu1 %v1293_v13  ;;  %3307 = vmatmul.f32.vlgmr.msra.gmra.mxu3 %v1295_v16  ;;  %v1305_v13 = vld.sshfl [vmem:[#allocation1 + $0x18] sm:$0xff pattern:$0x73625140]  ;;  %v2168_v16 = vpop.f32.mrf.mxu2 }
 0x191   : > { %1310 = vst [vmem:[#allocation1] ss:$4 sm:$0xff] %v331_v14  ;;  %v2169_v21 = vadd.f32 %v2168_v16, %v2149_v18  ;;  %v648_v14 = vld [vmem:[%s6139_s15 + $0x920] sm:$0xff] }
 0x192   : > { %3324 = vmatpush.xpose.msrb.mxu0 %v832_v39  ;;  %3364 = vmatpush.xpose.msrb.mxu2 %v834_v40  ;;  %v1308_v39 = vld.sshfl [vmem:[#allocation1 + $0x30] sm:$0xff pattern:$0x73625140]  ;;  %v1307_v40 = vld.sshfl [vmem:[#allocation1 + $0x28] sm:$0xff pattern:$0x73625140]  ;;  %v2288_v53 = vpop.f32.mrf.mxu0 }
 0x193   : > { %3344 = vmatpush.xpose.msrb.mxu1 %v833_v45  ;;  %3384 = vmatpush.xpose.msrb.mxu3 %v835_v49  ;;  %v2189_v30 = vadd.f32 %v2188_v23, %v2169_v21  ;;  %v646_v49 = vld [vmem:[%s6139_s15 + $0x910] sm:$0xff]  ;;  %v1044_v23 = vld [vmem:[%s6139_s15 + $0x1580] sm:$0xff] }
 0x195   : > { %v2209_v33 = vadd.f32 %v2208_v27, %v2189_v30  ;;  %v2228_v35 = vpop.f32.mrf.mxu1  ;;  %v455_v27 = vld [vmem:[%s6139_s15 + $0x318] sm:$0xff] }
 0x196   : > { %3325 = vmatpush.xpose.msrb.mxu0 %v636_v51  ;;  %3365 = vmatpush.xpose.msrb.mxu2 %v638_v52  ;;  %v645_v51 = vld [vmem:[%s6139_s15 + $0x908] sm:$0xff]  ;;  %v647_v52 = vld [vmem:[%s6139_s15 + $0x918] sm:$0xff] }
 0x197   : > { %3345 = vmatpush.xpose.msrb.mxu1 %v637_v54  ;;  %3385 = vmatpush.xpose.msrb.mxu3 %v639_v56  ;;  %v2229_v45 = vadd.f32 %v2228_v35, %v2209_v33  ;;  %v448_v54 = vld [vmem:[%s6139_s15 + $0x2e0] sm:$0xff]  ;;  %v450_v56 = vld [vmem:[%s6139_s15 + $0x2f0] sm:$0xff] }
 0x198   : > { %v850_v33 = vld [vmem:[%s6139_s15 + $0xf70] sm:$0xff] }
 0x19a   : > { %3326 = vmatpush.xpose.msrb.mxu0 %v440_v57  ;;  %3366 = vmatpush.xpose.msrb.mxu2 %v442_v59  ;;  %v1040_v57 = vld [vmem:[%s6139_s15 + $0x1560] sm:$0xff]  ;;  %v449_v59 = vld [vmem:[%s6139_s15 + $0x2e8] sm:$0xff]  ;;  %v2368_v16 = vpop.f32.mrf.mxu0 }
 0x19b   : > { %3346 = vmatpush.xpose.msrb.mxu1 %v441_v63  ;;  %3386 = vmatpush.xpose.msrb.mxu3 %v443_v0  ;;  %v1041_v63 = vld [vmem:[%s6139_s15 + $0x1568] sm:$0xff]  ;;  %v1043_v0 = vld [vmem:[%s6139_s15 + $0x1578] sm:$0xff] }
 0x19d   : > { %3327 = vmatmul.f32.vlgmr.msrb.gmra.mxu0 %v1296_v41  ;;  %3367 = vmatmul.f32.vlgmr.msrb.gmra.mxu2 %v1298_v43  ;;  %v2248_v41 = vpop.f32.mrf.mxu2  ;;  %v1309_v43 = vld.sshfl [vmem:[#allocation1 + $0x38] sm:$0xff pattern:$0x73625140] }
 0x19e   : > { %3403 = vmatpush.xpose.msra.mxu0 %v1032_v60  ;;  %3443 = vmatpush.xpose.msra.mxu2 %v1034_v62  ;;  %v2249_v48 = vadd.f32 %v2248_v41, %v2229_v45  ;;  %v2308_v62 = vpop.f32.mrf.mxu1  ;;  %v334_v41 = vld [vmem:[%s6157_s17 + $0xd8] sm:$0xff] }
 0x19f   : > { %3423 = vmatpush.xpose.msra.mxu1 %v1033_v2  ;;  %3463 = vmatpush.xpose.msra.mxu3 %v1035_v4  ;;  %v844_v2 = vld [vmem:[%s6139_s15 + $0xf40] sm:$0xff]  ;;  %v1312_v4 = vld.sshfl [vmem:[#allocation1] sm:$0xff pattern:$0x73625140] }
 0x1a0   : > { %3347 = vmatmul.f32.vlgmr.msrb.gmra.mxu1 %v1297_v44  ;;  %3387 = vmatmul.f32.vlgmr.msrb.gmra.mxu3 %v1299_v46  ;;  %v332_v44 = vld [vmem:[%s6157_s17 + $0xc8] sm:$0xff]  ;;  %v2269_v55 = vadd.f32 %v2268_v50, %v2249_v48 }
 0x1a1   : > { %v843_v46 = vld [vmem:[%s6139_s15 + $0xf38] sm:$0xff]  ;;  %1311 = vst [vmem:[#allocation1 + $0x20] ss:$4 sm:$0xff] %v332_v44  ;;  %v652_v44 = vld [vmem:[%s6139_s15 + $0x940] sm:$0xff] }
 0x1a2   : > { %3404 = vmatpush.xpose.msra.mxu0 %v836_v5  ;;  %3444 = vmatpush.xpose.msra.mxu2 %v838_v6  ;;  %v2289_v60 = vadd.f32 %v2288_v53, %v2269_v55  ;;  %v1314_v6 = vld.sshfl [vmem:[#allocation1 + $0x10] sm:$0xff pattern:$0x73625140]  ;;  %v1050_v55 = vld [vmem:[%s6139_s15 + $0x15b0] sm:$0xff] }
 0x1a3   : > { %3424 = vmatpush.xpose.msra.mxu1 %v837_v12  ;;  %3464 = vmatpush.xpose.msra.mxu3 %v839_v15  ;;  %v847_v12 = vld [vmem:[%s6139_s15 + $0xf58] sm:$0xff]  ;;  %v650_v15 = vld [vmem:[%s6139_s15 + $0x930] sm:$0xff]  ;;  %v1048_v53 = vld [vmem:[%s6139_s15 + $0x15a0] sm:$0xff] }
 0x1a4   : > { %v2309_v5 = vadd.f32 %v2308_v62, %v2289_v60 }
 0x1a5   : > { %v2328_v1 = vpop.f32.mrf.mxu2 }
 0x1a6   : > { %3405 = vmatpush.xpose.msra.mxu0 %v640_v17  ;;  %3445 = vmatpush.xpose.msra.mxu2 %v642_v19  ;;  %v2329_v11 = vadd.f32 %v2328_v1, %v2309_v5  ;;  %v649_v17 = vld [vmem:[%s6139_s15 + $0x928] sm:$0xff]  ;;  %v651_v19 = vld [vmem:[%s6139_s15 + $0x938] sm:$0xff] }
 0x1a7   : > { %3425 = vmatpush.xpose.msra.mxu1 %v641_v20  ;;  %3465 = vmatpush.xpose.msra.mxu3 %v643_v22  ;;  %v452_v20 = vld [vmem:[%s6139_s15 + $0x300] sm:$0xff]  ;;  %v454_v22 = vld [vmem:[%s6139_s15 + $0x310] sm:$0xff]  ;;  %v853_v5 = vld [vmem:[%s6139_s15 + $0xf88] sm:$0xff] }
 0x1aa   : > { %3406 = vmatpush.xpose.msra.mxu0 %v444_v24  ;;  %3446 = vmatpush.xpose.msra.mxu2 %v446_v25  ;;  %v2388_v24 = vpop.f32.mrf.mxu1  ;;  %v1046_v25 = vld [vmem:[%s6139_s15 + $0x1590] sm:$0xff] }
 0x1ab   : > { %3426 = vmatpush.xpose.msra.mxu1 %v445_v29  ;;  %3466 = vmatpush.xpose.msra.mxu3 %v447_v31  ;;  %v1045_v29 = vld [vmem:[%s6139_s15 + $0x1588] sm:$0xff]  ;;  %v1047_v31 = vld [vmem:[%s6139_s15 + $0x1598] sm:$0xff] }
 0x1ad   : > { %3407 = vmatmul.f32.vlgmr.msra.gmra.mxu0 %v1302_v7  ;;  %3447 = vmatmul.f32.vlgmr.msra.gmra.mxu2 %v1304_v9  ;;  %v1313_v7 = vld.sshfl [vmem:[#allocation1 + $0x8] sm:$0xff pattern:$0x73625140]  ;;  %v1315_v9 = vld.sshfl [vmem:[#allocation1 + $0x18] sm:$0xff pattern:$0x73625140] }
 0x1ae   : > { %3483 = vmatpush.xpose.msrb.mxu0 %v1036_v26  ;;  %3523 = vmatpush.xpose.msrb.mxu2 %v1038_v28  ;;  %v453_v26 = vld [vmem:[%s6139_s15 + $0x308] sm:$0xff]  ;;  %v2408_v28 = vpop.f32.mrf.mxu2 }
 0x1af   : > { %3503 = vmatpush.xpose.msrb.mxu1 %v1037_v32  ;;  %3543 = vmatpush.xpose.msrb.mxu3 %v1039_v34  ;;  %v848_v32 = vld [vmem:[%s6139_s15 + $0xf60] sm:$0xff]  ;;  %v1316_v34 = vld.sshfl [vmem:[#allocation1 + $0x20] sm:$0xff pattern:$0x73625140] }
 0x1b0   : > { %3427 = vmatmul.f32.vlgmr.msra.gmra.mxu1 %v1303_v10  ;;  %3467 = vmatmul.f32.vlgmr.msra.gmra.mxu3 %v1305_v13  ;;  %v333_v10 = vld [vmem:[%s6157_s17 + $0xd0] sm:$0xff]  ;;  %v2348_v13 = vpop.f32.mrf.mxu3 }
 0x1b1   : > { %1320 = vst [vmem:[#allocation1] ss:$4 sm:$0xff] %v333_v10  ;;  %v2349_v18 = vadd.f32 %v2348_v13, %v2329_v11  ;;  %v656_v10 = vld [vmem:[%s6139_s15 + $0x960] sm:$0xff] }
 0x1b2   : > { %3484 = vmatpush.xpose.msrb.mxu0 %v840_v36  ;;  %3524 = vmatpush.xpose.msrb.mxu2 %v842_v37  ;;  %v1318_v36 = vld.sshfl [vmem:[#allocation1 + $0x30] sm:$0xff pattern:$0x73625140]  ;;  %v1317_v37 = vld.sshfl [vmem:[#allocation1 + $0x28] sm:$0xff pattern:$0x73625140]  ;;  %v2468_v50 = vpop.f32.mrf.mxu1 }
 0x1b3   : > { %3504 = vmatpush.xpose.msrb.mxu1 %v841_v42  ;;  %3544 = vmatpush.xpose.msrb.mxu3 %v843_v46  ;;  %v2369_v21 = vadd.f32 %v2368_v16, %v2349_v18  ;;  %v851_v42 = vld [vmem:[%s6139_s15 + $0xf78] sm:$0xff]  ;;  %v654_v46 = vld [vmem:[%s6139_s15 + $0x950] sm:$0xff] }
 0x1b5   : > { %v2389_v30 = vadd.f32 %v2388_v24, %v2369_v21  ;;  %v1054_v21 = vld [vmem:[%s6139_s15 + $0x15d0] sm:$0xff]  ;;  %v463_v24 = vld [vmem:[%s6139_s15 + $0x358] sm:$0xff] }
 0x1b6   : > { %3485 = vmatpush.xpose.msrb.mxu0 %v644_v47  ;;  %3525 = vmatpush.xpose.msrb.mxu2 %v646_v49  ;;  %v653_v47 = vld [vmem:[%s6139_s15 + $0x948] sm:$0xff]  ;;  %v655_v49 = vld [vmem:[%s6139_s15 + $0x958] sm:$0xff] }
 0x1b7   : > { %3505 = vmatpush.xpose.msrb.mxu1 %v645_v51  ;;  %3545 = vmatpush.xpose.msrb.mxu3 %v647_v52  ;;  %v2409_v35 = vadd.f32 %v2408_v28, %v2389_v30  ;;  %v456_v51 = vld [vmem:[%s6139_s15 + $0x320] sm:$0xff]  ;;  %v458_v52 = vld [vmem:[%s6139_s15 + $0x330] sm:$0xff] }
 0x1b8   : > { %v1322_v1 = vld.sshfl [vmem:[#allocation1] sm:$0xff pattern:$0x73625140] }
 0x1b9   : > { %v858_v30 = vld [vmem:[%s6139_s15 + $0xfb0] sm:$0xff] }
 0x1ba   : > { %3486 = vmatpush.xpose.msrb.mxu0 %v448_v54  ;;  %3526 = vmatpush.xpose.msrb.mxu2 %v450_v56  ;;  %v2488_v54 = vpop.f32.mrf.mxu2  ;;  %v457_v56 = vld [vmem:[%s6139_s15 + $0x328] sm:$0xff]  ;;  %v2548_v13 = vpop.f32.mrf.mxu1 }
 0x1bb   : > { %3506 = vmatpush.xpose.msrb.mxu1 %v449_v59  ;;  %3546 = vmatpush.xpose.msrb.mxu3 %v451_v61  ;;  %v1049_v59 = vld [vmem:[%s6139_s15 + $0x15a8] sm:$0xff]  ;;  %v1051_v61 = vld [vmem:[%s6139_s15 + $0x15b8] sm:$0xff] }
 0x1bd   : > { %3487 = vmatmul.f32.vlgmr.msrb.gmra.mxu0 %v1306_v38  ;;  %3527 = vmatmul.f32.vlgmr.msrb.gmra.mxu2 %v1308_v39  ;;  %v2428_v38 = vpop.f32.mrf.mxu3  ;;  %v849_v39 = vld [vmem:[%s6139_s15 + $0xf68] sm:$0xff] }
 0x1be   : > { %3563 = vmatpush.xpose.msra.mxu0 %v1040_v57  ;;  %3603 = vmatpush.xpose.msra.mxu2 %v1042_v58  ;;  %v2429_v45 = vadd.f32 %v2428_v38, %v2409_v35  ;;  %v459_v58 = vld [vmem:[%s6139_s15 + $0x338] sm:$0xff]  ;;  %v857_v35 = vld [vmem:[%s6139_s15 + $0xfa8] sm:$0xff] }
 0x1bf   : > { %3583 = vmatpush.xpose.msra.mxu1 %v1041_v63  ;;  %3623 = vmatpush.xpose.msra.mxu3 %v1043_v0  ;;  %v852_v63 = vld [vmem:[%s6139_s15 + $0xf80] sm:$0xff]  ;;  %v854_v0 = vld [vmem:[%s6139_s15 + $0xf90] sm:$0xff] }
 0x1c0   : > { %3507 = vmatmul.f32.vlgmr.msrb.gmra.mxu1 %v1307_v40  ;;  %3547 = vmatmul.f32.vlgmr.msrb.gmra.mxu3 %v1309_v43  ;;  %v1319_v40 = vld.sshfl [vmem:[#allocation1 + $0x38] sm:$0xff pattern:$0x73625140]  ;;  %v2448_v43 = vpop.f32.mrf.mxu0 }
 0x1c1   : > { %1321 = vst [vmem:[#allocation1 + $0x20] ss:$4 sm:$0xff] %v334_v41  ;;  %v2449_v48 = vadd.f32 %v2448_v43, %v2429_v45  ;;  %v660_v41 = vld [vmem:[%s6139_s15 + $0x980] sm:$0xff] }
 0x1c2   : > { %3564 = vmatpush.xpose.msra.mxu0 %v844_v2  ;;  %3604 = vmatpush.xpose.msra.mxu2 %v846_v3  ;;  %v1324_v2 = vld.sshfl [vmem:[#allocation1 + $0x10] sm:$0xff pattern:$0x73625140]  ;;  %v1323_v3 = vld.sshfl [vmem:[#allocation1 + $0x8] sm:$0xff pattern:$0x73625140]  ;;  %v2568_v16 = vpop.f32.mrf.mxu2 }
 0x1c3   : > { %3584 = vmatpush.xpose.msra.mxu1 %v845_v8  ;;  %3624 = vmatpush.xpose.msra.mxu3 %v847_v12  ;;  %v2469_v57 = vadd.f32 %v2468_v50, %v2449_v48  ;;  %v658_v12 = vld [vmem:[%s6139_s15 + $0x970] sm:$0xff]  ;;  %v1056_v50 = vld [vmem:[%s6139_s15 + $0x15e0] sm:$0xff] }
 0x1c5   : > { %v2489_v60 = vadd.f32 %v2488_v54, %v2469_v57  ;;  %v2508_v62 = vpop.f32.mrf.mxu3  ;;  %v467_v54 = vld [vmem:[%s6139_s15 + $0x378] sm:$0xff] }
 0x1c6   : > { %3565 = vmatpush.xpose.msra.mxu0 %v648_v14  ;;  %3605 = vmatpush.xpose.msra.mxu2 %v650_v15  ;;  %v657_v14 = vld [vmem:[%s6139_s15 + $0x968] sm:$0xff]  ;;  %v659_v15 = vld [vmem:[%s6139_s15 + $0x978] sm:$0xff] }
 0x1c7   : > { %3585 = vmatpush.xpose.msra.mxu1 %v649_v17  ;;  %3625 = vmatpush.xpose.msra.mxu3 %v651_v19  ;;  %v2509_v8 = vadd.f32 %v2508_v62, %v2489_v60  ;;  %v460_v17 = vld [vmem:[%s6139_s15 + $0x340] sm:$0xff]  ;;  %v462_v19 = vld [vmem:[%s6139_s15 + $0x350] sm:$0xff] }
 0x1c8   : > { %v862_v60 = vld [vmem:[%s6139_s15 + $0xfd0] sm:$0xff] }
 0x1ca   : > { %3566 = vmatpush.xpose.msra.mxu0 %v452_v20  ;;  %3606 = vmatpush.xpose.msra.mxu2 %v454_v22  ;;  %v1052_v20 = vld [vmem:[%s6139_s15 + $0x15c0] sm:$0xff]  ;;  %v461_v22 = vld [vmem:[%s6139_s15 + $0x348] sm:$0xff]  ;;  %v2648_v43 = vpop.f32.mrf.mxu2 }
 0x1cb   : > { %3586 = vmatpush.xpose.msra.mxu1 %v453_v26  ;;  %3626 = vmatpush.xpose.msra.mxu3 %v455_v27  ;;  %v1053_v26 = vld [vmem:[%s6139_s15 + $0x15c8] sm:$0xff]  ;;  %v1055_v27 = vld [vmem:[%s6139_s15 + $0x15d8] sm:$0xff] }
 0x1cd   : > { %3567 = vmatmul.f32.vlgmr.msra.gmra.mxu0 %v1312_v4  ;;  %3607 = vmatmul.f32.vlgmr.msra.gmra.mxu2 %v1314_v6  ;;  %v2528_v4 = vpop.f32.mrf.mxu0  ;;  %v1325_v6 = vld.sshfl [vmem:[#allocation1 + $0x18] sm:$0xff pattern:$0x73625140] }
 0x1ce   : > { %3643 = vmatpush.xpose.msrb.mxu0 %v1044_v23  ;;  %3683 = vmatpush.xpose.msrb.mxu2 %v1046_v25  ;;  %v2529_v11 = vadd.f32 %v2528_v4, %v2509_v8  ;;  %v2588_v25 = vpop.f32.mrf.mxu3  ;;  %v337_v4 = vld [vmem:[%s6157_s17 + $0xf0] sm:$0xff] }
 0x1cf   : > { %3663 = vmatpush.xpose.msrb.mxu1 %v1045_v29  ;;  %3703 = vmatpush.xpose.msrb.mxu3 %v1047_v31  ;;  %v856_v29 = vld [vmem:[%s6139_s15 + $0xfa0] sm:$0xff]  ;;  %v1326_v31 = vld.sshfl [vmem:[#allocation1 + $0x20] sm:$0xff pattern:$0x73625140] }
 0x1d0   : > { %3587 = vmatmul.f32.vlgmr.msra.gmra.mxu1 %v1313_v7  ;;  %3627 = vmatmul.f32.vlgmr.msra.gmra.mxu3 %v1315_v9  ;;  %v335_v7 = vld [vmem:[%s6157_s17 + $0xe0] sm:$0xff]  ;;  %v2549_v18 = vadd.f32 %v2548_v13, %v2529_v11 }
 0x1d1   : > { %v855_v9 = vld [vmem:[%s6139_s15 + $0xf98] sm:$0xff]  ;;  %1330 = vst [vmem:[#allocation1] ss:$4 sm:$0xff] %v335_v7  ;;  %v664_v7 = vld [vmem:[%s6139_s15 + $0x9a0] sm:$0xff] }
 0x1d2   : > { %3644 = vmatpush.xpose.msrb.mxu0 %v848_v32  ;;  %3684 = vmatpush.xpose.msrb.mxu2 %v850_v33  ;;  %v2569_v23 = vadd.f32 %v2568_v16, %v2549_v18  ;;  %v1328_v33 = vld.sshfl [vmem:[#allocation1 + $0x30] sm:$0xff pattern:$0x73625140]  ;;  %v1062_v18 = vld [vmem:[%s6139_s15 + $0x1610] sm:$0xff] }
 0x1d3   : > { %3664 = vmatpush.xpose.msrb.mxu1 %v849_v39  ;;  %3704 = vmatpush.xpose.msrb.mxu3 %v851_v42  ;;  %v859_v39 = vld [vmem:[%s6139_s15 + $0xfb8] sm:$0xff]  ;;  %v662_v42 = vld [vmem:[%s6139_s15 + $0x990] sm:$0xff]  ;;  %v1060_v16 = vld [vmem:[%s6139_s15 + $0x1600] sm:$0xff] }
 0x1d4   : > { %v2589_v32 = vadd.f32 %v2588_v25, %v2569_v23 }
 0x1d5   : > { %v2608_v28 = vpop.f32.mrf.mxu0 }
 0x1d6   : > { %3645 = vmatpush.xpose.msrb.mxu0 %v652_v44  ;;  %3685 = vmatpush.xpose.msrb.mxu2 %v654_v46  ;;  %v2609_v38 = vadd.f32 %v2608_v28, %v2589_v32  ;;  %v661_v44 = vld [vmem:[%s6139_s15 + $0x988] sm:$0xff]  ;;  %v663_v46 = vld [vmem:[%s6139_s15 + $0x998] sm:$0xff] }
 0x1d7   : > { %3665 = vmatpush.xpose.msrb.mxu1 %v653_v47  ;;  %3705 = vmatpush.xpose.msrb.mxu3 %v655_v49  ;;  %v464_v47 = vld [vmem:[%s6139_s15 + $0x360] sm:$0xff]  ;;  %v466_v49 = vld [vmem:[%s6139_s15 + $0x370] sm:$0xff]  ;;  %v865_v32 = vld [vmem:[%s6139_s15 + $0xfe8] sm:$0xff] }
 0x1da   : > { %3646 = vmatpush.xpose.msrb.mxu0 %v456_v51  ;;  %3686 = vmatpush.xpose.msrb.mxu2 %v458_v52  ;;  %v2668_v51 = vpop.f32.mrf.mxu3  ;;  %v1058_v52 = vld [vmem:[%s6139_s15 + $0x15f0] sm:$0xff] }
 0x1db   : > { %3666 = vmatpush.xpose.msrb.mxu1 %v457_v56  ;;  %3706 = vmatpush.xpose.msrb.mxu3 %v459_v58  ;;  %v1057_v56 = vld [vmem:[%s6139_s15 + $0x15e8] sm:$0xff]  ;;  %v1059_v58 = vld [vmem:[%s6139_s15 + $0x15f8] sm:$0xff] }
 0x1dd   : > { %3647 = vmatmul.f32.vlgmr.msrb.gmra.mxu0 %v1316_v34  ;;  %3687 = vmatmul.f32.vlgmr.msrb.gmra.mxu2 %v1318_v36  ;;  %v1327_v34 = vld.sshfl [vmem:[#allocation1 + $0x28] sm:$0xff pattern:$0x73625140]  ;;  %v1329_v36 = vld.sshfl [vmem:[#allocation1 + $0x38] sm:$0xff pattern:$0x73625140] }
 0x1de   : > { %3723 = vmatpush.xpose.msra.mxu0 %v1048_v53  ;;  %3763 = vmatpush.xpose.msra.mxu2 %v1050_v55  ;;  %v465_v53 = vld [vmem:[%s6139_s15 + $0x368] sm:$0xff]  ;;  %v2688_v55 = vpop.f32.mrf.mxu0 }
 0x1df   : > { %3743 = vmatpush.xpose.msra.mxu1 %v1049_v59  ;;  %3783 = vmatpush.xpose.msra.mxu3 %v1051_v61  ;;  %v860_v59 = vld [vmem:[%s6139_s15 + $0xfc0] sm:$0xff]  ;;  %v1332_v61 = vld.sshfl [vmem:[#allocation1] sm:$0xff pattern:$0x73625140] }
 0x1e0   : > { %3667 = vmatmul.f32.vlgmr.msrb.gmra.mxu1 %v1317_v37  ;;  %3707 = vmatmul.f32.vlgmr.msrb.gmra.mxu3 %v1319_v40  ;;  %v336_v37 = vld [vmem:[%s6157_s17 + $0xe8] sm:$0xff]  ;;  %v2628_v40 = vpop.f32.mrf.mxu1 }
 0x1e1   : > { %1331 = vst [vmem:[#allocation1 + $0x20] ss:$4 sm:$0xff] %v336_v37  ;;  %v2629_v45 = vadd.f32 %v2628_v40, %v2609_v38  ;;  %v668_v37 = vld [vmem:[%s6139_s15 + $0x9c0] sm:$0xff] }
 0x1e2   : > { %3724 = vmatpush.xpose.msra.mxu0 %v852_v63  ;;  %3764 = vmatpush.xpose.msra.mxu2 %v854_v0  ;;  %v1334_v63 = vld.sshfl [vmem:[#allocation1 + $0x10] sm:$0xff pattern:$0x73625140]  ;;  %v1333_v0 = vld.sshfl [vmem:[#allocation1 + $0x8] sm:$0xff pattern:$0x73625140]  ;;  %v2748_v13 = vpop.f32.mrf.mxu3 }
 0x1e3   : > { %3744 = vmatpush.xpose.msra.mxu1 %v853_v5  ;;  %3784 = vmatpush.xpose.msra.mxu3 %v855_v9  ;;  %v2649_v48 = vadd.f32 %v2648_v43, %v2629_v45  ;;  %v863_v5 = vld [vmem:[%s6139_s15 + $0xfd8] sm:$0xff]  ;;  %v666_v9 = vld [vmem:[%s6139_s15 + $0x9b0] sm:$0xff] }
 0x1e5   : > { %v2669_v57 = vadd.f32 %v2668_v51, %v2649_v48  ;;  %v1066_v48 = vld [vmem:[%s6139_s15 + $0x1630] sm:$0xff]  ;;  %v475_v51 = vld [vmem:[%s6139_s15 + $0x3b8] sm:$0xff] }
 0x1e6   : > { %3725 = vmatpush.xpose.msra.mxu0 %v656_v10  ;;  %3765 = vmatpush.xpose.msra.mxu2 %v658_v12  ;;  %v665_v10 = vld [vmem:[%s6139_s15 + $0x9a8] sm:$0xff]  ;;  %v667_v12 = vld [vmem:[%s6139_s15 + $0x9b8] sm:$0xff] }
 0x1e7   : > { %3745 = vmatpush.xpose.msra.mxu1 %v657_v14  ;;  %3785 = vmatpush.xpose.msra.mxu3 %v659_v15  ;;  %v2689_v62 = vadd.f32 %v2688_v55, %v2669_v57  ;;  %v468_v14 = vld [vmem:[%s6139_s15 + $0x380] sm:$0xff]  ;;  %v470_v15 = vld [vmem:[%s6139_s15 + $0x390] sm:$0xff] }
 0x1e8   : > { %v1336_v28 = vld.sshfl [vmem:[#allocation1 + $0x20] sm:$0xff pattern:$0x73625140] }
 0x1e9   : > { %v870_v57 = vld [vmem:[%s6139_s15 + $0x1010] sm:$0xff] }
 0x1ea   : > { %3726 = vmatpush.xpose.msra.mxu0 %v460_v17  ;;  %3766 = vmatpush.xpose.msra.mxu2 %v462_v19  ;;  %v2768_v17 = vpop.f32.mrf.mxu0  ;;  %v469_v19 = vld [vmem:[%s6139_s15 + $0x388] sm:$0xff]  ;;  %v2828_v40 = vpop.f32.mrf.mxu3 }
 0x1eb   : > { %3746 = vmatpush.xpose.msra.mxu1 %v461_v22  ;;  %3786 = vmatpush.xpose.msra.mxu3 %v463_v24  ;;  %v1061_v22 = vld [vmem:[%s6139_s15 + $0x1608] sm:$0xff]  ;;  %v1063_v24 = vld [vmem:[%s6139_s15 + $0x1618] sm:$0xff] }
 0x1ed   : > { %3727 = vmatmul.f32.vlgmr.msra.gmra.mxu0 %v1322_v1  ;;  %3767 = vmatmul.f32.vlgmr.msra.gmra.mxu2 %v1324_v2  ;;  %v2708_v1 = vpop.f32.mrf.mxu1  ;;  %v861_v2 = vld [vmem:[%s6139_s15 + $0xfc8] sm:$0xff] }
 0x1ee   : > { %3803 = vmatpush.xpose.msrb.mxu0 %v1052_v20  ;;  %3843 = vmatpush.xpose.msrb.mxu2 %v1054_v21  ;;  %v2709_v8 = vadd.f32 %v2708_v1, %v2689_v62  ;;  %v471_v21 = vld [vmem:[%s6139_s15 + $0x398] sm:$0xff]  ;;  %v869_v62 = vld [vmem:[%s6139_s15 + $0x1008] sm:$0xff] }
 0x1ef   : > { %3823 = vmatpush.xpose.msrb.mxu1 %v1053_v26  ;;  %3863 = vmatpush.xpose.msrb.mxu3 %v1055_v27  ;;  %v864_v26 = vld [vmem:[%s6139_s15 + $0xfe0] sm:$0xff]  ;;  %v866_v27 = vld [vmem:[%s6139_s15 + $0xff0] sm:$0xff] }
 0x1f0   : > { %3747 = vmatmul.f32.vlgmr.msra.gmra.mxu1 %v1323_v3  ;;  %3787 = vmatmul.f32.vlgmr.msra.gmra.mxu3 %v1325_v6  ;;  %v1335_v3 = vld.sshfl [vmem:[#allocation1 + $0x18] sm:$0xff pattern:$0x73625140]  ;;  %v2728_v6 = vpop.f32.mrf.mxu2 }
 0x1f1   : > { %1340 = vst [vmem:[#allocation1] ss:$4 sm:$0xff] %v337_v4  ;;  %v2729_v11 = vadd.f32 %v2728_v6, %v2709_v8  ;;  %v672_v4 = vld [vmem:[%s6139_s15 + $0x9e0] sm:$0xff] }
 0x1f2   : > { %3804 = vmatpush.xpose.msrb.mxu0 %v856_v29  ;;  %3844 = vmatpush.xpose.msrb.mxu2 %v858_v30  ;;  %v1338_v29 = vld.sshfl [vmem:[#allocation1 + $0x30] sm:$0xff pattern:$0x73625140]  ;;  %v1337_v30 = vld.sshfl [vmem:[#allocation1 + $0x28] sm:$0xff pattern:$0x73625140]  ;;  %v2848_v43 = vpop.f32.mrf.mxu0 }
 0x1f3   : > { %3824 = vmatpush.xpose.msrb.mxu1 %v857_v35  ;;  %3864 = vmatpush.xpose.msrb.mxu3 %v859_v39  ;;  %v2749_v20 = vadd.f32 %v2748_v13, %v2729_v11  ;;  %v670_v39 = vld [vmem:[%s6139_s15 + $0x9d0] sm:$0xff]  ;;  %v1068_v13 = vld [vmem:[%s6139_s15 + $0x1640] sm:$0xff] }
 0x1f5   : > { %v2769_v23 = vadd.f32 %v2768_v17, %v2749_v20  ;;  %v2788_v25 = vpop.f32.mrf.mxu1  ;;  %v479_v17 = vld [vmem:[%s6139_s15 + $0x3d8] sm:$0xff] }
 0x1f6   : > { %3805 = vmatpush.xpose.msrb.mxu0 %v660_v41  ;;  %3845 = vmatpush.xpose.msrb.mxu2 %v662_v42  ;;  %v669_v41 = vld [vmem:[%s6139_s15 + $0x9c8] sm:$0xff]  ;;  %v671_v42 = vld [vmem:[%s6139_s15 + $0x9d8] sm:$0xff] }
 0x1f7   : > { %3825 = vmatpush.xpose.msrb.mxu1 %v661_v44  ;;  %3865 = vmatpush.xpose.msrb.mxu3 %v663_v46  ;;  %v2789_v35 = vadd.f32 %v2788_v25, %v2769_v23  ;;  %v472_v44 = vld [vmem:[%s6139_s15 + $0x3a0] sm:$0xff]  ;;  %v474_v46 = vld [vmem:[%s6139_s15 + $0x3b0] sm:$0xff] }
 0x1f8   : > { %v874_v23 = vld [vmem:[%s6139_s15 + $0x1030] sm:$0xff] }
 0x1fa   : > { %3806 = vmatpush.xpose.msrb.mxu0 %v464_v47  ;;  %3846 = vmatpush.xpose.msrb.mxu2 %v466_v49  ;;  %v1064_v47 = vld [vmem:[%s6139_s15 + $0x1620] sm:$0xff]  ;;  %v473_v49 = vld [vmem:[%s6139_s15 + $0x3a8] sm:$0xff]  ;;  %v2928_v6 = vpop.f32.mrf.mxu0 }
 0x1fb   : > { %3826 = vmatpush.xpose.msrb.mxu1 %v465_v53  ;;  %3866 = vmatpush.xpose.msrb.mxu3 %v467_v54  ;;  %v1065_v53 = vld [vmem:[%s6139_s15 + $0x1628] sm:$0xff]  ;;  %v1067_v54 = vld [vmem:[%s6139_s15 + $0x1638] sm:$0xff] }
 0x1fd   : > { %3807 = vmatmul.f32.vlgmr.msrb.gmra.mxu0 %v1326_v31  ;;  %3847 = vmatmul.f32.vlgmr.msrb.gmra.mxu2 %v1328_v33  ;;  %v2808_v31 = vpop.f32.mrf.mxu2  ;;  %v1339_v33 = vld.sshfl [vmem:[#allocation1 + $0x38] sm:$0xff pattern:$0x73625140] }
 0x1fe   : > { %3883 = vmatpush.xpose.msra.mxu0 %v1056_v50  ;;  %3923 = vmatpush.xpose.msra.mxu2 %v1058_v52  ;;  %v2809_v38 = vadd.f32 %v2808_v31, %v2789_v35  ;;  %v2868_v52 = vpop.f32.mrf.mxu1  ;;  %v340_v31 = vld [vmem:[%s6157_s17 + $0x108] sm:$0xff] }
 0x1ff   : > { %3903 = vmatpush.xpose.msra.mxu1 %v1057_v56  ;;  %3943 = vmatpush.xpose.msra.mxu3 %v1059_v58  ;;  %v868_v56 = vld [vmem:[%s6139_s15 + $0x1000] sm:$0xff]  ;;  %v1342_v58 = vld.sshfl [vmem:[#allocation1] sm:$0xff pattern:$0x73625140] }
 0x200   : > { %3827 = vmatmul.f32.vlgmr.msrb.gmra.mxu1 %v1327_v34  ;;  %3867 = vmatmul.f32.vlgmr.msrb.gmra.mxu3 %v1329_v36  ;;  %v338_v34 = vld [vmem:[%s6157_s17 + $0xf8] sm:$0xff]  ;;  %v867_v36 = vld [vmem:[%s6139_s15 + $0xff8] sm:$0xff]  ;;  %v2829_v45 = vadd.f32 %v2828_v40, %v2809_v38 }
 0x201   : > { %1341 = vst [vmem:[#allocation1 + $0x20] ss:$4 sm:$0xff] %v338_v34  ;;  %v676_v34 = vld [vmem:[%s6139_s15 + $0xa00] sm:$0xff] }
 0x202   : > { %3884 = vmatpush.xpose.msra.mxu0 %v860_v59  ;;  %3924 = vmatpush.xpose.msra.mxu2 %v862_v60  ;;  %v2849_v50 = vadd.f32 %v2848_v43, %v2829_v45  ;;  %v1344_v60 = vld.sshfl [vmem:[#allocation1 + $0x10] sm:$0xff pattern:$0x73625140]  ;;  %v1074_v45 = vld [vmem:[%s6139_s15 + $0x1670] sm:$0xff] }
 0x203   : > { %3904 = vmatpush.xpose.msra.mxu1 %v861_v2  ;;  %3944 = vmatpush.xpose.msra.mxu3 %v863_v5  ;;  %v871_v2 = vld [vmem:[%s6139_s15 + $0x1018] sm:$0xff]  ;;  %v674_v5 = vld [vmem:[%s6139_s15 + $0x9f0] sm:$0xff]  ;;  %v1072_v43 = vld [vmem:[%s6139_s15 + $0x1660] sm:$0xff] }
 0x204   : > { %v2869_v59 = vadd.f32 %v2868_v52, %v2849_v50 }
 0x205   : > { %v2888_v55 = vpop.f32.mrf.mxu2 }
 0x206   : > { %3885 = vmatpush.xpose.msra.mxu0 %v664_v7  ;;  %3925 = vmatpush.xpose.msra.mxu2 %v666_v9  ;;  %v2889_v1 = vadd.f32 %v2888_v55, %v2869_v59  ;;  %v673_v7 = vld [vmem:[%s6139_s15 + $0x9e8] sm:$0xff]  ;;  %v675_v9 = vld [vmem:[%s6139_s15 + $0x9f8] sm:$0xff] }
 0x207   : > { %3905 = vmatpush.xpose.msra.mxu1 %v665_v10  ;;  %3945 = vmatpush.xpose.msra.mxu3 %v667_v12  ;;  %v476_v10 = vld [vmem:[%s6139_s15 + $0x3c0] sm:$0xff]  ;;  %v478_v12 = vld [vmem:[%s6139_s15 + $0x3d0] sm:$0xff]  ;;  %v877_v59 = vld [vmem:[%s6139_s15 + $0x1048] sm:$0xff] }
 0x20a   : > { %3886 = vmatpush.xpose.msra.mxu0 %v468_v14  ;;  %3926 = vmatpush.xpose.msra.mxu2 %v470_v15  ;;  %v2948_v14 = vpop.f32.mrf.mxu1  ;;  %v1070_v15 = vld [vmem:[%s6139_s15 + $0x1650] sm:$0xff] }
 0x20b   : > { %3906 = vmatpush.xpose.msra.mxu1 %v469_v19  ;;  %3946 = vmatpush.xpose.msra.mxu3 %v471_v21  ;;  %v1069_v19 = vld [vmem:[%s6139_s15 + $0x1648] sm:$0xff]  ;;  %v1071_v21 = vld [vmem:[%s6139_s15 + $0x1658] sm:$0xff] }
 0x20d   : > { %3887 = vmatmul.f32.vlgmr.msra.gmra.mxu0 %v1332_v61  ;;  %3927 = vmatmul.f32.vlgmr.msra.gmra.mxu2 %v1334_v63  ;;  %v1343_v61 = vld.sshfl [vmem:[#allocation1 + $0x8] sm:$0xff pattern:$0x73625140]  ;;  %v1345_v63 = vld.sshfl [vmem:[#allocation1 + $0x18] sm:$0xff pattern:$0x73625140] }
 0x20e   : > { %3963 = vmatpush.xpose.msrb.mxu0 %v1060_v16  ;;  %4003 = vmatpush.xpose.msrb.mxu2 %v1062_v18  ;;  %v477_v16 = vld [vmem:[%s6139_s15 + $0x3c8] sm:$0xff]  ;;  %v2968_v18 = vpop.f32.mrf.mxu2 }
 0x20f   : > { %3983 = vmatpush.xpose.msrb.mxu1 %v1061_v22  ;;  %4023 = vmatpush.xpose.msrb.mxu3 %v1063_v24  ;;  %v872_v22 = vld [vmem:[%s6139_s15 + $0x1020] sm:$0xff]  ;;  %v1346_v24 = vld.sshfl [vmem:[#allocation1 + $0x20] sm:$0xff pattern:$0x73625140] }
 0x210   : > { %3907 = vmatmul.f32.vlgmr.msra.gmra.mxu1 %v1333_v0  ;;  %3947 = vmatmul.f32.vlgmr.msra.gmra.mxu3 %v1335_v3  ;;  %v339_v0 = vld [vmem:[%s6157_s17 + $0x100] sm:$0xff]  ;;  %v2908_v3 = vpop.f32.mrf.mxu3 }
 0x211   : > { %1350 = vst [vmem:[#allocation1] ss:$4 sm:$0xff] %v339_v0  ;;  %v2909_v8 = vadd.f32 %v2908_v3, %v2889_v1  ;;  %v680_v0 = vld [vmem:[%s6139_s15 + $0xa20] sm:$0xff] }
 0x212   : > { %3964 = vmatpush.xpose.msrb.mxu0 %v864_v26  ;;  %4004 = vmatpush.xpose.msrb.mxu2 %v866_v27  ;;  %v1348_v26 = vld.sshfl [vmem:[#allocation1 + $0x30] sm:$0xff pattern:$0x73625140]  ;;  %v1347_v27 = vld.sshfl [vmem:[#allocation1 + $0x28] sm:$0xff pattern:$0x73625140]  ;;  %v3028_v40 = vpop.f32.mrf.mxu1 }
 0x213   : > { %3984 = vmatpush.xpose.msrb.mxu1 %v865_v32  ;;  %4024 = vmatpush.xpose.msrb.mxu3 %v867_v36  ;;  %v2929_v11 = vadd.f32 %v2928_v6, %v2909_v8  ;;  %v875_v32 = vld [vmem:[%s6139_s15 + $0x1038] sm:$0xff]  ;;  %v678_v36 = vld [vmem:[%s6139_s15 + $0xa10] sm:$0xff] }
 0x215   : > { %v2949_v20 = vadd.f32 %v2948_v14, %v2929_v11  ;;  %v1078_v11 = vld [vmem:[%s6139_s15 + $0x1690] sm:$0xff]  ;;  %v487_v14 = vld [vmem:[%s6139_s15 + $0x418] sm:$0xff] }
 0x216   : > { %3965 = vmatpush.xpose.msrb.mxu0 %v668_v37  ;;  %4005 = vmatpush.xpose.msrb.mxu2 %v670_v39  ;;  %v677_v37 = vld [vmem:[%s6139_s15 + $0xa08] sm:$0xff]  ;;  %v679_v39 = vld [vmem:[%s6139_s15 + $0xa18] sm:$0xff] }
 0x217   : > { %3985 = vmatpush.xpose.msrb.mxu1 %v669_v41  ;;  %4025 = vmatpush.xpose.msrb.mxu3 %v671_v42  ;;  %v2969_v25 = vadd.f32 %v2968_v18, %v2949_v20  ;;  %v480_v41 = vld [vmem:[%s6139_s15 + $0x3e0] sm:$0xff]  ;;  %v482_v42 = vld [vmem:[%s6139_s15 + $0x3f0] sm:$0xff] }
 0x218   : > { %v1352_v55 = vld.sshfl [vmem:[#allocation1] sm:$0xff pattern:$0x73625140] }
 0x219   : > { %v882_v20 = vld [vmem:[%s6139_s15 + $0x1070] sm:$0xff] }
 0x21a   : > { %3966 = vmatpush.xpose.msrb.mxu0 %v472_v44  ;;  %4006 = vmatpush.xpose.msrb.mxu2 %v474_v46  ;;  %v3048_v44 = vpop.f32.mrf.mxu2  ;;  %v481_v46 = vld [vmem:[%s6139_s15 + $0x3e8] sm:$0xff]  ;;  %v3108_v3 = vpop.f32.mrf.mxu1 }
 0x21b   : > { %3986 = vmatpush.xpose.msrb.mxu1 %v473_v49  ;;  %4026 = vmatpush.xpose.msrb.mxu3 %v475_v51  ;;  %v1073_v49 = vld [vmem:[%s6139_s15 + $0x1668] sm:$0xff]  ;;  %v1075_v51 = vld [vmem:[%s6139_s15 + $0x1678] sm:$0xff] }
 0x21d   : > { %3967 = vmatmul.f32.vlgmr.msrb.gmra.mxu0 %v1336_v28  ;;  %4007 = vmatmul.f32.vlgmr.msrb.gmra.mxu2 %v1338_v29  ;;  %v2988_v28 = vpop.f32.mrf.mxu3  ;;  %v873_v29 = vld [vmem:[%s6139_s15 + $0x1028] sm:$0xff] }
 0x21e   : > { %4043 = vmatpush.xpose.msra.mxu0 %v1064_v47  ;;  %4083 = vmatpush.xpose.msra.mxu2 %v1066_v48  ;;  %v2989_v35 = vadd.f32 %v2988_v28, %v2969_v25  ;;  %v483_v48 = vld [vmem:[%s6139_s15 + $0x3f8] sm:$0xff]  ;;  %v881_v25 = vld [vmem:[%s6139_s15 + $0x1068] sm:$0xff] }
 0x21f   : > { %4063 = vmatpush.xpose.msra.mxu1 %v1065_v53  ;;  %4103 = vmatpush.xpose.msra.mxu3 %v1067_v54  ;;  %v876_v53 = vld [vmem:[%s6139_s15 + $0x1040] sm:$0xff]  ;;  %v878_v54 = vld [vmem:[%s6139_s15 + $0x1050] sm:$0xff] }
 0x220   : > { %3987 = vmatmul.f32.vlgmr.msrb.gmra.mxu1 %v1337_v30  ;;  %4027 = vmatmul.f32.vlgmr.msrb.gmra.mxu3 %v1339_v33  ;;  %v1349_v30 = vld.sshfl [vmem:[#allocation1 + $0x38] sm:$0xff pattern:$0x73625140]  ;;  %v3008_v33 = vpop.f32.mrf.mxu0 }
 0x221   : > { %1351 = vst [vmem:[#allocation1 + $0x20] ss:$4 sm:$0xff] %v340_v31  ;;  %v3009_v38 = vadd.f32 %v3008_v33, %v2989_v35  ;;  %v684_v31 = vld [vmem:[%s6139_s15 + $0xa40] sm:$0xff] }
 0x222   : > { %4044 = vmatpush.xpose.msra.mxu0 %v868_v56  ;;  %4084 = vmatpush.xpose.msra.mxu2 %v870_v57  ;;  %v1354_v56 = vld.sshfl [vmem:[#allocation1 + $0x10] sm:$0xff pattern:$0x73625140]  ;;  %v1353_v57 = vld.sshfl [vmem:[#allocation1 + $0x8] sm:$0xff pattern:$0x73625140]  ;;  %v3128_v6 = vpop.f32.mrf.mxu2 }
 0x223   : > { %4064 = vmatpush.xpose.msra.mxu1 %v869_v62  ;;  %4104 = vmatpush.xpose.msra.mxu3 %v871_v2  ;;  %v3029_v47 = vadd.f32 %v3028_v40, %v3009_v38  ;;  %v682_v2 = vld [vmem:[%s6139_s15 + $0xa30] sm:$0xff]  ;;  %v1080_v40 = vld [vmem:[%s6139_s15 + $0x16a0] sm:$0xff] }
 0x225   : > { %v3049_v50 = vadd.f32 %v3048_v44, %v3029_v47  ;;  %v3068_v52 = vpop.f32.mrf.mxu3  ;;  %v491_v44 = vld [vmem:[%s6139_s15 + $0x438] sm:$0xff] }
 0x226   : > { %4045 = vmatpush.xpose.msra.mxu0 %v672_v4  ;;  %4085 = vmatpush.xpose.msra.mxu2 %v674_v5  ;;  %v681_v4 = vld [vmem:[%s6139_s15 + $0xa28] sm:$0xff]  ;;  %v683_v5 = vld [vmem:[%s6139_s15 + $0xa38] sm:$0xff] }
 0x227   : > { %4065 = vmatpush.xpose.msra.mxu1 %v673_v7  ;;  %4105 = vmatpush.xpose.msra.mxu3 %v675_v9  ;;  %v3069_v62 = vadd.f32 %v3068_v52, %v3049_v50  ;;  %v484_v7 = vld [vmem:[%s6139_s15 + $0x400] sm:$0xff]  ;;  %v486_v9 = vld [vmem:[%s6139_s15 + $0x410] sm:$0xff] }
 0x228   : > { %v886_v50 = vld [vmem:[%s6139_s15 + $0x1090] sm:$0xff] }
 0x22a   : > { %4046 = vmatpush.xpose.msra.mxu0 %v476_v10  ;;  %4086 = vmatpush.xpose.msra.mxu2 %v478_v12  ;;  %v1076_v10 = vld [vmem:[%s6139_s15 + $0x1680] sm:$0xff]  ;;  %v485_v12 = vld [vmem:[%s6139_s15 + $0x408] sm:$0xff]  ;;  %v3208_v33 = vpop.f32.mrf.mxu2 }
 0x22b   : > { %4066 = vmatpush.xpose.msra.mxu1 %v477_v16  ;;  %4106 = vmatpush.xpose.msra.mxu3 %v479_v17  ;;  %v1077_v16 = vld [vmem:[%s6139_s15 + $0x1688] sm:$0xff]  ;;  %v1079_v17 = vld [vmem:[%s6139_s15 + $0x1698] sm:$0xff] }
 0x22d   : > { %4047 = vmatmul.f32.vlgmr.msra.gmra.mxu0 %v1342_v58  ;;  %4087 = vmatmul.f32.vlgmr.msra.gmra.mxu2 %v1344_v60  ;;  %v3088_v58 = vpop.f32.mrf.mxu0  ;;  %v1355_v60 = vld.sshfl [vmem:[#allocation1 + $0x18] sm:$0xff pattern:$0x73625140] }
 0x22e   : > { %4123 = vmatpush.xpose.msrb.mxu0 %v1068_v13  ;;  %4163 = vmatpush.xpose.msrb.mxu2 %v1070_v15  ;;  %v3089_v1 = vadd.f32 %v3088_v58, %v3069_v62  ;;  %v3148_v15 = vpop.f32.mrf.mxu3  ;;  %v343_v58 = vld [vmem:[%s6157_s17 + $0x120] sm:$0xff] }
 0x22f   : > { %4143 = vmatpush.xpose.msrb.mxu1 %v1069_v19  ;;  %4183 = vmatpush.xpose.msrb.mxu3 %v1071_v21  ;;  %v880_v19 = vld [vmem:[%s6139_s15 + $0x1060] sm:$0xff]  ;;  %v1356_v21 = vld.sshfl [vmem:[#allocation1 + $0x20] sm:$0xff pattern:$0x73625140] }
 0x230   : > { %4067 = vmatmul.f32.vlgmr.msra.gmra.mxu1 %v1343_v61  ;;  %4107 = vmatmul.f32.vlgmr.msra.gmra.mxu3 %v1345_v63  ;;  %v341_v61 = vld [vmem:[%s6157_s17 + $0x110] sm:$0xff]  ;;  %v879_v63 = vld [vmem:[%s6139_s15 + $0x1058] sm:$0xff]  ;;  %v3109_v8 = vadd.f32 %v3108_v3, %v3089_v1 }
 0x231   : > { %1360 = vst [vmem:[#allocation1] ss:$4 sm:$0xff] %v341_v61  ;;  %v688_v61 = vld [vmem:[%s6139_s15 + $0xa60] sm:$0xff] }
 0x232   : > { %4124 = vmatpush.xpose.msrb.mxu0 %v872_v22  ;;  %4164 = vmatpush.xpose.msrb.mxu2 %v874_v23  ;;  %v3129_v13 = vadd.f32 %v3128_v6, %v3109_v8  ;;  %v1358_v23 = vld.sshfl [vmem:[#allocation1 + $0x30] sm:$0xff pattern:$0x73625140]  ;;  %v1086_v8 = vld [vmem:[%s6139_s15 + $0x16d0] sm:$0xff] }
 0x233   : > { %4144 = vmatpush.xpose.msrb.mxu1 %v873_v29  ;;  %4184 = vmatpush.xpose.msrb.mxu3 %v875_v32  ;;  %v883_v29 = vld [vmem:[%s6139_s15 + $0x1078] sm:$0xff]  ;;  %v686_v32 = vld [vmem:[%s6139_s15 + $0xa50] sm:$0xff]  ;;  %v1084_v6 = vld [vmem:[%s6139_s15 + $0x16c0] sm:$0xff] }
 0x234   : > { %v3149_v22 = vadd.f32 %v3148_v15, %v3129_v13 }
 0x235   : > { %v3168_v18 = vpop.f32.mrf.mxu0 }
 0x236   : > { %4125 = vmatpush.xpose.msrb.mxu0 %v676_v34  ;;  %4165 = vmatpush.xpose.msrb.mxu2 %v678_v36  ;;  %v3169_v28 = vadd.f32 %v3168_v18, %v3149_v22  ;;  %v685_v34 = vld [vmem:[%s6139_s15 + $0xa48] sm:$0xff]  ;;  %v687_v36 = vld [vmem:[%s6139_s15 + $0xa58] sm:$0xff] }
 0x237   : > { %4145 = vmatpush.xpose.msrb.mxu1 %v677_v37  ;;  %4185 = vmatpush.xpose.msrb.mxu3 %v679_v39  ;;  %v488_v37 = vld [vmem:[%s6139_s15 + $0x420] sm:$0xff]  ;;  %v490_v39 = vld [vmem:[%s6139_s15 + $0x430] sm:$0xff]  ;;  %v889_v22 = vld [vmem:[%s6139_s15 + $0x10a8] sm:$0xff] }
 0x23a   : > { %4126 = vmatpush.xpose.msrb.mxu0 %v480_v41  ;;  %4166 = vmatpush.xpose.msrb.mxu2 %v482_v42  ;;  %v3228_v41 = vpop.f32.mrf.mxu3  ;;  %v1082_v42 = vld [vmem:[%s6139_s15 + $0x16b0] sm:$0xff] }
 0x23b   : > { %4146 = vmatpush.xpose.msrb.mxu1 %v481_v46  ;;  %4186 = vmatpush.xpose.msrb.mxu3 %v483_v48  ;;  %v1081_v46 = vld [vmem:[%s6139_s15 + $0x16a8] sm:$0xff]  ;;  %v1083_v48 = vld [vmem:[%s6139_s15 + $0x16b8] sm:$0xff] }
 0x23d   : > { %4127 = vmatmul.f32.vlgmr.msrb.gmra.mxu0 %v1346_v24  ;;  %4167 = vmatmul.f32.vlgmr.msrb.gmra.mxu2 %v1348_v26  ;;  %v1357_v24 = vld.sshfl [vmem:[#allocation1 + $0x28] sm:$0xff pattern:$0x73625140]  ;;  %v1359_v26 = vld.sshfl [vmem:[#allocation1 + $0x38] sm:$0xff pattern:$0x73625140] }
 0x23e   : > { %4203 = vmatpush.xpose.msra.mxu0 %v1072_v43  ;;  %4243 = vmatpush.xpose.msra.mxu2 %v1074_v45  ;;  %v489_v43 = vld [vmem:[%s6139_s15 + $0x428] sm:$0xff]  ;;  %v3248_v45 = vpop.f32.mrf.mxu0 }
 0x23f   : > { %4223 = vmatpush.xpose.msra.mxu1 %v1073_v49  ;;  %4263 = vmatpush.xpose.msra.mxu3 %v1075_v51  ;;  %v884_v49 = vld [vmem:[%s6139_s15 + $0x1080] sm:$0xff]  ;;  %v1362_v51 = vld.sshfl [vmem:[#allocation1] sm:$0xff pattern:$0x73625140] }
 0x240   : > { %4147 = vmatmul.f32.vlgmr.msrb.gmra.mxu1 %v1347_v27  ;;  %4187 = vmatmul.f32.vlgmr.msrb.gmra.mxu3 %v1349_v30  ;;  %v342_v27 = vld [vmem:[%s6157_s17 + $0x118] sm:$0xff]  ;;  %v3188_v30 = vpop.f32.mrf.mxu1 }
 0x241   : > { %1361 = vst [vmem:[#allocation1 + $0x20] ss:$4 sm:$0xff] %v342_v27  ;;  %v3189_v35 = vadd.f32 %v3188_v30, %v3169_v28  ;;  %v692_v27 = vld [vmem:[%s6139_s15 + $0xa80] sm:$0xff] }
 0x242   : > { %4204 = vmatpush.xpose.msra.mxu0 %v876_v53  ;;  %4244 = vmatpush.xpose.msra.mxu2 %v878_v54  ;;  %v1364_v53 = vld.sshfl [vmem:[#allocation1 + $0x10] sm:$0xff pattern:$0x73625140]  ;;  %v1363_v54 = vld.sshfl [vmem:[#allocation1 + $0x8] sm:$0xff pattern:$0x73625140]  ;;  %v3308_v3 = vpop.f32.mrf.mxu3 }
 0x243   : > { %4224 = vmatpush.xpose.msra.mxu1 %v877_v59  ;;  %4264 = vmatpush.xpose.msra.mxu3 %v879_v63  ;;  %v3209_v38 = vadd.f32 %v3208_v33, %v3189_v35  ;;  %v887_v59 = vld [vmem:[%s6139_s15 + $0x1098] sm:$0xff]  ;;  %v690_v63 = vld [vmem:[%s6139_s15 + $0xa70] sm:$0xff] }
 0x245   : > { %v3229_v47 = vadd.f32 %v3228_v41, %v3209_v38  ;;  %v1090_v38 = vld [vmem:[%s6139_s15 + $0x16f0] sm:$0xff]  ;;  %v499_v41 = vld [vmem:[%s6139_s15 + $0x478] sm:$0xff] }
 0x246   : > { %4205 = vmatpush.xpose.msra.mxu0 %v680_v0  ;;  %4245 = vmatpush.xpose.msra.mxu2 %v682_v2  ;;  %v689_v0 = vld [vmem:[%s6139_s15 + $0xa68] sm:$0xff]  ;;  %v691_v2 = vld [vmem:[%s6139_s15 + $0xa78] sm:$0xff] }
 0x247   : > { %4225 = vmatpush.xpose.msra.mxu1 %v681_v4  ;;  %4265 = vmatpush.xpose.msra.mxu3 %v683_v5  ;;  %v3249_v52 = vadd.f32 %v3248_v45, %v3229_v47  ;;  %v492_v4 = vld [vmem:[%s6139_s15 + $0x440] sm:$0xff]  ;;  %v494_v5 = vld [vmem:[%s6139_s15 + $0x450] sm:$0xff] }
 0x248   : > { %v1366_v18 = vld.sshfl [vmem:[#allocation1 + $0x20] sm:$0xff pattern:$0x73625140] }
 0x249   : > { %v894_v47 = vld [vmem:[%s6139_s15 + $0x10d0] sm:$0xff] }
 0x24a   : > { %4206 = vmatpush.xpose.msra.mxu0 %v484_v7  ;;  %4246 = vmatpush.xpose.msra.mxu2 %v486_v9  ;;  %v3328_v7 = vpop.f32.mrf.mxu0  ;;  %v493_v9 = vld [vmem:[%s6139_s15 + $0x448] sm:$0xff]  ;;  %v3388_v30 = vpop.f32.mrf.mxu3 }
 0x24b   : > { %4226 = vmatpush.xpose.msra.mxu1 %v485_v12  ;;  %4266 = vmatpush.xpose.msra.mxu3 %v487_v14  ;;  %v1085_v12 = vld [vmem:[%s6139_s15 + $0x16c8] sm:$0xff]  ;;  %v1087_v14 = vld [vmem:[%s6139_s15 + $0x16d8] sm:$0xff] }
 0x24d   : > { %4207 = vmatmul.f32.vlgmr.msra.gmra.mxu0 %v1352_v55  ;;  %4247 = vmatmul.f32.vlgmr.msra.gmra.mxu2 %v1354_v56  ;;  %v3268_v55 = vpop.f32.mrf.mxu1  ;;  %v885_v56 = vld [vmem:[%s6139_s15 + $0x1088] sm:$0xff] }
 0x24e   : > { %4283 = vmatpush.xpose.msrb.mxu0 %v1076_v10  ;;  %4323 = vmatpush.xpose.msrb.mxu2 %v1078_v11  ;;  %v3269_v62 = vadd.f32 %v3268_v55, %v3249_v52  ;;  %v495_v11 = vld [vmem:[%s6139_s15 + $0x458] sm:$0xff]  ;;  %v893_v52 = vld [vmem:[%s6139_s15 + $0x10c8] sm:$0xff] }
 0x24f   : > { %4303 = vmatpush.xpose.msrb.mxu1 %v1077_v16  ;;  %4343 = vmatpush.xpose.msrb.mxu3 %v1079_v17  ;;  %v888_v16 = vld [vmem:[%s6139_s15 + $0x10a0] sm:$0xff]  ;;  %v890_v17 = vld [vmem:[%s6139_s15 + $0x10b0] sm:$0xff] }
 0x250   : > { %4227 = vmatmul.f32.vlgmr.msra.gmra.mxu1 %v1353_v57  ;;  %4267 = vmatmul.f32.vlgmr.msra.gmra.mxu3 %v1355_v60  ;;  %v1365_v57 = vld.sshfl [vmem:[#allocation1 + $0x18] sm:$0xff pattern:$0x73625140]  ;;  %v3288_v60 = vpop.f32.mrf.mxu2 }
 0x251   : > { %1370 = vst [vmem:[#allocation1] ss:$4 sm:$0xff] %v343_v58  ;;  %v3289_v1 = vadd.f32 %v3288_v60, %v3269_v62  ;;  %v696_v58 = vld [vmem:[%s6139_s15 + $0xaa0] sm:$0xff] }
 0x252   : > { %4284 = vmatpush.xpose.msrb.mxu0 %v880_v19  ;;  %4324 = vmatpush.xpose.msrb.mxu2 %v882_v20  ;;  %v1368_v19 = vld.sshfl [vmem:[#allocation1 + $0x30] sm:$0xff pattern:$0x73625140]  ;;  %v1367_v20 = vld.sshfl [vmem:[#allocation1 + $0x28] sm:$0xff pattern:$0x73625140]  ;;  %v3408_v33 = vpop.f32.mrf.mxu0 }
 0x253   : > { %4304 = vmatpush.xpose.msrb.mxu1 %v881_v25  ;;  %4344 = vmatpush.xpose.msrb.mxu3 %v883_v29  ;;  %v3309_v10 = vadd.f32 %v3308_v3, %v3289_v1  ;;  %v694_v29 = vld [vmem:[%s6139_s15 + $0xa90] sm:$0xff]  ;;  %v1092_v3 = vld [vmem:[%s6139_s15 + $0x1700] sm:$0xff] }
 0x255   : > { %v3329_v13 = vadd.f32 %v3328_v7, %v3309_v10  ;;  %v3348_v15 = vpop.f32.mrf.mxu1  ;;  %v503_v7 = vld [vmem:[%s6139_s15 + $0x498] sm:$0xff] }
 0x256   : > { %4285 = vmatpush.xpose.msrb.mxu0 %v684_v31  ;;  %4325 = vmatpush.xpose.msrb.mxu2 %v686_v32  ;;  %v693_v31 = vld [vmem:[%s6139_s15 + $0xa88] sm:$0xff]  ;;  %v695_v32 = vld [vmem:[%s6139_s15 + $0xa98] sm:$0xff] }
 0x257   : > { %4305 = vmatpush.xpose.msrb.mxu1 %v685_v34  ;;  %4345 = vmatpush.xpose.msrb.mxu3 %v687_v36  ;;  %v3349_v25 = vadd.f32 %v3348_v15, %v3329_v13  ;;  %v496_v34 = vld [vmem:[%s6139_s15 + $0x460] sm:$0xff]  ;;  %v498_v36 = vld [vmem:[%s6139_s15 + $0x470] sm:$0xff] }
 0x258   : > { %v898_v13 = vld [vmem:[%s6139_s15 + $0x10f0] sm:$0xff] }
 0x25a   : > { %4286 = vmatpush.xpose.msrb.mxu0 %v488_v37  ;;  %4326 = vmatpush.xpose.msrb.mxu2 %v490_v39  ;;  %v1088_v37 = vld [vmem:[%s6139_s15 + $0x16e0] sm:$0xff]  ;;  %v497_v39 = vld [vmem:[%s6139_s15 + $0x468] sm:$0xff]  ;;  %v3488_v60 = vpop.f32.mrf.mxu0 }
 0x25b   : > { %4306 = vmatpush.xpose.msrb.mxu1 %v489_v43  ;;  %4346 = vmatpush.xpose.msrb.mxu3 %v491_v44  ;;  %v1089_v43 = vld [vmem:[%s6139_s15 + $0x16e8] sm:$0xff]  ;;  %v1091_v44 = vld [vmem:[%s6139_s15 + $0x16f8] sm:$0xff] }
 0x25d   : > { %4287 = vmatmul.f32.vlgmr.msrb.gmra.mxu0 %v1356_v21  ;;  %4327 = vmatmul.f32.vlgmr.msrb.gmra.mxu2 %v1358_v23  ;;  %v3368_v21 = vpop.f32.mrf.mxu2  ;;  %v1369_v23 = vld.sshfl [vmem:[#allocation1 + $0x38] sm:$0xff pattern:$0x73625140] }
 0x25e   : > { %4363 = vmatpush.xpose.msra.mxu0 %v1080_v40  ;;  %4403 = vmatpush.xpose.msra.mxu2 %v1082_v42  ;;  %v3369_v28 = vadd.f32 %v3368_v21, %v3349_v25  ;;  %v3428_v42 = vpop.f32.mrf.mxu1  ;;  %v346_v21 = vld [vmem:[%s6157_s17 + $0x138] sm:$0xff] }
 0x25f   : > { %4383 = vmatpush.xpose.msra.mxu1 %v1081_v46  ;;  %4423 = vmatpush.xpose.msra.mxu3 %v1083_v48  ;;  %v892_v46 = vld [vmem:[%s6139_s15 + $0x10c0] sm:$0xff]  ;;  %v1372_v48 = vld.sshfl [vmem:[#allocation1] sm:$0xff pattern:$0x73625140] }
 0x260   : > { %4307 = vmatmul.f32.vlgmr.msrb.gmra.mxu1 %v1357_v24  ;;  %4347 = vmatmul.f32.vlgmr.msrb.gmra.mxu3 %v1359_v26  ;;  %v344_v24 = vld [vmem:[%s6157_s17 + $0x128] sm:$0xff]  ;;  %v3389_v35 = vadd.f32 %v3388_v30, %v3369_v28 }
 0x261   : > { %v891_v26 = vld [vmem:[%s6139_s15 + $0x10b8] sm:$0xff]  ;;  %1371 = vst [vmem:[#allocation1 + $0x20] ss:$4 sm:$0xff] %v344_v24  ;;  %v700_v24 = vld [vmem:[%s6139_s15 + $0xac0] sm:$0xff] }
 0x262   : > { %4364 = vmatpush.xpose.msra.mxu0 %v884_v49  ;;  %4404 = vmatpush.xpose.msra.mxu2 %v886_v50  ;;  %v3409_v40 = vadd.f32 %v3408_v33, %v3389_v35  ;;  %v1374_v50 = vld.sshfl [vmem:[#allocation1 + $0x10] sm:$0xff pattern:$0x73625140]  ;;  %v1098_v35 = vld [vmem:[%s6139_s15 + $0x1730] sm:$0xff] }
 0x263   : > { %4384 = vmatpush.xpose.msra.mxu1 %v885_v56  ;;  %4424 = vmatpush.xpose.msra.mxu3 %v887_v59  ;;  %v895_v56 = vld [vmem:[%s6139_s15 + $0x10d8] sm:$0xff]  ;;  %v698_v59 = vld [vmem:[%s6139_s15 + $0xab0] sm:$0xff]  ;;  %v1096_v33 = vld [vmem:[%s6139_s15 + $0x1720] sm:$0xff] }
 0x264   : > { %v3429_v49 = vadd.f32 %v3428_v42, %v3409_v40 }
 0x265   : > { %v3448_v45 = vpop.f32.mrf.mxu2 }
 0x266   : > { %4365 = vmatpush.xpose.msra.mxu0 %v688_v61  ;;  %4405 = vmatpush.xpose.msra.mxu2 %v690_v63  ;;  %v3449_v55 = vadd.f32 %v3448_v45, %v3429_v49  ;;  %v697_v61 = vld [vmem:[%s6139_s15 + $0xaa8] sm:$0xff]  ;;  %v699_v63 = vld [vmem:[%s6139_s15 + $0xab8] sm:$0xff] }
 0x267   : > { %4385 = vmatpush.xpose.msra.mxu1 %v689_v0  ;;  %4425 = vmatpush.xpose.msra.mxu3 %v691_v2  ;;  %v500_v0 = vld [vmem:[%s6139_s15 + $0x480] sm:$0xff]  ;;  %v502_v2 = vld [vmem:[%s6139_s15 + $0x490] sm:$0xff]  ;;  %v901_v49 = vld [vmem:[%s6139_s15 + $0x1108] sm:$0xff] }
 0x26a   : > { %4366 = vmatpush.xpose.msra.mxu0 %v492_v4  ;;  %4406 = vmatpush.xpose.msra.mxu2 %v494_v5  ;;  %v3508_v4 = vpop.f32.mrf.mxu1  ;;  %v1094_v5 = vld [vmem:[%s6139_s15 + $0x1710] sm:$0xff] }
 0x26b   : > { %4386 = vmatpush.xpose.msra.mxu1 %v493_v9  ;;  %4426 = vmatpush.xpose.msra.mxu3 %v495_v11  ;;  %v1093_v9 = vld [vmem:[%s6139_s15 + $0x1708] sm:$0xff]  ;;  %v1095_v11 = vld [vmem:[%s6139_s15 + $0x1718] sm:$0xff] }
 0x26d   : > { %4367 = vmatmul.f32.vlgmr.msra.gmra.mxu0 %v1362_v51  ;;  %4407 = vmatmul.f32.vlgmr.msra.gmra.mxu2 %v1364_v53  ;;  %v1373_v51 = vld.sshfl [vmem:[#allocation1 + $0x8] sm:$0xff pattern:$0x73625140]  ;;  %v1375_v53 = vld.sshfl [vmem:[#allocation1 + $0x18] sm:$0xff pattern:$0x73625140] }
 0x26e   : > { %4443 = vmatpush.xpose.msrb.mxu0 %v1084_v6  ;;  %4483 = vmatpush.xpose.msrb.mxu2 %v1086_v8  ;;  %v501_v6 = vld [vmem:[%s6139_s15 + $0x488] sm:$0xff]  ;;  %v3528_v8 = vpop.f32.mrf.mxu2 }
 0x26f   : > { %4463 = vmatpush.xpose.msrb.mxu1 %v1085_v12  ;;  %4503 = vmatpush.xpose.msrb.mxu3 %v1087_v14  ;;  %v896_v12 = vld [vmem:[%s6139_s15 + $0x10e0] sm:$0xff]  ;;  %v1376_v14 = vld.sshfl [vmem:[#allocation1 + $0x20] sm:$0xff pattern:$0x73625140] }
 0x270   : > { %4387 = vmatmul.f32.vlgmr.msra.gmra.mxu1 %v1363_v54  ;;  %4427 = vmatmul.f32.vlgmr.msra.gmra.mxu3 %v1365_v57  ;;  %v345_v54 = vld [vmem:[%s6157_s17 + $0x130] sm:$0xff]  ;;  %v3468_v57 = vpop.f32.mrf.mxu3 }
 0x271   : > { %1380 = vst [vmem:[#allocation1] ss:$4 sm:$0xff] %v345_v54  ;;  %v3469_v62 = vadd.f32 %v3468_v57, %v3449_v55  ;;  %v704_v54 = vld [vmem:[%s6139_s15 + $0xae0] sm:$0xff] }
 0x272   : > { %4444 = vmatpush.xpose.msrb.mxu0 %v888_v16  ;;  %4484 = vmatpush.xpose.msrb.mxu2 %v890_v17  ;;  %v1378_v16 = vld.sshfl [vmem:[#allocation1 + $0x30] sm:$0xff pattern:$0x73625140]  ;;  %v1377_v17 = vld.sshfl [vmem:[#allocation1 + $0x28] sm:$0xff pattern:$0x73625140]  ;;  %v3588_v30 = vpop.f32.mrf.mxu1 }
 0x273   : > { %4464 = vmatpush.xpose.msrb.mxu1 %v889_v22  ;;  %4504 = vmatpush.xpose.msrb.mxu3 %v891_v26  ;;  %v3489_v1 = vadd.f32 %v3488_v60, %v3469_v62  ;;  %v899_v22 = vld [vmem:[%s6139_s15 + $0x10f8] sm:$0xff]  ;;  %v702_v26 = vld [vmem:[%s6139_s15 + $0xad0] sm:$0xff] }
 0x275   : > { %v3509_v10 = vadd.f32 %v3508_v4, %v3489_v1  ;;  %v1102_v1 = vld [vmem:[%s6139_s15 + $0x1750] sm:$0xff]  ;;  %v511_v4 = vld [vmem:[%s6139_s15 + $0x4d8] sm:$0xff] }
 0x276   : > { %4445 = vmatpush.xpose.msrb.mxu0 %v692_v27  ;;  %4485 = vmatpush.xpose.msrb.mxu2 %v694_v29  ;;  %v701_v27 = vld [vmem:[%s6139_s15 + $0xac8] sm:$0xff]  ;;  %v703_v29 = vld [vmem:[%s6139_s15 + $0xad8] sm:$0xff] }
 0x277   : > { %4465 = vmatpush.xpose.msrb.mxu1 %v693_v31  ;;  %4505 = vmatpush.xpose.msrb.mxu3 %v695_v32  ;;  %v3529_v15 = vadd.f32 %v3528_v8, %v3509_v10  ;;  %v504_v31 = vld [vmem:[%s6139_s15 + $0x4a0] sm:$0xff]  ;;  %v506_v32 = vld [vmem:[%s6139_s15 + $0x4b0] sm:$0xff] }
 0x278   : > { %v1382_v45 = vld.sshfl [vmem:[#allocation1] sm:$0xff pattern:$0x73625140] }
 0x279   : > { %v906_v10 = vld [vmem:[%s6139_s15 + $0x1130] sm:$0xff] }
 0x27a   : > { %4446 = vmatpush.xpose.msrb.mxu0 %v496_v34  ;;  %4486 = vmatpush.xpose.msrb.mxu2 %v498_v36  ;;  %v3608_v34 = vpop.f32.mrf.mxu2  ;;  %v505_v36 = vld [vmem:[%s6139_s15 + $0x4a8] sm:$0xff]  ;;  %v3668_v57 = vpop.f32.mrf.mxu1 }
 0x27b   : > { %4466 = vmatpush.xpose.msrb.mxu1 %v497_v39  ;;  %4506 = vmatpush.xpose.msrb.mxu3 %v499_v41  ;;  %v1097_v39 = vld [vmem:[%s6139_s15 + $0x1728] sm:$0xff]  ;;  %v1099_v41 = vld [vmem:[%s6139_s15 + $0x1738] sm:$0xff] }
 0x27d   : > { %4447 = vmatmul.f32.vlgmr.msrb.gmra.mxu0 %v1366_v18  ;;  %4487 = vmatmul.f32.vlgmr.msrb.gmra.mxu2 %v1368_v19  ;;  %v3548_v18 = vpop.f32.mrf.mxu3  ;;  %v897_v19 = vld [vmem:[%s6139_s15 + $0x10e8] sm:$0xff] }
 0x27e   : > { %4523 = vmatpush.xpose.msra.mxu0 %v1088_v37  ;;  %4563 = vmatpush.xpose.msra.mxu2 %v1090_v38  ;;  %v3549_v25 = vadd.f32 %v3548_v18, %v3529_v15  ;;  %v507_v38 = vld [vmem:[%s6139_s15 + $0x4b8] sm:$0xff]  ;;  %v905_v15 = vld [vmem:[%s6139_s15 + $0x1128] sm:$0xff] }
 0x27f   : > { %4543 = vmatpush.xpose.msra.mxu1 %v1089_v43  ;;  %4583 = vmatpush.xpose.msra.mxu3 %v1091_v44  ;;  %v900_v43 = vld [vmem:[%s6139_s15 + $0x1100] sm:$0xff]  ;;  %v902_v44 = vld [vmem:[%s6139_s15 + $0x1110] sm:$0xff] }
 0x280   : > { %4467 = vmatmul.f32.vlgmr.msrb.gmra.mxu1 %v1367_v20  ;;  %4507 = vmatmul.f32.vlgmr.msrb.gmra.mxu3 %v1369_v23  ;;  %v1379_v20 = vld.sshfl [vmem:[#allocation1 + $0x38] sm:$0xff pattern:$0x73625140]  ;;  %v3568_v23 = vpop.f32.mrf.mxu0 }
 0x281   : > { %1381 = vst [vmem:[#allocation1 + $0x20] ss:$4 sm:$0xff] %v346_v21  ;;  %v3569_v28 = vadd.f32 %v3568_v23, %v3549_v25  ;;  %v708_v21 = vld [vmem:[%s6139_s15 + $0xb00] sm:$0xff] }
 0x282   : > { %4524 = vmatpush.xpose.msra.mxu0 %v892_v46  ;;  %4564 = vmatpush.xpose.msra.mxu2 %v894_v47  ;;  %v1384_v46 = vld.sshfl [vmem:[#allocation1 + $0x10] sm:$0xff pattern:$0x73625140]  ;;  %v1383_v47 = vld.sshfl [vmem:[#allocation1 + $0x8] sm:$0xff pattern:$0x73625140]  ;;  %v3688_v60 = vpop.f32.mrf.mxu2 }
 0x283   : > { %4544 = vmatpush.xpose.msra.mxu1 %v893_v52  ;;  %4584 = vmatpush.xpose.msra.mxu3 %v895_v56  ;;  %v3589_v37 = vadd.f32 %v3588_v30, %v3569_v28  ;;  %v706_v56 = vld [vmem:[%s6139_s15 + $0xaf0] sm:$0xff]  ;;  %v1104_v30 = vld [vmem:[%s6139_s15 + $0x1760] sm:$0xff] }
 0x285   : > { %v3609_v40 = vadd.f32 %v3608_v34, %v3589_v37  ;;  %v3628_v42 = vpop.f32.mrf.mxu3  ;;  %v515_v34 = vld [vmem:[%s6139_s15 + $0x4f8] sm:$0xff] }
 0x286   : > { %4525 = vmatpush.xpose.msra.mxu0 %v696_v58  ;;  %4565 = vmatpush.xpose.msra.mxu2 %v698_v59  ;;  %v705_v58 = vld [vmem:[%s6139_s15 + $0xae8] sm:$0xff]  ;;  %v707_v59 = vld [vmem:[%s6139_s15 + $0xaf8] sm:$0xff] }
 0x287   : > { %4545 = vmatpush.xpose.msra.mxu1 %v697_v61  ;;  %4585 = vmatpush.xpose.msra.mxu3 %v699_v63  ;;  %v3629_v52 = vadd.f32 %v3628_v42, %v3609_v40  ;;  %v508_v61 = vld [vmem:[%s6139_s15 + $0x4c0] sm:$0xff]  ;;  %v510_v63 = vld [vmem:[%s6139_s15 + $0x4d0] sm:$0xff] }
 0x288   : > { %v910_v40 = vld [vmem:[%s6139_s15 + $0x1150] sm:$0xff] }
 0x28a   : > { %4526 = vmatpush.xpose.msra.mxu0 %v500_v0  ;;  %4566 = vmatpush.xpose.msra.mxu2 %v502_v2  ;;  %v1100_v0 = vld [vmem:[%s6139_s15 + $0x1740] sm:$0xff]  ;;  %v509_v2 = vld [vmem:[%s6139_s15 + $0x4c8] sm:$0xff]  ;;  %v3768_v23 = vpop.f32.mrf.mxu2 }
 0x28b   : > { %4546 = vmatpush.xpose.msra.mxu1 %v501_v6  ;;  %4586 = vmatpush.xpose.msra.mxu3 %v503_v7  ;;  %v1101_v6 = vld [vmem:[%s6139_s15 + $0x1748] sm:$0xff]  ;;  %v1103_v7 = vld [vmem:[%s6139_s15 + $0x1758] sm:$0xff] }
 0x28d   : > { %4527 = vmatmul.f32.vlgmr.msra.gmra.mxu0 %v1372_v48  ;;  %4567 = vmatmul.f32.vlgmr.msra.gmra.mxu2 %v1374_v50  ;;  %v3648_v48 = vpop.f32.mrf.mxu0  ;;  %v1385_v50 = vld.sshfl [vmem:[#allocation1 + $0x18] sm:$0xff pattern:$0x73625140] }
 0x28e   : > { %4603 = vmatpush.xpose.msrb.mxu0 %v1092_v3  ;;  %4643 = vmatpush.xpose.msrb.mxu2 %v1094_v5  ;;  %v3649_v55 = vadd.f32 %v3648_v48, %v3629_v52  ;;  %v3708_v5 = vpop.f32.mrf.mxu3  ;;  %v349_v48 = vld [vmem:[%s6157_s17 + $0x150] sm:$0xff] }
 0x28f   : > { %4623 = vmatpush.xpose.msrb.mxu1 %v1093_v9  ;;  %4663 = vmatpush.xpose.msrb.mxu3 %v1095_v11  ;;  %v904_v9 = vld [vmem:[%s6139_s15 + $0x1120] sm:$0xff]  ;;  %v1386_v11 = vld.sshfl [vmem:[#allocation1 + $0x20] sm:$0xff pattern:$0x73625140] }
 0x290   : > { %4547 = vmatmul.f32.vlgmr.msra.gmra.mxu1 %v1373_v51  ;;  %4587 = vmatmul.f32.vlgmr.msra.gmra.mxu3 %v1375_v53  ;;  %v347_v51 = vld [vmem:[%s6157_s17 + $0x140] sm:$0xff]  ;;  %v3669_v62 = vadd.f32 %v3668_v57, %v3649_v55 }
 0x291   : > { %v903_v53 = vld [vmem:[%s6139_s15 + $0x1118] sm:$0xff]  ;;  %1390 = vst [vmem:[#allocation1] ss:$4 sm:$0xff] %v347_v51  ;;  %v712_v51 = vld [vmem:[%s6139_s15 + $0xb20] sm:$0xff] }
 0x292   : > { %4604 = vmatpush.xpose.msrb.mxu0 %v896_v12  ;;  %4644 = vmatpush.xpose.msrb.mxu2 %v898_v13  ;;  %v3689_v3 = vadd.f32 %v3688_v60, %v3669_v62  ;;  %v1388_v13 = vld.sshfl [vmem:[#allocation1 + $0x30] sm:$0xff pattern:$0x73625140]  ;;  %v1110_v62 = vld [vmem:[%s6139_s15 + $0x1790] sm:$0xff] }
 0x293   : > { %4624 = vmatpush.xpose.msrb.mxu1 %v897_v19  ;;  %4664 = vmatpush.xpose.msrb.mxu3 %v899_v22  ;;  %v907_v19 = vld [vmem:[%s6139_s15 + $0x1138] sm:$0xff]  ;;  %v710_v22 = vld [vmem:[%s6139_s15 + $0xb10] sm:$0xff]  ;;  %v1108_v60 = vld [vmem:[%s6139_s15 + $0x1780] sm:$0xff] }
 0x294   : > { %v3709_v12 = vadd.f32 %v3708_v5, %v3689_v3 }
 0x295   : > { %v3728_v8 = vpop.f32.mrf.mxu0 }
 0x296   : > { %4605 = vmatpush.xpose.msrb.mxu0 %v700_v24  ;;  %4645 = vmatpush.xpose.msrb.mxu2 %v702_v26  ;;  %v3729_v18 = vadd.f32 %v3728_v8, %v3709_v12  ;;  %v709_v24 = vld [vmem:[%s6139_s15 + $0xb08] sm:$0xff]  ;;  %v711_v26 = vld [vmem:[%s6139_s15 + $0xb18] sm:$0xff] }
 0x297   : > { %4625 = vmatpush.xpose.msrb.mxu1 %v701_v27  ;;  %4665 = vmatpush.xpose.msrb.mxu3 %v703_v29  ;;  %v512_v27 = vld [vmem:[%s6139_s15 + $0x4e0] sm:$0xff]  ;;  %v514_v29 = vld [vmem:[%s6139_s15 + $0x4f0] sm:$0xff]  ;;  %v913_v12 = vld [vmem:[%s6139_s15 + $0x1168] sm:$0xff] }
 0x29a   : > { %4606 = vmatpush.xpose.msrb.mxu0 %v504_v31  ;;  %4646 = vmatpush.xpose.msrb.mxu2 %v506_v32  ;;  %v3788_v31 = vpop.f32.mrf.mxu3  ;;  %v1106_v32 = vld [vmem:[%s6139_s15 + $0x1770] sm:$0xff] }
 0x29b   : > { %4626 = vmatpush.xpose.msrb.mxu1 %v505_v36  ;;  %4666 = vmatpush.xpose.msrb.mxu3 %v507_v38  ;;  %v1105_v36 = vld [vmem:[%s6139_s15 + $0x1768] sm:$0xff]  ;;  %v1107_v38 = vld [vmem:[%s6139_s15 + $0x1778] sm:$0xff] }
 0x29d   : > { %4607 = vmatmul.f32.vlgmr.msrb.gmra.mxu0 %v1376_v14  ;;  %4647 = vmatmul.f32.vlgmr.msrb.gmra.mxu2 %v1378_v16  ;;  %v1387_v14 = vld.sshfl [vmem:[#allocation1 + $0x28] sm:$0xff pattern:$0x73625140]  ;;  %v1389_v16 = vld.sshfl [vmem:[#allocation1 + $0x38] sm:$0xff pattern:$0x73625140] }
 0x29e   : > { %4683 = vmatpush.xpose.msra.mxu0 %v1096_v33  ;;  %4723 = vmatpush.xpose.msra.mxu2 %v1098_v35  ;;  %v513_v33 = vld [vmem:[%s6139_s15 + $0x4e8] sm:$0xff]  ;;  %v3808_v35 = vpop.f32.mrf.mxu0 }
 0x29f   : > { %4703 = vmatpush.xpose.msra.mxu1 %v1097_v39  ;;  %4743 = vmatpush.xpose.msra.mxu3 %v1099_v41  ;;  %v908_v39 = vld [vmem:[%s6139_s15 + $0x1140] sm:$0xff]  ;;  %v1392_v41 = vld.sshfl [vmem:[#allocation1] sm:$0xff pattern:$0x73625140] }
 0x2a0   : > { %4627 = vmatmul.f32.vlgmr.msrb.gmra.mxu1 %v1377_v17  ;;  %4667 = vmatmul.f32.vlgmr.msrb.gmra.mxu3 %v1379_v20  ;;  %v348_v17 = vld [vmem:[%s6157_s17 + $0x148] sm:$0xff]  ;;  %v3748_v20 = vpop.f32.mrf.mxu1 }
 0x2a1   : > { %1391 = vst [vmem:[#allocation1 + $0x20] ss:$4 sm:$0xff] %v348_v17  ;;  %v3749_v25 = vadd.f32 %v3748_v20, %v3729_v18  ;;  %v716_v17 = vld [vmem:[%s6139_s15 + $0xb40] sm:$0xff] }
 0x2a2   : > { %4684 = vmatpush.xpose.msra.mxu0 %v900_v43  ;;  %4724 = vmatpush.xpose.msra.mxu2 %v902_v44  ;;  %v1394_v43 = vld.sshfl [vmem:[#allocation1 + $0x10] sm:$0xff pattern:$0x73625140]  ;;  %v1393_v44 = vld.sshfl [vmem:[#allocation1 + $0x8] sm:$0xff pattern:$0x73625140]  ;;  %v3868_v57 = vpop.f32.mrf.mxu3 }
 0x2a3   : > { %4704 = vmatpush.xpose.msra.mxu1 %v901_v49  ;;  %4744 = vmatpush.xpose.msra.mxu3 %v903_v53  ;;  %v3769_v28 = vadd.f32 %v3768_v23, %v3749_v25  ;;  %v911_v49 = vld [vmem:[%s6139_s15 + $0x1158] sm:$0xff]  ;;  %v714_v53 = vld [vmem:[%s6139_s15 + $0xb30] sm:$0xff] }
 0x2a5   : > { %v3789_v37 = vadd.f32 %v3788_v31, %v3769_v28  ;;  %v1114_v28 = vld [vmem:[%s6139_s15 + $0x17b0] sm:$0xff]  ;;  %v523_v31 = vld [vmem:[%s6139_s15 + $0x538] sm:$0xff] }
 0x2a6   : > { %4685 = vmatpush.xpose.msra.mxu0 %v704_v54  ;;  %4725 = vmatpush.xpose.msra.mxu2 %v706_v56  ;;  %v713_v54 = vld [vmem:[%s6139_s15 + $0xb28] sm:$0xff]  ;;  %v715_v56 = vld [vmem:[%s6139_s15 + $0xb38] sm:$0xff] }
 0x2a7   : > { %4705 = vmatpush.xpose.msra.mxu1 %v705_v58  ;;  %4745 = vmatpush.xpose.msra.mxu3 %v707_v59  ;;  %v3809_v42 = vadd.f32 %v3808_v35, %v3789_v37  ;;  %v516_v58 = vld [vmem:[%s6139_s15 + $0x500] sm:$0xff]  ;;  %v518_v59 = vld [vmem:[%s6139_s15 + $0x510] sm:$0xff] }
 0x2a8   : > { %v1396_v8 = vld.sshfl [vmem:[#allocation1 + $0x20] sm:$0xff pattern:$0x73625140] }
 0x2a9   : > { %v918_v37 = vld [vmem:[%s6139_s15 + $0x1190] sm:$0xff] }
 0x2aa   : > { %4686 = vmatpush.xpose.msra.mxu0 %v508_v61  ;;  %4726 = vmatpush.xpose.msra.mxu2 %v510_v63  ;;  %v3888_v61 = vpop.f32.mrf.mxu0  ;;  %v517_v63 = vld [vmem:[%s6139_s15 + $0x508] sm:$0xff]  ;;  %v3948_v20 = vpop.f32.mrf.mxu3 }
 0x2ab   : > { %4706 = vmatpush.xpose.msra.mxu1 %v509_v2  ;;  %4746 = vmatpush.xpose.msra.mxu3 %v511_v4  ;;  %v1109_v2 = vld [vmem:[%s6139_s15 + $0x1788] sm:$0xff]  ;;  %v1111_v4 = vld [vmem:[%s6139_s15 + $0x1798] sm:$0xff] }
 0x2ad   : > { %4687 = vmatmul.f32.vlgmr.msra.gmra.mxu0 %v1382_v45  ;;  %4727 = vmatmul.f32.vlgmr.msra.gmra.mxu2 %v1384_v46  ;;  %v3828_v45 = vpop.f32.mrf.mxu1  ;;  %v909_v46 = vld [vmem:[%s6139_s15 + $0x1148] sm:$0xff] }
 0x2ae   : > { %4763 = vmatpush.xpose.msrb.mxu0 %v1100_v0  ;;  %4803 = vmatpush.xpose.msrb.mxu2 %v1102_v1  ;;  %v3829_v52 = vadd.f32 %v3828_v45, %v3809_v42  ;;  %v519_v1 = vld [vmem:[%s6139_s15 + $0x518] sm:$0xff]  ;;  %v917_v42 = vld [vmem:[%s6139_s15 + $0x1188] sm:$0xff] }
 0x2af   : > { %4783 = vmatpush.xpose.msrb.mxu1 %v1101_v6  ;;  %4823 = vmatpush.xpose.msrb.mxu3 %v1103_v7  ;;  %v912_v6 = vld [vmem:[%s6139_s15 + $0x1160] sm:$0xff]  ;;  %v914_v7 = vld [vmem:[%s6139_s15 + $0x1170] sm:$0xff] }
 0x2b0   : > { %4707 = vmatmul.f32.vlgmr.msra.gmra.mxu1 %v1383_v47  ;;  %4747 = vmatmul.f32.vlgmr.msra.gmra.mxu3 %v1385_v50  ;;  %v1395_v47 = vld.sshfl [vmem:[#allocation1 + $0x18] sm:$0xff pattern:$0x73625140]  ;;  %v3848_v50 = vpop.f32.mrf.mxu2 }
 0x2b1   : > { %1400 = vst [vmem:[#allocation1] ss:$4 sm:$0xff] %v349_v48  ;;  %v3849_v55 = vadd.f32 %v3848_v50, %v3829_v52  ;;  %v720_v48 = vld [vmem:[%s6139_s15 + $0xb60] sm:$0xff] }
 0x2b2   : > { %4764 = vmatpush.xpose.msrb.mxu0 %v904_v9  ;;  %4804 = vmatpush.xpose.msrb.mxu2 %v906_v10  ;;  %v1398_v9 = vld.sshfl [vmem:[#allocation1 + $0x30] sm:$0xff pattern:$0x73625140]  ;;  %v1397_v10 = vld.sshfl [vmem:[#allocation1 + $0x28] sm:$0xff pattern:$0x73625140]  ;;  %v3968_v23 = vpop.f32.mrf.mxu0 }
 0x2b3   : > { %4784 = vmatpush.xpose.msrb.mxu1 %v905_v15  ;;  %4824 = vmatpush.xpose.msrb.mxu3 %v907_v19  ;;  %v3869_v0 = vadd.f32 %v3868_v57, %v3849_v55  ;;  %v718_v19 = vld [vmem:[%s6139_s15 + $0xb50] sm:$0xff]  ;;  %v1116_v57 = vld [vmem:[%s6139_s15 + $0x17c0] sm:$0xff] }
 0x2b5   : > { %v3889_v3 = vadd.f32 %v3888_v61, %v3869_v0  ;;  %v3908_v5 = vpop.f32.mrf.mxu1  ;;  %v527_v61 = vld [vmem:[%s6139_s15 + $0x558] sm:$0xff] }
 0x2b6   : > { %4765 = vmatpush.xpose.msrb.mxu0 %v708_v21  ;;  %4805 = vmatpush.xpose.msrb.mxu2 %v710_v22  ;;  %v717_v21 = vld [vmem:[%s6139_s15 + $0xb48] sm:$0xff]  ;;  %v719_v22 = vld [vmem:[%s6139_s15 + $0xb58] sm:$0xff] }
 0x2b7   : > { %4785 = vmatpush.xpose.msrb.mxu1 %v709_v24  ;;  %4825 = vmatpush.xpose.msrb.mxu3 %v711_v26  ;;  %v3909_v15 = vadd.f32 %v3908_v5, %v3889_v3  ;;  %v520_v24 = vld [vmem:[%s6139_s15 + $0x520] sm:$0xff]  ;;  %v522_v26 = vld [vmem:[%s6139_s15 + $0x530] sm:$0xff] }
 0x2b8   : > { %v922_v3 = vld [vmem:[%s6139_s15 + $0x11b0] sm:$0xff] }
 0x2ba   : > { %4766 = vmatpush.xpose.msrb.mxu0 %v512_v27  ;;  %4806 = vmatpush.xpose.msrb.mxu2 %v514_v29  ;;  %v1112_v27 = vld [vmem:[%s6139_s15 + $0x17a0] sm:$0xff]  ;;  %v521_v29 = vld [vmem:[%s6139_s15 + $0x528] sm:$0xff]  ;;  %v4048_v50 = vpop.f32.mrf.mxu0 }
 0x2bb   : > { %4786 = vmatpush.xpose.msrb.mxu1 %v513_v33  ;;  %4826 = vmatpush.xpose.msrb.mxu3 %v515_v34  ;;  %v1113_v33 = vld [vmem:[%s6139_s15 + $0x17a8] sm:$0xff]  ;;  %v1115_v34 = vld [vmem:[%s6139_s15 + $0x17b8] sm:$0xff] }
 0x2bd   : > { %4767 = vmatmul.f32.vlgmr.msrb.gmra.mxu0 %v1386_v11  ;;  %4807 = vmatmul.f32.vlgmr.msrb.gmra.mxu2 %v1388_v13  ;;  %v3928_v11 = vpop.f32.mrf.mxu2  ;;  %v1399_v13 = vld.sshfl [vmem:[#allocation1 + $0x38] sm:$0xff pattern:$0x73625140] }
 0x2be   : > { %4843 = vmatpush.xpose.msra.mxu0 %v1104_v30  ;;  %4883 = vmatpush.xpose.msra.mxu2 %v1106_v32  ;;  %v3929_v18 = vadd.f32 %v3928_v11, %v3909_v15  ;;  %v3988_v32 = vpop.f32.mrf.mxu1  ;;  %v352_v11 = vld [vmem:[%s6157_s17 + $0x168] sm:$0xff] }
 0x2bf   : > { %4863 = vmatpush.xpose.msra.mxu1 %v1105_v36  ;;  %4903 = vmatpush.xpose.msra.mxu3 %v1107_v38  ;;  %v916_v36 = vld [vmem:[%s6139_s15 + $0x1180] sm:$0xff]  ;;  %v1402_v38 = vld.sshfl [vmem:[#allocation1] sm:$0xff pattern:$0x73625140] }
 0x2c0   : > { %4787 = vmatmul.f32.vlgmr.msrb.gmra.mxu1 %v1387_v14  ;;  %4827 = vmatmul.f32.vlgmr.msrb.gmra.mxu3 %v1389_v16  ;;  %v350_v14 = vld [vmem:[%s6157_s17 + $0x158] sm:$0xff]  ;;  %v915_v16 = vld [vmem:[%s6139_s15 + $0x1178] sm:$0xff]  ;;  %v3949_v25 = vadd.f32 %v3948_v20, %v3929_v18 }
 0x2c1   : > { %1401 = vst [vmem:[#allocation1 + $0x20] ss:$4 sm:$0xff] %v350_v14  ;;  %v724_v14 = vld [vmem:[%s6139_s15 + $0xb80] sm:$0xff] }
 0x2c2   : > { %4844 = vmatpush.xpose.msra.mxu0 %v908_v39  ;;  %4884 = vmatpush.xpose.msra.mxu2 %v910_v40  ;;  %v3969_v30 = vadd.f32 %v3968_v23, %v3949_v25  ;;  %v1404_v40 = vld.sshfl [vmem:[#allocation1 + $0x10] sm:$0xff pattern:$0x73625140]  ;;  %v1122_v25 = vld [vmem:[%s6139_s15 + $0x17f0] sm:$0xff] }
 0x2c3   : > { %4864 = vmatpush.xpose.msra.mxu1 %v909_v46  ;;  %4904 = vmatpush.xpose.msra.mxu3 %v911_v49  ;;  %v919_v46 = vld [vmem:[%s6139_s15 + $0x1198] sm:$0xff]  ;;  %v722_v49 = vld [vmem:[%s6139_s15 + $0xb70] sm:$0xff]  ;;  %v1120_v23 = vld [vmem:[%s6139_s15 + $0x17e0] sm:$0xff] }
 0x2c4   : > { %v3989_v39 = vadd.f32 %v3988_v32, %v3969_v30 }
 0x2c5   : > { %v4008_v35 = vpop.f32.mrf.mxu2 }
 0x2c6   : > { %4845 = vmatpush.xpose.msra.mxu0 %v712_v51  ;;  %4885 = vmatpush.xpose.msra.mxu2 %v714_v53  ;;  %v4009_v45 = vadd.f32 %v4008_v35, %v3989_v39  ;;  %v721_v51 = vld [vmem:[%s6139_s15 + $0xb68] sm:$0xff]  ;;  %v723_v53 = vld [vmem:[%s6139_s15 + $0xb78] sm:$0xff] }
 0x2c7   : > { %4865 = vmatpush.xpose.msra.mxu1 %v713_v54  ;;  %4905 = vmatpush.xpose.msra.mxu3 %v715_v56  ;;  %v524_v54 = vld [vmem:[%s6139_s15 + $0x540] sm:$0xff]  ;;  %v526_v56 = vld [vmem:[%s6139_s15 + $0x550] sm:$0xff]  ;;  %v925_v39 = vld [vmem:[%s6139_s15 + $0x11c8] sm:$0xff] }
 0x2ca   : > { %4846 = vmatpush.xpose.msra.mxu0 %v516_v58  ;;  %4886 = vmatpush.xpose.msra.mxu2 %v518_v59  ;;  %v4068_v58 = vpop.f32.mrf.mxu1  ;;  %v1118_v59 = vld [vmem:[%s6139_s15 + $0x17d0] sm:$0xff] }
 0x2cb   : > { %4866 = vmatpush.xpose.msra.mxu1 %v517_v63  ;;  %4906 = vmatpush.xpose.msra.mxu3 %v519_v1  ;;  %v1117_v63 = vld [vmem:[%s6139_s15 + $0x17c8] sm:$0xff]  ;;  %v1119_v1 = vld [vmem:[%s6139_s15 + $0x17d8] sm:$0xff] }
 0x2cd   : > { %4847 = vmatmul.f32.vlgmr.msra.gmra.mxu0 %v1392_v41  ;;  %4887 = vmatmul.f32.vlgmr.msra.gmra.mxu2 %v1394_v43  ;;  %v1403_v41 = vld.sshfl [vmem:[#allocation1 + $0x8] sm:$0xff pattern:$0x73625140]  ;;  %v1405_v43 = vld.sshfl [vmem:[#allocation1 + $0x18] sm:$0xff pattern:$0x73625140] }
 0x2ce   : > { %4923 = vmatpush.xpose.msrb.mxu0 %v1108_v60  ;;  %4963 = vmatpush.xpose.msrb.mxu2 %v1110_v62  ;;  %v525_v60 = vld [vmem:[%s6139_s15 + $0x548] sm:$0xff]  ;;  %v4088_v62 = vpop.f32.mrf.mxu2 }
 0x2cf   : > { %4943 = vmatpush.xpose.msrb.mxu1 %v1109_v2  ;;  %4983 = vmatpush.xpose.msrb.mxu3 %v1111_v4  ;;  %v920_v2 = vld [vmem:[%s6139_s15 + $0x11a0] sm:$0xff]  ;;  %v1406_v4 = vld.sshfl [vmem:[#allocation1 + $0x20] sm:$0xff pattern:$0x73625140] }
 0x2d0   : > { %4867 = vmatmul.f32.vlgmr.msra.gmra.mxu1 %v1393_v44  ;;  %4907 = vmatmul.f32.vlgmr.msra.gmra.mxu3 %v1395_v47  ;;  %v351_v44 = vld [vmem:[%s6157_s17 + $0x160] sm:$0xff]  ;;  %v4028_v47 = vpop.f32.mrf.mxu3 }
 0x2d1   : > { %1410 = vst [vmem:[#allocation1] ss:$4 sm:$0xff] %v351_v44  ;;  %v4029_v52 = vadd.f32 %v4028_v47, %v4009_v45  ;;  %v728_v44 = vld [vmem:[%s6139_s15 + $0xba0] sm:$0xff] }
 0x2d2   : > { %4924 = vmatpush.xpose.msrb.mxu0 %v912_v6  ;;  %4964 = vmatpush.xpose.msrb.mxu2 %v914_v7  ;;  %v1408_v6 = vld.sshfl [vmem:[#allocation1 + $0x30] sm:$0xff pattern:$0x73625140]  ;;  %v1407_v7 = vld.sshfl [vmem:[#allocation1 + $0x28] sm:$0xff pattern:$0x73625140]  ;;  %v4148_v20 = vpop.f32.mrf.mxu1 }
 0x2d3   : > { %4944 = vmatpush.xpose.msrb.mxu1 %v913_v12  ;;  %4984 = vmatpush.xpose.msrb.mxu3 %v915_v16  ;;  %v4049_v55 = vadd.f32 %v4048_v50, %v4029_v52  ;;  %v923_v12 = vld [vmem:[%s6139_s15 + $0x11b8] sm:$0xff]  ;;  %v726_v16 = vld [vmem:[%s6139_s15 + $0xb90] sm:$0xff] }
 0x2d5   : > { %v4069_v0 = vadd.f32 %v4068_v58, %v4049_v55  ;;  %v1126_v55 = vld [vmem:[%s6139_s15 + $0x1810] sm:$0xff]  ;;  %v535_v58 = vld [vmem:[%s6139_s15 + $0x598] sm:$0xff] }
 0x2d6   : > { %4925 = vmatpush.xpose.msrb.mxu0 %v716_v17  ;;  %4965 = vmatpush.xpose.msrb.mxu2 %v718_v19  ;;  %v725_v17 = vld [vmem:[%s6139_s15 + $0xb88] sm:$0xff]  ;;  %v727_v19 = vld [vmem:[%s6139_s15 + $0xb98] sm:$0xff] }
 0x2d7   : > { %4945 = vmatpush.xpose.msrb.mxu1 %v717_v21  ;;  %4985 = vmatpush.xpose.msrb.mxu3 %v719_v22  ;;  %v4089_v5 = vadd.f32 %v4088_v62, %v4069_v0  ;;  %v528_v21 = vld [vmem:[%s6139_s15 + $0x560] sm:$0xff]  ;;  %v530_v22 = vld [vmem:[%s6139_s15 + $0x570] sm:$0xff] }
 0x2d8   : > { %v1412_v35 = vld.sshfl [vmem:[#allocation1] sm:$0xff pattern:$0x73625140] }
 0x2d9   : > { %v930_v0 = vld [vmem:[%s6139_s15 + $0x11f0] sm:$0xff] }
 0x2da   : > { %4926 = vmatpush.xpose.msrb.mxu0 %v520_v24  ;;  %4966 = vmatpush.xpose.msrb.mxu2 %v522_v26  ;;  %v4168_v24 = vpop.f32.mrf.mxu2  ;;  %v529_v26 = vld [vmem:[%s6139_s15 + $0x568] sm:$0xff]  ;;  %v4228_v47 = vpop.f32.mrf.mxu1 }
 0x2db   : > { %4946 = vmatpush.xpose.msrb.mxu1 %v521_v29  ;;  %4986 = vmatpush.xpose.msrb.mxu3 %v523_v31  ;;  %v1121_v29 = vld [vmem:[%s6139_s15 + $0x17e8] sm:$0xff]  ;;  %v1123_v31 = vld [vmem:[%s6139_s15 + $0x17f8] sm:$0xff] }
 0x2dd   : > { %4927 = vmatmul.f32.vlgmr.msrb.gmra.mxu0 %v1396_v8  ;;  %4967 = vmatmul.f32.vlgmr.msrb.gmra.mxu2 %v1398_v9  ;;  %v4108_v8 = vpop.f32.mrf.mxu3  ;;  %v921_v9 = vld [vmem:[%s6139_s15 + $0x11a8] sm:$0xff] }
 0x2de   : > { %5003 = vmatpush.xpose.msra.mxu0 %v1112_v27  ;;  %5043 = vmatpush.xpose.msra.mxu2 %v1114_v28  ;;  %v4109_v15 = vadd.f32 %v4108_v8, %v4089_v5  ;;  %v531_v28 = vld [vmem:[%s6139_s15 + $0x578] sm:$0xff]  ;;  %v929_v5 = vld [vmem:[%s6139_s15 + $0x11e8] sm:$0xff] }
 0x2df   : > { %5023 = vmatpush.xpose.msra.mxu1 %v1113_v33  ;;  %5063 = vmatpush.xpose.msra.mxu3 %v1115_v34  ;;  %v924_v33 = vld [vmem:[%s6139_s15 + $0x11c0] sm:$0xff]  ;;  %v926_v34 = vld [vmem:[%s6139_s15 + $0x11d0] sm:$0xff] }
 0x2e0   : > { %4947 = vmatmul.f32.vlgmr.msrb.gmra.mxu1 %v1397_v10  ;;  %4987 = vmatmul.f32.vlgmr.msrb.gmra.mxu3 %v1399_v13  ;;  %v1409_v10 = vld.sshfl [vmem:[#allocation1 + $0x38] sm:$0xff pattern:$0x73625140]  ;;  %v4128_v13 = vpop.f32.mrf.mxu0 }
 0x2e1   : > { %1411 = vst [vmem:[#allocation1 + $0x20] ss:$4 sm:$0xff] %v352_v11  ;;  %v4129_v18 = vadd.f32 %v4128_v13, %v4109_v15  ;;  %v732_v11 = vld [vmem:[%s6139_s15 + $0xbc0] sm:$0xff] }
 0x2e2   : > { %5004 = vmatpush.xpose.msra.mxu0 %v916_v36  ;;  %5044 = vmatpush.xpose.msra.mxu2 %v918_v37  ;;  %v1414_v36 = vld.sshfl [vmem:[#allocation1 + $0x10] sm:$0xff pattern:$0x73625140]  ;;  %v1413_v37 = vld.sshfl [vmem:[#allocation1 + $0x8] sm:$0xff pattern:$0x73625140]  ;;  %v4248_v50 = vpop.f32.mrf.mxu2 }
 0x2e3   : > { %5024 = vmatpush.xpose.msra.mxu1 %v917_v42  ;;  %5064 = vmatpush.xpose.msra.mxu3 %v919_v46  ;;  %v4149_v27 = vadd.f32 %v4148_v20, %v4129_v18  ;;  %v730_v46 = vld [vmem:[%s6139_s15 + $0xbb0] sm:$0xff]  ;;  %v1128_v20 = vld [vmem:[%s6139_s15 + $0x1820] sm:$0xff] }
 0x2e5   : > { %v4169_v30 = vadd.f32 %v4168_v24, %v4149_v27  ;;  %v4188_v32 = vpop.f32.mrf.mxu3  ;;  %v539_v24 = vld [vmem:[%s6139_s15 + $0x5b8] sm:$0xff] }
 0x2e6   : > { %5005 = vmatpush.xpose.msra.mxu0 %v720_v48  ;;  %5045 = vmatpush.xpose.msra.mxu2 %v722_v49  ;;  %v729_v48 = vld [vmem:[%s6139_s15 + $0xba8] sm:$0xff]  ;;  %v731_v49 = vld [vmem:[%s6139_s15 + $0xbb8] sm:$0xff] }
 0x2e7   : > { %5025 = vmatpush.xpose.msra.mxu1 %v721_v51  ;;  %5065 = vmatpush.xpose.msra.mxu3 %v723_v53  ;;  %v4189_v42 = vadd.f32 %v4188_v32, %v4169_v30  ;;  %v532_v51 = vld [vmem:[%s6139_s15 + $0x580] sm:$0xff]  ;;  %v534_v53 = vld [vmem:[%s6139_s15 + $0x590] sm:$0xff] }
 0x2e8   : > { %v934_v30 = vld [vmem:[%s6139_s15 + $0x1210] sm:$0xff] }
 0x2ea   : > { %5006 = vmatpush.xpose.msra.mxu0 %v524_v54  ;;  %5046 = vmatpush.xpose.msra.mxu2 %v526_v56  ;;  %v1124_v54 = vld [vmem:[%s6139_s15 + $0x1800] sm:$0xff]  ;;  %v533_v56 = vld [vmem:[%s6139_s15 + $0x588] sm:$0xff]  ;;  %v4328_v13 = vpop.f32.mrf.mxu2 }
 0x2eb   : > { %5026 = vmatpush.xpose.msra.mxu1 %v525_v60  ;;  %5066 = vmatpush.xpose.msra.mxu3 %v527_v61  ;;  %v1125_v60 = vld [vmem:[%s6139_s15 + $0x1808] sm:$0xff]  ;;  %v1127_v61 = vld [vmem:[%s6139_s15 + $0x1818] sm:$0xff] }
 0x2ed   : > { %5007 = vmatmul.f32.vlgmr.msra.gmra.mxu0 %v1402_v38  ;;  %5047 = vmatmul.f32.vlgmr.msra.gmra.mxu2 %v1404_v40  ;;  %v4208_v38 = vpop.f32.mrf.mxu0  ;;  %v1415_v40 = vld.sshfl [vmem:[#allocation1 + $0x18] sm:$0xff pattern:$0x73625140] }
 0x2ee   : > { %5083 = vmatpush.xpose.msrb.mxu0 %v1116_v57  ;;  %5123 = vmatpush.xpose.msrb.mxu2 %v1118_v59  ;;  %v4209_v45 = vadd.f32 %v4208_v38, %v4189_v42  ;;  %v4268_v59 = vpop.f32.mrf.mxu3  ;;  %v355_v38 = vld [vmem:[%s6157_s17 + $0x180] sm:$0xff] }
 0x2ef   : > { %5103 = vmatpush.xpose.msrb.mxu1 %v1117_v63  ;;  %5143 = vmatpush.xpose.msrb.mxu3 %v1119_v1  ;;  %v928_v63 = vld [vmem:[%s6139_s15 + $0x11e0] sm:$0xff]  ;;  %v1416_v1 = vld.sshfl [vmem:[#allocation1 + $0x20] sm:$0xff pattern:$0x73625140] }
 0x2f0   : > { %5027 = vmatmul.f32.vlgmr.msra.gmra.mxu1 %v1403_v41  ;;  %5067 = vmatmul.f32.vlgmr.msra.gmra.mxu3 %v1405_v43  ;;  %v353_v41 = vld [vmem:[%s6157_s17 + $0x170] sm:$0xff]  ;;  %v927_v43 = vld [vmem:[%s6139_s15 + $0x11d8] sm:$0xff]  ;;  %v4229_v52 = vadd.f32 %v4228_v47, %v4209_v45 }
 0x2f1   : > { %1420 = vst [vmem:[#allocation1] ss:$4 sm:$0xff] %v353_v41  ;;  %v736_v41 = vld [vmem:[%s6139_s15 + $0xbe0] sm:$0xff] }
 0x2f2   : > { %5084 = vmatpush.xpose.msrb.mxu0 %v920_v2  ;;  %5124 = vmatpush.xpose.msrb.mxu2 %v922_v3  ;;  %v4249_v57 = vadd.f32 %v4248_v50, %v4229_v52  ;;  %v1418_v3 = vld.sshfl [vmem:[#allocation1 + $0x30] sm:$0xff pattern:$0x73625140]  ;;  %v1134_v52 = vld [vmem:[%s6139_s15 + $0x1850] sm:$0xff] }
 0x2f3   : > { %5104 = vmatpush.xpose.msrb.mxu1 %v921_v9  ;;  %5144 = vmatpush.xpose.msrb.mxu3 %v923_v12  ;;  %v931_v9 = vld [vmem:[%s6139_s15 + $0x11f8] sm:$0xff]  ;;  %v734_v12 = vld [vmem:[%s6139_s15 + $0xbd0] sm:$0xff]  ;;  %v1132_v50 = vld [vmem:[%s6139_s15 + $0x1840] sm:$0xff] }
 0x2f4   : > { %v4269_v2 = vadd.f32 %v4268_v59, %v4249_v57 }
 0x2f5   : > { %v4288_v62 = vpop.f32.mrf.mxu0 }
 0x2f6   : > { %5085 = vmatpush.xpose.msrb.mxu0 %v724_v14  ;;  %5125 = vmatpush.xpose.msrb.mxu2 %v726_v16  ;;  %v4289_v8 = vadd.f32 %v4288_v62, %v4269_v2  ;;  %v733_v14 = vld [vmem:[%s6139_s15 + $0xbc8] sm:$0xff]  ;;  %v735_v16 = vld [vmem:[%s6139_s15 + $0xbd8] sm:$0xff]  ;;  %v740_v2 = vld [vmem:[%s6139_s15 + $0xc00] sm:$0xff] }
 0x2f7   : > { %5105 = vmatpush.xpose.msrb.mxu1 %v725_v17  ;;  %5145 = vmatpush.xpose.msrb.mxu3 %v727_v19  ;;  %v536_v17 = vld [vmem:[%s6139_s15 + $0x5a0] sm:$0xff]  ;;  %v538_v19 = vld [vmem:[%s6139_s15 + $0x5b0] sm:$0xff] }
 0x2fa   : > { %5086 = vmatpush.xpose.msrb.mxu0 %v528_v21  ;;  %5126 = vmatpush.xpose.msrb.mxu2 %v530_v22  ;;  %v4348_v21 = vpop.f32.mrf.mxu3  ;;  %v1130_v22 = vld [vmem:[%s6139_s15 + $0x1830] sm:$0xff] }
 0x2fb   : > { %5106 = vmatpush.xpose.msrb.mxu1 %v529_v26  ;;  %5146 = vmatpush.xpose.msrb.mxu3 %v531_v28  ;;  %v1129_v26 = vld [vmem:[%s6139_s15 + $0x1828] sm:$0xff]  ;;  %v1131_v28 = vld [vmem:[%s6139_s15 + $0x1838] sm:$0xff] }
 0x2fd   : > { %5087 = vmatmul.f32.vlgmr.msrb.gmra.mxu0 %v1406_v4  ;;  %5127 = vmatmul.f32.vlgmr.msrb.gmra.mxu2 %v1408_v6  ;;  %v1417_v4 = vld.sshfl [vmem:[#allocation1 + $0x28] sm:$0xff pattern:$0x73625140]  ;;  %v1419_v6 = vld.sshfl [vmem:[#allocation1 + $0x38] sm:$0xff pattern:$0x73625140] }
 0x2fe   : > { %5163 = vmatpush.xpose.msra.mxu0 %v1120_v23  ;;  %5203 = vmatpush.xpose.msra.mxu2 %v1122_v25  ;;  %v537_v23 = vld [vmem:[%s6139_s15 + $0x5a8] sm:$0xff]  ;;  %v4368_v25 = vpop.f32.mrf.mxu0 }
 0x2ff   : > { %5183 = vmatpush.xpose.msra.mxu1 %v1121_v29  ;;  %5223 = vmatpush.xpose.msra.mxu3 %v1123_v31  ;;  %v932_v29 = vld [vmem:[%s6139_s15 + $0x1200] sm:$0xff]  ;;  %v1422_v31 = vld.sshfl [vmem:[#allocation1] sm:$0xff pattern:$0x73625140] }
 0x300   : > { %5107 = vmatmul.f32.vlgmr.msrb.gmra.mxu1 %v1407_v7  ;;  %5147 = vmatmul.f32.vlgmr.msrb.gmra.mxu3 %v1409_v10  ;;  %v354_v7 = vld [vmem:[%s6157_s17 + $0x178] sm:$0xff]  ;;  %v4308_v10 = vpop.f32.mrf.mxu1 }
 0x301   : > { %1421 = vst [vmem:[#allocation1 + $0x20] ss:$4 sm:$0xff] %v354_v7  ;;  %v4309_v15 = vadd.f32 %v4308_v10, %v4289_v8  ;;  %v743_v7 = vld [vmem:[%s6139_s15 + $0xc18] sm:$0xff] }
 0x302   : > { %5164 = vmatpush.xpose.msra.mxu0 %v924_v33  ;;  %5204 = vmatpush.xpose.msra.mxu2 %v926_v34  ;;  %v1424_v33 = vld.sshfl [vmem:[#allocation1 + $0x10] sm:$0xff pattern:$0x73625140]  ;;  %v1423_v34 = vld.sshfl [vmem:[#allocation1 + $0x8] sm:$0xff pattern:$0x73625140]  ;;  %v4428_v47 = vpop.f32.mrf.mxu3 }
 0x303   : > { %5184 = vmatpush.xpose.msra.mxu1 %v925_v39  ;;  %5224 = vmatpush.xpose.msra.mxu3 %v927_v43  ;;  %v4329_v18 = vadd.f32 %v4328_v13, %v4309_v15  ;;  %v935_v39 = vld [vmem:[%s6139_s15 + $0x1218] sm:$0xff]  ;;  %v738_v43 = vld [vmem:[%s6139_s15 + $0xbf0] sm:$0xff] }
 0x304   : > { %v1138_v13 = vld [vmem:[%s6139_s15 + $0x1870] sm:$0xff] }
 0x305   : > { %v4349_v27 = vadd.f32 %v4348_v21, %v4329_v18  ;;  %v1139_v21 = vld [vmem:[%s6139_s15 + $0x1878] sm:$0xff] }
 0x306   : > { %5165 = vmatpush.xpose.msra.mxu0 %v728_v44  ;;  %5205 = vmatpush.xpose.msra.mxu2 %v730_v46  ;;  %v737_v44 = vld [vmem:[%s6139_s15 + $0xbe8] sm:$0xff]  ;;  %v739_v46 = vld [vmem:[%s6139_s15 + $0xbf8] sm:$0xff] }
 0x307   : > { %5185 = vmatpush.xpose.msra.mxu1 %v729_v48  ;;  %5225 = vmatpush.xpose.msra.mxu3 %v731_v49  ;;  %v4369_v32 = vadd.f32 %v4368_v25, %v4349_v27  ;;  %v540_v48 = vld [vmem:[%s6139_s15 + $0x5c0] sm:$0xff]  ;;  %v542_v49 = vld [vmem:[%s6139_s15 + $0x5d0] sm:$0xff] }
 0x308   : > { %v940_v25 = vld [vmem:[%s6139_s15 + $0x1240] sm:$0xff]  ;;  %v942_v27 = vld [vmem:[%s6139_s15 + $0x1250] sm:$0xff] }
 0x30a   : > { %5166 = vmatpush.xpose.msra.mxu0 %v532_v51  ;;  %5206 = vmatpush.xpose.msra.mxu2 %v534_v53  ;;  %v4448_v51 = vpop.f32.mrf.mxu0  ;;  %v541_v53 = vld [vmem:[%s6139_s15 + $0x5c8] sm:$0xff] }
 0x30b   : > { %5186 = vmatpush.xpose.msra.mxu1 %v533_v56  ;;  %5226 = vmatpush.xpose.msra.mxu3 %v535_v58  ;;  %v1133_v56 = vld [vmem:[%s6139_s15 + $0x1848] sm:$0xff]  ;;  %v1135_v58 = vld [vmem:[%s6139_s15 + $0x1858] sm:$0xff] }
 0x30d   : > { %5167 = vmatmul.f32.vlgmr.msra.gmra.mxu0 %v1412_v35  ;;  %5207 = vmatmul.f32.vlgmr.msra.gmra.mxu2 %v1414_v36  ;;  %v4388_v35 = vpop.f32.mrf.mxu1  ;;  %v933_v36 = vld [vmem:[%s6139_s15 + $0x1208] sm:$0xff] }
 0x30e   : > { %5243 = vmatpush.xpose.msrb.mxu0 %v1124_v54  ;;  %5283 = vmatpush.xpose.msrb.mxu2 %v1126_v55  ;;  %v4389_v42 = vadd.f32 %v4388_v35, %v4369_v32  ;;  %v543_v55 = vld [vmem:[%s6139_s15 + $0x5d8] sm:$0xff]  ;;  %v744_v32 = vld [vmem:[%s6139_s15 + $0xc20] sm:$0xff]  ;;  %v745_v35 = vld [vmem:[%s6139_s15 + $0xc28] sm:$0xff] }
 0x30f   : > { %5263 = vmatpush.xpose.msrb.mxu1 %v1125_v60  ;;  %5303 = vmatpush.xpose.msrb.mxu3 %v1127_v61  ;;  %v936_v60 = vld [vmem:[%s6139_s15 + $0x1220] sm:$0xff]  ;;  %v938_v61 = vld [vmem:[%s6139_s15 + $0x1230] sm:$0xff] }
 0x310   : > { %5187 = vmatmul.f32.vlgmr.msra.gmra.mxu1 %v1413_v37  ;;  %5227 = vmatmul.f32.vlgmr.msra.gmra.mxu3 %v1415_v40  ;;  %v1425_v37 = vld.sshfl [vmem:[#allocation1 + $0x18] sm:$0xff pattern:$0x73625140]  ;;  %v4408_v40 = vpop.f32.mrf.mxu2 }
 0x311   : > { %1430 = vst [vmem:[#allocation1] ss:$4 sm:$0xff] %v355_v38  ;;  %v4409_v45 = vadd.f32 %v4408_v40, %v4389_v42  ;;  %v548_v38 = vld [vmem:[%s6139_s15 + $0x600] sm:$0xff]  ;;  %v550_v40 = vld [vmem:[%s6139_s15 + $0x610] sm:$0xff]  ;;  %v549_v42 = vld [vmem:[%s6139_s15 + $0x608] sm:$0xff] }
 0x312   : > { %5244 = vmatpush.xpose.msrb.mxu0 %v928_v63  ;;  %5284 = vmatpush.xpose.msrb.mxu2 %v930_v0  ;;  %v937_v63 = vld [vmem:[%s6139_s15 + $0x1228] sm:$0xff]  ;;  %v4528_v8 = vpop.f32.mrf.mxu0 }
 0x313   : > { %5264 = vmatpush.xpose.msrb.mxu1 %v929_v5  ;;  %5304 = vmatpush.xpose.msrb.mxu3 %v931_v9  ;;  %v4429_v54 = vadd.f32 %v4428_v47, %v4409_v45  ;;  %v4508_v5 = vpop.f32.mrf.mxu3  ;;  %v544_v9 = vld [vmem:[%s6139_s15 + $0x5e0] sm:$0xff] }
 0x315   : > { %v4449_v57 = vadd.f32 %v4448_v51, %v4429_v54  ;;  %v4468_v59 = vpop.f32.mrf.mxu1 }
 0x316   : > { %5245 = vmatpush.xpose.msrb.mxu0 %v732_v11  ;;  %5285 = vmatpush.xpose.msrb.mxu2 %v734_v12  ;;  %v546_v11 = vld [vmem:[%s6139_s15 + $0x5f0] sm:$0xff]  ;;  %v1136_v12 = vld [vmem:[%s6139_s15 + $0x1860] sm:$0xff] }
 0x317   : > { %5265 = vmatpush.xpose.msrb.mxu1 %v733_v14  ;;  %5305 = vmatpush.xpose.msrb.mxu3 %v735_v16  ;;  %v4469_v0 = vadd.f32 %v4468_v59, %v4449_v57  ;;  %v545_v14 = vld [vmem:[%s6139_s15 + $0x5e8] sm:$0xff]  ;;  %v547_v16 = vld [vmem:[%s6139_s15 + $0x5f8] sm:$0xff] }
 0x318   : > { %v4488_v62 = vpop.f32.mrf.mxu2 }
 0x31a   : > { %5246 = vmatpush.xpose.msrb.mxu0 %v536_v17  ;;  %5286 = vmatpush.xpose.msrb.mxu2 %v538_v19  ;;  %v1426_v17 = vld.sshfl [vmem:[#allocation1 + $0x20] sm:$0xff pattern:$0x73625140]  ;;  %v1428_v19 = vld.sshfl [vmem:[#allocation1 + $0x30] sm:$0xff pattern:$0x73625140] }
 0x31b   : > { %5266 = vmatpush.xpose.msrb.mxu1 %v537_v23  ;;  %5306 = vmatpush.xpose.msrb.mxu3 %v539_v24  ;;  %v1429_v24 = vld.sshfl [vmem:[#allocation1 + $0x38] sm:$0xff pattern:$0x73625140] }
 0x31d   : > { %5247 = vmatmul.f32.vlgmr.msrb.gmra.mxu0 %v1416_v1  ;;  %5287 = vmatmul.f32.vlgmr.msrb.gmra.mxu2 %v1418_v3  ;;  %v939_v1 = vld [vmem:[%s6139_s15 + $0x1238] sm:$0xff]  ;;  %v4489_v3 = vadd.f32 %v4488_v62, %v4469_v0  ;;  %v4548_v18 = vpop.f32.mrf.mxu1 }
 0x31e   : > { %5323 = vmatpush.xpose.msra.mxu0 %v1128_v20  ;;  %5363 = vmatpush.xpose.msra.mxu2 %v1130_v22  ;;  %v1137_v20 = vld [vmem:[%s6139_s15 + $0x1868] sm:$0xff]  ;;  %v1427_v22 = vld.sshfl [vmem:[#allocation1 + $0x28] sm:$0xff pattern:$0x73625140] }
 0x31f   : > { %5343 = vmatpush.xpose.msra.mxu1 %v1129_v26  ;;  %5383 = vmatpush.xpose.msra.mxu3 %v1131_v28  ;;  %v4509_v10 = vadd.f32 %v4508_v5, %v4489_v3  ;;  %v941_v28 = vld [vmem:[%s6139_s15 + $0x1248] sm:$0xff] }
 0x320   : > { %5267 = vmatmul.f32.vlgmr.msrb.gmra.mxu1 %v1417_v4  ;;  %5307 = vmatmul.f32.vlgmr.msrb.gmra.mxu3 %v1419_v6  ;;  %v742_v4 = vld [vmem:[%s6139_s15 + $0xc10] sm:$0xff]  ;;  %v741_v6 = vld [vmem:[%s6139_s15 + $0xc08] sm:$0xff]  ;;  %v4568_v23 = vpop.f32.mrf.mxu2 }
 0x321   : > { %v4529_v15 = vadd.f32 %v4528_v8, %v4509_v10 }
 0x322   : > { %5324 = vmatpush.xpose.msra.mxu0 %v932_v29  ;;  %5364 = vmatpush.xpose.msra.mxu2 %v934_v30  ;;  %v943_v30 = vld [vmem:[%s6139_s15 + $0x1258] sm:$0xff] }
 0x323   : > { %5344 = vmatpush.xpose.msra.mxu1 %v933_v36  ;;  %5384 = vmatpush.xpose.msra.mxu3 %v935_v39  ;;  %v4549_v26 = vadd.f32 %v4548_v18, %v4529_v15 }
 0x325   : > { %v4569_v29 = vadd.f32 %v4568_v23, %v4549_v26 }
 0x326   : > { %5325 = vmatpush.xpose.msra.mxu0 %v736_v41  ;;  %5365 = vmatpush.xpose.msra.mxu2 %v738_v43  ;;  %v4628_v41 = vpop.f32.mrf.mxu1  ;;  %v551_v43 = vld [vmem:[%s6139_s15 + $0x618] sm:$0xff] }
 0x327   : > { %5345 = vmatpush.xpose.msra.mxu1 %v737_v44  ;;  %5385 = vmatpush.xpose.msra.mxu3 %v739_v46  ;;  %v1431_v44 = vld.sshfl [vmem:[#allocation1] sm:$0xff pattern:$0x73625140]  ;;  %v1433_v46 = vld.sshfl [vmem:[#allocation1 + $0x10] sm:$0xff pattern:$0x73625140] }
 0x328   : > { %v4648_v45 = vpop.f32.mrf.mxu2 }
 0x32a   : > { %5326 = vmatpush.xpose.msra.mxu0 %v540_v48  ;;  %5366 = vmatpush.xpose.msra.mxu2 %v542_v49  ;;  %v1432_v48 = vld.sshfl [vmem:[#allocation1 + $0x8] sm:$0xff pattern:$0x73625140]  ;;  %v1434_v49 = vld.sshfl [vmem:[#allocation1 + $0x18] sm:$0xff pattern:$0x73625140] }
 0x32b   : > { %5346 = vmatpush.xpose.msra.mxu1 %v541_v53  ;;  %5386 = vmatpush.xpose.msra.mxu3 %v543_v55 }
 0x32d   : > { %5327 = vmatmul.f32.vlgmr.msra.gmra.mxu0 %v1422_v31  ;;  %5367 = vmatmul.f32.vlgmr.msra.gmra.mxu2 %v1424_v33  ;;  %v4588_v31 = vpop.f32.mrf.mxu3  ;;  %v746_v33 = vld [vmem:[%s6139_s15 + $0xc30] sm:$0xff] }
 0x32e   : > { %5403 = vmatpush.xpose.msrb.mxu0 %v1132_v50  ;;  %5443 = vmatpush.xpose.msrb.mxu2 %v1134_v52  ;;  %v4589_v36 = vadd.f32 %v4588_v31, %v4569_v29  ;;  %v4708_v55 = vpop.f32.mrf.mxu1 }
 0x32f   : > { %5423 = vmatpush.xpose.msrb.mxu1 %v1133_v56  ;;  %5463 = vmatpush.xpose.msrb.mxu3 %v1135_v58 }
 0x330   : > { %5347 = vmatmul.f32.vlgmr.msra.gmra.mxu1 %v1423_v34  ;;  %5387 = vmatmul.f32.vlgmr.msra.gmra.mxu3 %v1425_v37  ;;  %v4608_v34 = vpop.f32.mrf.mxu0  ;;  %v747_v37 = vld [vmem:[%s6139_s15 + $0xc38] sm:$0xff]  ;;  %v4728_v56 = vpop.f32.mrf.mxu2 }
 0x331   : > { %v4609_v39 = vadd.f32 %v4608_v34, %v4589_v36 }
 0x332   : > { %5404 = vmatpush.xpose.msrb.mxu0 %v936_v60  ;;  %5444 = vmatpush.xpose.msrb.mxu2 %v938_v61 }
 0x333   : > { %5424 = vmatpush.xpose.msrb.mxu1 %v937_v63  ;;  %5464 = vmatpush.xpose.msrb.mxu3 %v939_v1  ;;  %v4629_v47 = vadd.f32 %v4628_v41, %v4609_v39 }
 0x335   : > { %v4649_v50 = vadd.f32 %v4648_v45, %v4629_v47  ;;  %v4668_v51 = vpop.f32.mrf.mxu3 }
 0x336   : > { %5405 = vmatpush.xpose.msrb.mxu0 %v740_v2  ;;  %5445 = vmatpush.xpose.msrb.mxu2 %v742_v4 }
 0x337   : > { %5425 = vmatpush.xpose.msrb.mxu1 %v741_v6  ;;  %5465 = vmatpush.xpose.msrb.mxu3 %v743_v7  ;;  %v4669_v53 = vadd.f32 %v4668_v51, %v4649_v50 }
 0x338   : > { %v4688_v52 = vpop.f32.mrf.mxu0 }
 0x339   : > { %v4689_v54 = vadd.f32 %v4688_v52, %v4669_v53 }
 0x33a   : > { %5406 = vmatpush.xpose.msrb.mxu0 %v544_v9  ;;  %5446 = vmatpush.xpose.msrb.mxu2 %v546_v11 }
 0x33b   : > { %5426 = vmatpush.xpose.msrb.mxu1 %v545_v14  ;;  %5466 = vmatpush.xpose.msrb.mxu3 %v547_v16  ;;  %v4709_v57 = vadd.f32 %v4708_v55, %v4689_v54 }
 0x33d   : > { %5407 = vmatmul.f32.vlgmr.msrb.gmra.mxu0 %v1426_v17  ;;  %5447 = vmatmul.f32.vlgmr.msrb.gmra.mxu2 %v1428_v19  ;;  %v4729_v58 = vadd.f32 %v4728_v56, %v4709_v57  ;;  %v4748_v59 = vpop.f32.mrf.mxu3  ;;  %v4788_v63 = vpop.f32.mrf.mxu1 }
 0x33e   : > { %5483 = vmatpush.xpose.msra.mxu0 %v1136_v12  ;;  %5523 = vmatpush.xpose.msra.mxu2 %v1138_v13 }
 0x33f   : > { %5503 = vmatpush.xpose.msra.mxu1 %v1137_v20  ;;  %5543 = vmatpush.xpose.msra.mxu3 %v1139_v21  ;;  %v4749_v61 = vadd.f32 %v4748_v59, %v4729_v58 }
 0x340   : > { %5427 = vmatmul.f32.vlgmr.msrb.gmra.mxu1 %v1427_v22  ;;  %5467 = vmatmul.f32.vlgmr.msrb.gmra.mxu3 %v1429_v24  ;;  %v4768_v60 = vpop.f32.mrf.mxu0  ;;  %v4808_v0 = vpop.f32.mrf.mxu2 }
 0x341   : > { %v4769_v62 = vadd.f32 %v4768_v60, %v4749_v61 }
 0x342   : > { %5484 = vmatpush.xpose.msra.mxu0 %v940_v25  ;;  %5524 = vmatpush.xpose.msra.mxu2 %v942_v27 }
 0x343   : > { %5504 = vmatpush.xpose.msra.mxu1 %v941_v28  ;;  %5544 = vmatpush.xpose.msra.mxu3 %v943_v30  ;;  %v4789_v1 = vadd.f32 %v4788_v63, %v4769_v62 }
 0x345   : > { %v4809_v2 = vadd.f32 %v4808_v0, %v4789_v1  ;;  %v4828_v3 = vpop.f32.mrf.mxu3 }
 0x346   : > { %5485 = vmatpush.xpose.msra.mxu0 %v744_v32  ;;  %5525 = vmatpush.xpose.msra.mxu2 %v746_v33 }
 0x347   : > { %5505 = vmatpush.xpose.msra.mxu1 %v745_v35  ;;  %5545 = vmatpush.xpose.msra.mxu3 %v747_v37  ;;  %v4829_v5 = vadd.f32 %v4828_v3, %v4809_v2 }
 0x34a   : > { %5486 = vmatpush.xpose.msra.mxu0 %v548_v38  ;;  %5526 = vmatpush.xpose.msra.mxu2 %v550_v40  ;;  %v4848_v4 = vpop.f32.mrf.mxu0 }
 0x34b   : > { %5506 = vmatpush.xpose.msra.mxu1 %v549_v42  ;;  %5546 = vmatpush.xpose.msra.mxu3 %v551_v43  ;;  %v4849_v6 = vadd.f32 %v4848_v4, %v4829_v5 }
 0x34d   : > { %5487 = vmatmul.f32.vlgmr.msra.gmra.mxu0 %v1431_v44  ;;  %5527 = vmatmul.f32.vlgmr.msra.gmra.mxu2 %v1433_v46  ;;  %v4868_v7 = vpop.f32.mrf.mxu1 }
 0x34e   : > { %5507 = vmatmul.f32.vlgmr.msra.gmra.mxu1 %v1432_v48  ;;  %5547 = vmatmul.f32.vlgmr.msra.gmra.mxu3 %v1434_v49  ;;  %v4869_v9 = vadd.f32 %v4868_v7, %v4849_v6 }
 0x350   : > { %v4888_v8 = vpop.f32.mrf.mxu2 }
 0x351   : > { %v4889_v10 = vadd.f32 %v4888_v8, %v4869_v9 }
 0x353   : > { %v4908_v11 = vpop.f32.mrf.mxu3 }
 0x354   : > { %v4909_v13 = vadd.f32 %v4908_v11, %v4889_v10  ;;  %v306_v11 = vld [vmem:[#allocation2] sm:$0x3] }
 0x35a   : > { %v4928_v12 = vpop.f32.mrf.mxu0 }
 0x35b   : > { %v4929_v14 = vadd.f32 %v4928_v12, %v4909_v13 }
 0x35d   : > { %v4948_v15 = vpop.f32.mrf.mxu1 }
 0x35e   : > { %v4949_v17 = vadd.f32 %v4948_v15, %v4929_v14 }
 0x360   : > { %v4968_v16 = vpop.f32.mrf.mxu2 }
 0x361   : > { %v4969_v18 = vadd.f32 %v4968_v16, %v4949_v17 }
 0x363   : > { %v4988_v19 = vpop.f32.mrf.mxu3 }
 0x364   : > { %v4989_v21 = vadd.f32 %v4988_v19, %v4969_v18 }
 0x36a   : > { %v5008_v20 = vpop.f32.mrf.mxu0 }
 0x36b   : > { %v5009_v22 = vadd.f32 %v5008_v20, %v4989_v21 }
 0x36d   : > { %v5028_v23 = vpop.f32.mrf.mxu1 }
 0x36e   : > { %v5029_v25 = vadd.f32 %v5028_v23, %v5009_v22 }
 0x370   : > { %v5048_v24 = vpop.f32.mrf.mxu2 }
 0x371   : > { %v5049_v26 = vadd.f32 %v5048_v24, %v5029_v25 }
 0x373   : > { %v5068_v27 = vpop.f32.mrf.mxu3 }
 0x374   : > { %v5069_v29 = vadd.f32 %v5068_v27, %v5049_v26 }
 0x37a   : > { %v5088_v28 = vpop.f32.mrf.mxu0 }
 0x37b   : > { %v5089_v30 = vadd.f32 %v5088_v28, %v5069_v29 }
 0x37d   : > { %v5108_v31 = vpop.f32.mrf.mxu1 }
 0x37e   : > { %v5109_v33 = vadd.f32 %v5108_v31, %v5089_v30 }
 0x380   : > { %v5128_v32 = vpop.f32.mrf.mxu2 }
 0x381   : > { %v5129_v34 = vadd.f32 %v5128_v32, %v5109_v33 }
 0x383   : > { %v5148_v35 = vpop.f32.mrf.mxu3 }
 0x384   : > { %v5149_v37 = vadd.f32 %v5148_v35, %v5129_v34 }
 0x38a   : > { %v5168_v36 = vpop.f32.mrf.mxu0 }
 0x38b   : > { %v5169_v38 = vadd.f32 %v5168_v36, %v5149_v37 }
 0x38d   : > { %v5188_v39 = vpop.f32.mrf.mxu1 }
 0x38e   : > { %v5189_v41 = vadd.f32 %v5188_v39, %v5169_v38 }
 0x390   : > { %v5208_v40 = vpop.f32.mrf.mxu2 }
 0x391   : > { %v5209_v42 = vadd.f32 %v5208_v40, %v5189_v41 }
 0x393   : > { %v5228_v43 = vpop.f32.mrf.mxu3 }
 0x394   : > { %v5229_v45 = vadd.f32 %v5228_v43, %v5209_v42 }
 0x39a   : > { %v5248_v44 = vpop.f32.mrf.mxu0 }
 0x39b   : > { %v5249_v46 = vadd.f32 %v5248_v44, %v5229_v45 }
 0x39d   : > { %v5268_v47 = vpop.f32.mrf.mxu1 }
 0x39e   : > { %v5269_v49 = vadd.f32 %v5268_v47, %v5249_v46 }
 0x3a0   : > { %v5288_v48 = vpop.f32.mrf.mxu2 }
 0x3a1   : > { %v5289_v50 = vadd.f32 %v5288_v48, %v5269_v49 }
 0x3a3   : > { %v5308_v51 = vpop.f32.mrf.mxu3 }
 0x3a4   : > { %v5309_v53 = vadd.f32 %v5308_v51, %v5289_v50 }
 0x3aa   : > { %v5328_v52 = vpop.f32.mrf.mxu0 }
 0x3ab   : > { %v5329_v54 = vadd.f32 %v5328_v52, %v5309_v53 }
 0x3ad   : > { %v5348_v55 = vpop.f32.mrf.mxu1 }
 0x3ae   : > { %v5349_v57 = vadd.f32 %v5348_v55, %v5329_v54 }
 0x3b0   : > { %v5368_v56 = vpop.f32.mrf.mxu2 }
 0x3b1   : > { %v5369_v58 = vadd.f32 %v5368_v56, %v5349_v57 }
 0x3b3   : > { %v5388_v59 = vpop.f32.mrf.mxu3 }
 0x3b4   : > { %v5389_v61 = vadd.f32 %v5388_v59, %v5369_v58 }
 0x3ba   : > { %v5408_v60 = vpop.f32.mrf.mxu0 }
 0x3bb   : > { %v5409_v62 = vadd.f32 %v5408_v60, %v5389_v61 }
 0x3bd   : > { %v5428_v63 = vpop.f32.mrf.mxu1 }
 0x3be   : > { %v5429_v1 = vadd.f32 %v5428_v63, %v5409_v62 }
 0x3c0   : > { %v5448_v0 = vpop.f32.mrf.mxu2 }
 0x3c1   : > { %v5449_v2 = vadd.f32 %v5448_v0, %v5429_v1 }
 0x3c3   : > { %v5468_v3 = vpop.f32.mrf.mxu3 }
 0x3c4   : > { %v5469_v4 = vadd.f32 %v5468_v3, %v5449_v2 }
 0x3ca   : > { %v5488_v5 = vpop.f32.mrf.mxu0 }
 0x3cb   : > { %v5489_v6 = vadd.f32 %v5488_v5, %v5469_v4  ;;  %v5508_v7 = vpop.f32.mrf.mxu1 }
 0x3cd   : > { %v5509_v8 = vadd.f32 %v5508_v7, %v5489_v6 }
 0x3d0   : > { %v5528_v9 = vpop.f32.mrf.mxu2 }
 0x3d1   : > { %v5529_v10 = vadd.f32 %v5528_v9, %v5509_v8  ;;  %v5548_v12 = vpop.f32.mrf.mxu3 }
 0x3d3   : > { %v5549_v13 = vadd.f32 %v5548_v12, %v5529_v10  ;;  %5557 = sbr.rel (%p5712_p5) target bundleno = 1124 (0x464), region = 64 }
 0x3d5   : > { %v5551_v14 = vadd.f32 %v5549_v13, %v306_v11 }
 0x3d7   : > { %5553 = vst.msk [vmem:[#allocation2] sm:$0x3] %vm5552_vm1, %v5551_v14 }
 0x3d8   : > { %v5565_v15 = vld [vmem:[#allocation8] sm:$0xf]  ;;  %vm5570_vm2 = vcmask 261120   ;;  %v5803_v17 = vld [vmem:[#allocation6] ss:$0 sm:$0xff]  ;;  %vm5597_vm3 = vcmask 25600  }
 0x3d9   : > { %5713 = vmatpush.xpose.msk.msra.mxu0 %vm5570_vm2, %v5565_v15  ;;  %v5804_v20 = vld [vmem:[#allocation9] ss:$0 sm:$0xff] }
 0x3de   : > { %v5558_v16 = vld [vmem:[#allocation2] sm:$0x3] }
 0x3df   : > { %v5563_v18 = vadd.f32 %v5803_v17, %v5558_v16 }
 0x3e1   : > { %v5564_v19 = vmax.f32 %v5563_v18, 0.0 }
 0x3e3   : > { %5714 = vmatmul.msk.f32.vlgmr.msra.gmra.mxu0 %vm5570_vm2, %v5564_v19 }
 0x460   : > { %v5594_v21 = vpop.f32.mrf.mxu0 }
 0x461   : > { %v5595_v22 = vadd.f32 %v5804_v20, %v5594_v21 }
 0x463   : > { %5598 = vst.msk [vmem:[#allocation11] sm:$0x3] %vm5597_vm3, %v5595_v22 }
 0x464 PF: > { %p5761_p8 = scmp.eq.s32.totalorder %s6058_s22, 1  ;;  %s6008_s18 = smov [#allocation11]  }
 0x465   : > { %s5605_s13 = sshll.u32 %s6008_s18, 4  ;;  %s5607_s21 = sshll.u32 %s7017_s5, 4  ;;  %s5606_s13 = int_to_ptr.vmem [resolvable:$true] %s5605_s13  ;;  %s5608_s21 = int_to_ptr.hbm [resolvable:$true] %s5607_s21 }
 0x466   : > { %5737 = dma.vmem_to_hbm [thread:$0]  (%p5761_p8), %s5606_s13, 32, %s5608_s21, [#allocation5]  }
 0x467   : > { %5982 = dma.done.wait (%p5761_p8), [#allocation5], 32  }
 0x468   : > { %5984 = vsyncadd (%p5761_p8), [#allocation5], 4294967264 }
 0x469 PF: > { %p18_p9 = scmp.ge.s32.totalorder %s6061_s23, 4   ;;  %s7023_s18 = smov %s5991_s19 }
 0x46a   : > { %s7024_s19 = smov %s5995_s20  ;;  %s7025_s20 = smov %s6071_s26 }
 0x46b   : > { %s7026_s21 = smov %s6061_s23  ;;  %20 = sbr.rel (!%p18_p9) target bundleno = 6 (0x6), region = 101 }
 0x470   :  { %5621 = vsyncpa [#allocation4], 1 }
 0x471   :  { %5623 = vsyncpa [#allocation4 + $0x1], 1 }
 0x472   :  { %5624 = vsyncpa [#allocation7], 1 }
 0x473   :  { %5625 = vsyncpa [#allocation10], 1 }
 0x474   :  { %5626 = vsyncpa [#allocation5], 1 }
 0x475   :  { %5628 = vsyncpa [#allocation5 + $0x1], 1 }

</bundles_post_ra>
